<compile_context>
chip_gen: v7x
topology: tpu7x:2x2x1
jax: 0.10.0
libtpu: 0.0.40
codegen_flags: <defaults>
</compile_context>

<pallas_src>
import jax
import jax.numpy as jnp
from jax.experimental import pallas as pl
from jax.experimental.pallas import tpu as pltpu

# Small, deterministic synthetic config (CLIP text tower, shrunk).
N_CLASSES = 4          # number of prompts / classnames
CTX_LEN   = 8          # context length L
D_MODEL   = 32         # transformer width D
N_HEADS   = 4
HEAD_DIM  = D_MODEL // N_HEADS
N_LAYERS  = 2
VOCAB     = 64
EMBED_DIM = 16         # text_projection output width
DTYPE     = jnp.float32
LN_EPS    = 1e-5


def _layernorm(x, g, b, eps=LN_EPS):
    mu = jnp.mean(x, axis=-1, keepdims=True)
    var = jnp.mean((x - mu) ** 2, axis=-1, keepdims=True)
    return (x - mu) * jax.lax.rsqrt(var + eps) * g + b


# ---------------- fused Pallas kernel ----------------

def text_tower_kernel(eot_ref,                              # SMEM scalar prefetch: (N,) int32
                      x_ref, w_qkv_h_ref, b_qkv_h_ref, w_proj_h_ref,
                      w_fc_ref, w_out_ref, vecs_ref, ln_f_ref, proj_ref,
                      o_ref):
    N, L, D, H, dh = N_CLASSES, CTX_LEN, D_MODEL, N_HEADS, HEAD_DIM
    T = N * L

    x = x_ref[...]                                          # (T, D) residual stream, all prompts

    # Causal mask computed in-kernel (two iotas + compare) instead of an (L, L) HBM input.
    # -1e9 is fine in f32; if scores ever go bf16 use a dtype-aware large-negative.
    row = jax.lax.broadcasted_iota(jnp.int32, (L, L), 0)
    col = jax.lax.broadcasted_iota(jnp.int32, (L, L), 1)
    causal = jnp.where(col <= row, 0.0, -1e9).astype(jnp.float32)   # (L, L)
    scale = 1.0 / (dh ** 0.5)

    for l in range(N_LAYERS):                               # static unroll over layers
        vecs = vecs_ref[l]                                  # (7, 4D) packed vectors
        ln1_g, ln1_b = vecs[0:1, :D], vecs[1:2, :D]
        b_proj       = vecs[2:3, :D]
        ln2_g, ln2_b = vecs[3:4, :D], vecs[4:5, :D]
        b_out        = vecs[5:6, :D]
        b_fc         = vecs[6:7, :]

        # ---- multi-head causal self-attention, all prompts batched on sublanes ----
        xn = _layernorm(x, ln1_g, ln1_b)                    # (T, D)
        attn = jnp.zeros((T, D), jnp.float32)
        for h in range(H):                                  # static; weights pre-split per head
            qi = (l * 3 + 0) * H + h
            ki = (l * 3 + 1) * H + h
            vi = (l * 3 + 2) * H + h
            qh = jnp.dot(xn, w_qkv_h_ref[qi], preferred_element_type=jnp.float32) + b_qkv_h_ref[qi]
            kh = jnp.dot(xn, w_qkv_h_ref[ki], preferred_element_type=jnp.float32) + b_qkv_h_ref[ki]
            vh = jnp.dot(xn, w_qkv_h_ref[vi], preferred_element_type=jnp.float32) + b_qkv_h_ref[vi]
            qh = qh.reshape(N, L, dh)                       # sublane regroup only
            kh = kh.reshape(N, L, dh)
            vh = vh.reshape(N, L, dh)
            s = jnp.einsum('nqd,nkd->nqk', qh, kh,
                           preferred_element_type=jnp.float32) * scale + causal[None]
            p = jax.nn.softmax(s, axis=-1)
            ch = jnp.einsum('nqk,nkd->nqd', p, vh,
                            preferred_element_type=jnp.float32).reshape(T, dh)
            # accumulate this head's contribution through its row-slice of w_proj
            attn = attn + jnp.dot(ch, w_proj_h_ref[l * H + h],
                                  preferred_element_type=jnp.float32)
        x = x + attn + b_proj

        # ---- MLP with QuickGELU (x * sigmoid(1.702 x)) ----
        xn2 = _layernorm(x, ln2_g, ln2_b)
        hdn = jnp.dot(xn2, w_fc_ref[l], preferred_element_type=jnp.float32) + b_fc
        hdn = hdn * jax.nn.sigmoid(1.702 * hdn)
        x = x + jnp.dot(hdn, w_out_ref[l], preferred_element_type=jnp.float32) + b_out

    # ---- EOT gather (scalar-prefetch indices -> one-hot MXU gather) + head ----
    tcol = jax.lax.broadcasted_iota(jnp.int32, (1, T), 1)   # (1, T)
    sel = jnp.concatenate(
        [(tcol == (n * L + eot_ref[n])).astype(jnp.float32) for n in range(N)],
        axis=0)                                             # (N, T) one-hot rows
    x_eot = jnp.dot(sel, x, preferred_element_type=jnp.float32)     # (N, D)

    lnf = ln_f_ref[...]
    xf = _layernorm(x_eot, lnf[0:1, :], lnf[1:2, :])
    o_ref[...] = jnp.dot(xf, proj_ref[...], preferred_element_type=jnp.float32)


# ---------------- weight repacking ----------------

def _pack_tower(params):
    """Repack CLIP-style fused weights into kernel-friendly, lane-aligned arrays."""
    D, H, dh = D_MODEL, N_HEADS, HEAD_DIM
    w_qkv_h, b_qkv_h, w_proj_h, w_fc, w_out, vecs = [], [], [], [], [], []
    for blk in params['blocks']:
        wq, wk, wv = jnp.split(blk['w_qkv'], 3, axis=1)     # (D, D) each
        bq, bk, bv = jnp.split(blk['b_qkv'][0], 3)          # (D,) each
        for w, b in ((wq, bq), (wk, bk), (wv, bv)):
            for h in range(H):
                w_qkv_h.append(w[:, h * dh:(h + 1) * dh])          # (D, dh)
                b_qkv_h.append(b[h * dh:(h + 1) * dh][None, :])    # (1, dh)
        for h in range(H):
            w_proj_h.append(blk['w_proj'][h * dh:(h + 1) * dh, :])  # (dh, D)
        w_fc.append(blk['w_fc'])
        w_out.append(blk['w_out'])
        rows_d = [blk['ln1_g'][0], blk['ln1_b'][0], blk['b_proj'][0],
                  blk['ln2_g'][0], blk['ln2_b'][0], blk['b_out'][0]]
        vecs.append(jnp.stack([jnp.pad(r, (0, 3 * D)) for r in rows_d]
                              + [blk['b_fc'][0]]))           # (7, 4D)
    return dict(
        w_qkv_h=jnp.stack(w_qkv_h),                          # (N_LAYERS*3*H, D, dh)
        b_qkv_h=jnp.stack(b_qkv_h),                          # (N_LAYERS*3*H, 1, dh)
        w_proj_h=jnp.stack(w_proj_h),                        # (N_LAYERS*H, dh, D)
        w_fc=jnp.stack(w_fc),                                # (N_LAYERS, D, 4D)
        w_out=jnp.stack(w_out),                              # (N_LAYERS, 4D, D)
        vecs=jnp.stack(vecs),                                # (N_LAYERS, 7, 4D)
        ln_f=jnp.concatenate([params['ln_f_g'], params['ln_f_b']], axis=0),  # (2, D)
        text_proj=params['text_proj'],                       # (D, EMBED_DIM)
    )


# ---------------- wrappers ----------------

def encode_text(params, tokens):
    # Token-embedding gather + positional embedding (plain-JAX glue, tiny).
    x0 = (jnp.take(params['tok_emb'], tokens, axis=0)
          + params['pos_emb'][None]).reshape(N_CLASSES * CTX_LEN, D_MODEL)   # (N*L, D)
    # EOT token is the highest token id in each prompt (CLIP convention).
    eot = jnp.argmax(tokens, axis=-1).astype(jnp.int32)                      # (N,)

    packed = _pack_tower(params)
    T = N_CLASSES * CTX_LEN

    def full(shape):
        n = len(shape)
        return pl.BlockSpec(shape, lambda i, eot_ref, _n=n: (0,) * _n)

    grid_spec = pltpu.PrefetchScalarGridSpec(
        num_scalar_prefetch=1,
        grid=(1,),   # fully fused single step; activations + weights fit VMEM trivially
        in_specs=[
            full((T, D_MODEL)),                 # residual stream, all prompts
            full(packed['w_qkv_h'].shape),
            full(packed['b_qkv_h'].shape),
            full(packed['w_proj_h'].shape),
            full(packed['w_fc'].shape),
            full(packed['w_out'].shape),
            full(packed['vecs'].shape),
            full(packed['ln_f'].shape),
            full(packed['text_proj'].shape),
        ],
        out_specs=pl.BlockSpec((N_CLASSES, EMBED_DIM), lambda i, eot_ref: (0, 0)),
    )
    return pl.pallas_call(
        text_tower_kernel,
        out_shape=jax.ShapeDtypeStruct((N_CLASSES, EMBED_DIM), DTYPE),
        grid_spec=grid_spec,
        # NOTE: for real CLIP sizes add a leading "parallel" prompt-tile grid axis of
        # size >= 2 so both v7x TensorCores are used; at this toy size one step wins.
        compiler_params=pltpu.CompilerParams(dimension_semantics=("arbitrary",)),
    )(eot, x0, packed['w_qkv_h'], packed['b_qkv_h'], packed['w_proj_h'],
      packed['w_fc'], packed['w_out'], packed['vecs'], packed['ln_f'],
      packed['text_proj'])


def encode_text_ref(params, tokens):
    """Pure-JAX reference of the same math (correctness oracle)."""
    N, L, D, H, dh = N_CLASSES, CTX_LEN, D_MODEL, N_HEADS, HEAD_DIM
    x = jnp.take(params['tok_emb'], tokens, axis=0) + params['pos_emb'][None]   # (N, L, D)
    row = jnp.arange(L)[:, None]
    col = jnp.arange(L)[None, :]
    causal = jnp.where(col <= row, 0.0, -1e9).astype(jnp.float32)
    scale = 1.0 / (dh ** 0.5)
    for blk in params['blocks']:
        xn = _layernorm(x, blk['ln1_g'][0], blk['ln1_b'][0])
        qkv = xn @ blk['w_qkv'] + blk['b_qkv'][0]                               # (N, L, 3D)
        q, k, v = jnp.split(qkv, 3, axis=-1)
        q = q.reshape(N, L, H, dh).transpose(0, 2, 1, 3)
        k = k.reshape(N, L, H, dh).transpose(0, 2, 1, 3)
        v = v.reshape(N, L, H, dh).transpose(0, 2, 1, 3)
        s = jnp.einsum('nhqd,nhkd->nhqk', q, k) * scale + causal[None, None]
        p = jax.nn.softmax(s, axis=-1)
        c = jnp.einsum('nhqk,nhkd->nhqd', p, v).transpose(0, 2, 1, 3).reshape(N, L, D)
        x = x + c @ blk['w_proj'] + blk['b_proj'][0]
        xn2 = _layernorm(x, blk['ln2_g'][0], blk['ln2_b'][0])
        hdn = xn2 @ blk['w_fc'] + blk['b_fc'][0]
        hdn = hdn * jax.nn.sigmoid(1.702 * hdn)
        x = x + hdn @ blk['w_out'] + blk['b_out'][0]
    eot = jnp.argmax(tokens, axis=-1)
    x_eot = x[jnp.arange(N), eot]                                               # (N, D)
    xf = _layernorm(x_eot, params['ln_f_g'][0], params['ln_f_b'][0])
    return xf @ params['text_proj']


# ---------------- deterministic parameter / token construction ----------------

def init_params(key):
    keys = jax.random.split(key, 3 + N_LAYERS)
    scale = 0.02
    params = {
        'tok_emb': jax.random.normal(keys[0], (VOCAB, D_MODEL), DTYPE) * scale,
        'pos_emb': jax.random.normal(keys[1], (CTX_LEN, D_MODEL), DTYPE) * 0.01,
        'ln_f_g': jnp.ones((1, D_MODEL), DTYPE),
        'ln_f_b': jnp.zeros((1, D_MODEL), DTYPE),
        'text_proj': jax.random.normal(keys[2], (D_MODEL, EMBED_DIM), DTYPE) * scale,
        'blocks': [],
    }
    for l in range(N_LAYERS):
        k = jax.random.split(keys[3 + l], 4)
        params['blocks'].append(dict(
            ln1_g=jnp.ones((1, D_MODEL), DTYPE), ln1_b=jnp.zeros((1, D_MODEL), DTYPE),
            w_qkv=jax.random.normal(k[0], (D_MODEL, 3 * D_MODEL), DTYPE) * scale,
            b_qkv=jnp.zeros((1, 3 * D_MODEL), DTYPE),
            w_proj=jax.random.normal(k[1], (D_MODEL, D_MODEL), DTYPE) * scale,
            b_proj=jnp.zeros((1, D_MODEL), DTYPE),
            ln2_g=jnp.ones((1, D_MODEL), DTYPE), ln2_b=jnp.zeros((1, D_MODEL), DTYPE),
            w_fc=jax.random.normal(k[2], (D_MODEL, 4 * D_MODEL), DTYPE) * scale,
            b_fc=jnp.zeros((1, 4 * D_MODEL), DTYPE),
            w_out=jax.random.normal(k[3], (4 * D_MODEL, D_MODEL), DTYPE) * scale,
            b_out=jnp.zeros((1, D_MODEL), DTYPE),
        ))
    return params


def make_tokens(key):
    # TODO(synk): clip.tokenize (BPE over prompt-template strings) has no Pallas/JAX
    # equivalent; synthetic token ids with SOT=1, EOT=VOCAB-1, padding=0 are used.
    lens = jnp.array([5, 6, 4, 7])  # EOT position per prompt (< CTX_LEN)
    body = jax.random.randint(key, (N_CLASSES, CTX_LEN), 2, VOCAB - 1)
    pos = jnp.arange(CTX_LEN)[None, :]
    toks = jnp.where(pos == 0, 1, body)
    toks = jnp.where(pos == lens[:, None], VOCAB - 1, toks)
    toks = jnp.where(pos > lens[:, None], 0, toks)
    return toks.astype(jnp.int32)


if __name__ == "__main__":
    key = jax.random.PRNGKey(0)
    k_params, k_tok = jax.random.split(key)
    params = init_params(k_params)
    tokens = make_tokens(k_tok)                             # (N_CLASSES, CTX_LEN) int32

    text_features = jax.jit(encode_text)(params, tokens)    # (N_CLASSES, EMBED_DIM)
    jax.block_until_ready(text_features)

    ref = encode_text_ref(params, tokens)
    assert text_features.shape == (N_CLASSES, EMBED_DIM)
    assert jnp.all(jnp.isfinite(text_features))
    assert jnp.allclose(text_features, ref, atol=1e-3, rtol=1e-3), \
        float(jnp.max(jnp.abs(text_features - ref)))
    print("KERNEL_OK")
</pallas_src>

<mosaic_0001>
module attributes {stable_mosaic.version = 11 : i64} {
  func.func @text_tower_kernel(%arg0: i32, %arg1: memref<4xi32, #tpu.memory_space<smem>>, %arg2: memref<32x32xf32, #tpu.memory_space<vmem>>, %arg3: memref<24x32x8xf32, #tpu.memory_space<vmem>>, %arg4: memref<24x1x8xf32, #tpu.memory_space<vmem>>, %arg5: memref<8x8x32xf32, #tpu.memory_space<vmem>>, %arg6: memref<2x32x128xf32, #tpu.memory_space<vmem>>, %arg7: memref<2x128x32xf32, #tpu.memory_space<vmem>>, %arg8: memref<2x7x128xf32, #tpu.memory_space<vmem>>, %arg9: memref<2x32xf32, #tpu.memory_space<vmem>>, %arg10: memref<32x16xf32, #tpu.memory_space<vmem>>, %arg11: memref<4x16xf32, #tpu.memory_space<vmem>>) attributes {dimension_semantics = [#tpu.dimension_semantics<arbitrary>], iteration_bounds = array<i64: 1>, scalar_prefetch = 1 : i64, scratch_operands = 0 : i64, tpu.core_type = #tpu.core_type<tc>, window_params = [{pipeline_mode = #tpu.pipeline_mode<synchronous>, transform_indices = @transform_0, window_bounds = array<i64: 32, 32>}, {pipeline_mode = #tpu.pipeline_mode<synchronous>, transform_indices = @transform_1, window_bounds = array<i64: 24, 32, 8>}, {pipeline_mode = #tpu.pipeline_mode<synchronous>, transform_indices = @transform_2, window_bounds = array<i64: 24, 1, 8>}, {pipeline_mode = #tpu.pipeline_mode<synchronous>, transform_indices = @transform_3, window_bounds = array<i64: 8, 8, 32>}, {pipeline_mode = #tpu.pipeline_mode<synchronous>, transform_indices = @transform_4, window_bounds = array<i64: 2, 32, 128>}, {pipeline_mode = #tpu.pipeline_mode<synchronous>, transform_indices = @transform_5, window_bounds = array<i64: 2, 128, 32>}, {pipeline_mode = #tpu.pipeline_mode<synchronous>, transform_indices = @transform_6, window_bounds = array<i64: 2, 7, 128>}, {pipeline_mode = #tpu.pipeline_mode<synchronous>, transform_indices = @transform_7, window_bounds = array<i64: 2, 32>}, {pipeline_mode = #tpu.pipeline_mode<synchronous>, transform_indices = @transform_8, window_bounds = array<i64: 32, 16>}, {pipeline_mode = #tpu.pipeline_mode<synchronous>, transform_indices = @transform_9, window_bounds = array<i64: 4, 16>}]} {
    %c0 = arith.constant 0 : index
    %c0_0 = arith.constant 0 : index
    %0 = vector.load %arg2[%c0, %c0_0] : memref<32x32xf32, #tpu.memory_space<vmem>>, vector<32x32xf32>
    %1 = tpu.iota {dimensions = array<i32: 0>} : vector<8x8xi32>
    %2 = tpu.iota {dimensions = array<i32: 1>} : vector<8x8xi32>
    %3 = arith.cmpi sle, %2, %1 : vector<8x8xi32>
    %cst = arith.constant 0.000000e+00 : f32
    %cst_1 = arith.constant -1.000000e+09 : f32
    %4 = vector.broadcast %cst : f32 to vector<8x8xf32>
    %5 = vector.broadcast %cst_1 : f32 to vector<8x8xf32>
    %6 = arith.select %3, %4, %5 : vector<8x8xi1>, vector<8x8xf32>
    %c0_2 = arith.constant 0 : index
    %c0_3 = arith.constant 0 : index
    %c0_4 = arith.constant 0 : index
    %7 = vector.load %arg8[%c0_2, %c0_3, %c0_4] : memref<2x7x128xf32, #tpu.memory_space<vmem>>, vector<1x7x128xf32>
    %8 = vector.shape_cast %7 : vector<1x7x128xf32> to vector<7x128xf32>
    %9 = vector.extract_strided_slice %8 {offsets = [0, 0], sizes = [1, 32], strides = [1, 1]} : vector<7x128xf32> to vector<1x32xf32>
    %10 = vector.extract_strided_slice %8 {offsets = [1, 0], sizes = [1, 32], strides = [1, 1]} : vector<7x128xf32> to vector<1x32xf32>
    %11 = vector.extract_strided_slice %8 {offsets = [2, 0], sizes = [1, 32], strides = [1, 1]} : vector<7x128xf32> to vector<1x32xf32>
    %12 = vector.extract_strided_slice %8 {offsets = [3, 0], sizes = [1, 32], strides = [1, 1]} : vector<7x128xf32> to vector<1x32xf32>
    %13 = vector.extract_strided_slice %8 {offsets = [4, 0], sizes = [1, 32], strides = [1, 1]} : vector<7x128xf32> to vector<1x32xf32>
    %14 = vector.extract_strided_slice %8 {offsets = [5, 0], sizes = [1, 32], strides = [1, 1]} : vector<7x128xf32> to vector<1x32xf32>
    %15 = vector.extract_strided_slice %8 {offsets = [6, 0], sizes = [1, 128], strides = [1, 1]} : vector<7x128xf32> to vector<1x128xf32>
    %cst_5 = arith.constant dense<0.000000e+00> : vector<32xf32>
    %16 = vector.multi_reduction <add>, %0, %cst_5 [1] : vector<32x32xf32> to vector<32xf32>
    %17 = vector.shape_cast %16 : vector<32xf32> to vector<32x1xf32>
    %cst_6 = arith.constant 3.200000e+01 : f32
    %18 = vector.broadcast %cst_6 : f32 to vector<32x1xf32>
    %19 = arith.divf %17, %18 : vector<32x1xf32>
    %20 = vector.broadcast %19 : vector<32x1xf32> to vector<32x32xf32>
    %21 = arith.subf %0, %20 : vector<32x32xf32>
    %22 = arith.mulf %21, %21 : vector<32x32xf32>
    %cst_7 = arith.constant dense<0.000000e+00> : vector<32xf32>
    %23 = vector.multi_reduction <add>, %22, %cst_7 [1] : vector<32x32xf32> to vector<32xf32>
    %24 = vector.shape_cast %23 : vector<32xf32> to vector<32x1xf32>
    %cst_8 = arith.constant 3.200000e+01 : f32
    %25 = vector.broadcast %cst_8 : f32 to vector<32x1xf32>
    %26 = arith.divf %24, %25 : vector<32x1xf32>
    %27 = vector.broadcast %19 : vector<32x1xf32> to vector<32x32xf32>
    %28 = arith.subf %0, %27 : vector<32x32xf32>
    %cst_9 = arith.constant 9.99999974E-6 : f32
    %29 = vector.broadcast %cst_9 : f32 to vector<32x1xf32>
    %30 = arith.addf %26, %29 : vector<32x1xf32>
    %31 = math.rsqrt %30 : vector<32x1xf32>
    %32 = vector.broadcast %31 : vector<32x1xf32> to vector<32x32xf32>
    %33 = arith.mulf %28, %32 : vector<32x32xf32>
    %34 = vector.broadcast %9 : vector<1x32xf32> to vector<32x32xf32>
    %35 = arith.mulf %33, %34 : vector<32x32xf32>
    %36 = vector.broadcast %10 : vector<1x32xf32> to vector<32x32xf32>
    %37 = arith.addf %35, %36 : vector<32x32xf32>
    %cst_10 = arith.constant 0.000000e+00 : f32
    %38 = vector.broadcast %cst_10 : f32 to vector<32x32xf32>
    %c0_11 = arith.constant 0 : index
    %c0_12 = arith.constant 0 : index
    %c0_13 = arith.constant 0 : index
    %39 = vector.load %arg3[%c0_11, %c0_12, %c0_13] : memref<24x32x8xf32, #tpu.memory_space<vmem>>, vector<1x32x8xf32>
    %40 = vector.shape_cast %39 : vector<1x32x8xf32> to vector<32x8xf32>
    %cst_14 = arith.constant dense<0.000000e+00> : vector<32x8xf32>
    %41 = tpu.matmul %37, %40, %cst_14 {dimension_numbers = #tpu.dot_dimension_numbers<[1], [0], [0], [1], [0, 0, 1, 1], [], []>} : vector<32x32xf32>, vector<32x8xf32>, vector<32x8xf32> -> vector<32x8xf32>
    %c0_15 = arith.constant 0 : index
    %c0_16 = arith.constant 0 : index
    %c0_17 = arith.constant 0 : index
    %42 = vector.load %arg4[%c0_15, %c0_16, %c0_17] : memref<24x1x8xf32, #tpu.memory_space<vmem>>, vector<1x1x8xf32>
    %43 = vector.shape_cast %42 : vector<1x1x8xf32> to vector<1x8xf32>
    %44 = vector.broadcast %43 : vector<1x8xf32> to vector<32x8xf32>
    %45 = arith.addf %41, %44 : vector<32x8xf32>
    %c4 = arith.constant 4 : index
    %c0_18 = arith.constant 0 : index
    %c0_19 = arith.constant 0 : index
    %46 = vector.load %arg3[%c4, %c0_18, %c0_19] : memref<24x32x8xf32, #tpu.memory_space<vmem>>, vector<1x32x8xf32>
    %47 = vector.shape_cast %46 : vector<1x32x8xf32> to vector<32x8xf32>
    %cst_20 = arith.constant dense<0.000000e+00> : vector<32x8xf32>
    %48 = tpu.matmul %37, %47, %cst_20 {dimension_numbers = #tpu.dot_dimension_numbers<[1], [0], [0], [1], [0, 0, 1, 1], [], []>} : vector<32x32xf32>, vector<32x8xf32>, vector<32x8xf32> -> vector<32x8xf32>
    %c4_21 = arith.constant 4 : index
    %c0_22 = arith.constant 0 : index
    %c0_23 = arith.constant 0 : index
    %49 = vector.load %arg4[%c4_21, %c0_22, %c0_23] : memref<24x1x8xf32, #tpu.memory_space<vmem>>, vector<1x1x8xf32>
    %50 = vector.shape_cast %49 : vector<1x1x8xf32> to vector<1x8xf32>
    %51 = vector.broadcast %50 : vector<1x8xf32> to vector<32x8xf32>
    %52 = arith.addf %48, %51 : vector<32x8xf32>
    %c8 = arith.constant 8 : index
    %c0_24 = arith.constant 0 : index
    %c0_25 = arith.constant 0 : index
    %53 = vector.load %arg3[%c8, %c0_24, %c0_25] : memref<24x32x8xf32, #tpu.memory_space<vmem>>, vector<1x32x8xf32>
    %54 = vector.shape_cast %53 : vector<1x32x8xf32> to vector<32x8xf32>
    %cst_26 = arith.constant dense<0.000000e+00> : vector<32x8xf32>
    %55 = tpu.matmul %37, %54, %cst_26 {dimension_numbers = #tpu.dot_dimension_numbers<[1], [0], [0], [1], [0, 0, 1, 1], [], []>} : vector<32x32xf32>, vector<32x8xf32>, vector<32x8xf32> -> vector<32x8xf32>
    %c8_27 = arith.constant 8 : index
    %c0_28 = arith.constant 0 : index
    %c0_29 = arith.constant 0 : index
    %56 = vector.load %arg4[%c8_27, %c0_28, %c0_29] : memref<24x1x8xf32, #tpu.memory_space<vmem>>, vector<1x1x8xf32>
    %57 = vector.shape_cast %56 : vector<1x1x8xf32> to vector<1x8xf32>
    %58 = vector.broadcast %57 : vector<1x8xf32> to vector<32x8xf32>
    %59 = arith.addf %55, %58 : vector<32x8xf32>
    %60 = vector.shape_cast %45 : vector<32x8xf32> to vector<4x8x8xf32>
    %61 = vector.shape_cast %52 : vector<32x8xf32> to vector<4x8x8xf32>
    %62 = vector.shape_cast %59 : vector<32x8xf32> to vector<4x8x8xf32>
    "tpu.trace_start"() <{level = 10 : i32, message = "nqd,nkd->nqk"}> : () -> ()
    %cst_30 = arith.constant dense<0.000000e+00> : vector<4x8x8xf32>
    %63 = tpu.matmul %60, %61, %cst_30 {dimension_numbers = #tpu.dot_dimension_numbers<[2], [2], [1], [1], [0, 0, 0, 1, 1, 1], [0], [0]>} : vector<4x8x8xf32>, vector<4x8x8xf32>, vector<4x8x8xf32> -> vector<4x8x8xf32>
    "tpu.trace_stop"() : () -> ()
    %cst_31 = arith.constant 0.353553385 : f32
    %64 = vector.broadcast %cst_31 : f32 to vector<4x8x8xf32>
    %65 = arith.mulf %63, %64 : vector<4x8x8xf32>
    %66 = vector.shape_cast %6 : vector<8x8xf32> to vector<1x8x8xf32>
    %67 = vector.broadcast %66 : vector<1x8x8xf32> to vector<4x8x8xf32>
    %68 = arith.addf %65, %67 : vector<4x8x8xf32>
    %cst_32 = arith.constant dense<0xFF800000> : vector<4x8xf32>
    %69 = vector.multi_reduction <maximumf>, %68, %cst_32 [2] : vector<4x8x8xf32> to vector<4x8xf32>
    %cst_33 = arith.constant 0xFF800000 : f32
    %70 = vector.broadcast %cst_33 : f32 to vector<4x8xf32>
    %71 = arith.maximumf %70, %69 : vector<4x8xf32>
    %72 = vector.shape_cast %71 : vector<4x8xf32> to vector<4x8x1xf32>
    %73 = vector.broadcast %72 : vector<4x8x1xf32> to vector<4x8x8xf32>
    %74 = arith.subf %68, %73 : vector<4x8x8xf32>
    %75 = math.exp %74 : vector<4x8x8xf32>
    %cst_34 = arith.constant dense<0.000000e+00> : vector<4x8xf32>
    %76 = vector.multi_reduction <add>, %75, %cst_34 [2] : vector<4x8x8xf32> to vector<4x8xf32>
    %77 = vector.shape_cast %76 : vector<4x8xf32> to vector<4x8x1xf32>
    %78 = vector.broadcast %77 : vector<4x8x1xf32> to vector<4x8x8xf32>
    %79 = arith.divf %75, %78 : vector<4x8x8xf32>
    "tpu.trace_start"() <{level = 10 : i32, message = "nqk,nkd->nqd"}> : () -> ()
    %cst_35 = arith.constant dense<0.000000e+00> : vector<4x8x8xf32>
    %80 = tpu.matmul %79, %62, %cst_35 {dimension_numbers = #tpu.dot_dimension_numbers<[2], [1], [1], [2], [0, 0, 0, 1, 1, 2], [0], [0]>} : vector<4x8x8xf32>, vector<4x8x8xf32>, vector<4x8x8xf32> -> vector<4x8x8xf32>
    "tpu.trace_stop"() : () -> ()
    %81 = vector.shape_cast %80 : vector<4x8x8xf32> to vector<32x8xf32>
    %c0_36 = arith.constant 0 : index
    %c0_37 = arith.constant 0 : index
    %c0_38 = arith.constant 0 : index
    %82 = vector.load %arg5[%c0_36, %c0_37, %c0_38] : memref<8x8x32xf32, #tpu.memory_space<vmem>>, vector<1x8x32xf32>
    %83 = vector.shape_cast %82 : vector<1x8x32xf32> to vector<8x32xf32>
    %cst_39 = arith.constant dense<0.000000e+00> : vector<32x32xf32>
    %84 = tpu.matmul %81, %83, %cst_39 {dimension_numbers = #tpu.dot_dimension_numbers<[1], [0], [0], [1], [0, 0, 1, 1], [], []>} : vector<32x8xf32>, vector<8x32xf32>, vector<32x32xf32> -> vector<32x32xf32>
    %85 = arith.addf %38, %84 : vector<32x32xf32>
    %c1 = arith.constant 1 : index
    %c0_40 = arith.constant 0 : index
    %c0_41 = arith.constant 0 : index
    %86 = vector.load %arg3[%c1, %c0_40, %c0_41] : memref<24x32x8xf32, #tpu.memory_space<vmem>>, vector<1x32x8xf32>
    %87 = vector.shape_cast %86 : vector<1x32x8xf32> to vector<32x8xf32>
    %cst_42 = arith.constant dense<0.000000e+00> : vector<32x8xf32>
    %88 = tpu.matmul %37, %87, %cst_42 {dimension_numbers = #tpu.dot_dimension_numbers<[1], [0], [0], [1], [0, 0, 1, 1], [], []>} : vector<32x32xf32>, vector<32x8xf32>, vector<32x8xf32> -> vector<32x8xf32>
    %c1_43 = arith.constant 1 : index
    %c0_44 = arith.constant 0 : index
    %c0_45 = arith.constant 0 : index
    %89 = vector.load %arg4[%c1_43, %c0_44, %c0_45] : memref<24x1x8xf32, #tpu.memory_space<vmem>>, vector<1x1x8xf32>
    %90 = vector.shape_cast %89 : vector<1x1x8xf32> to vector<1x8xf32>
    %91 = vector.broadcast %90 : vector<1x8xf32> to vector<32x8xf32>
    %92 = arith.addf %88, %91 : vector<32x8xf32>
    %c5 = arith.constant 5 : index
    %c0_46 = arith.constant 0 : index
    %c0_47 = arith.constant 0 : index
    %93 = vector.load %arg3[%c5, %c0_46, %c0_47] : memref<24x32x8xf32, #tpu.memory_space<vmem>>, vector<1x32x8xf32>
    %94 = vector.shape_cast %93 : vector<1x32x8xf32> to vector<32x8xf32>
    %cst_48 = arith.constant dense<0.000000e+00> : vector<32x8xf32>
    %95 = tpu.matmul %37, %94, %cst_48 {dimension_numbers = #tpu.dot_dimension_numbers<[1], [0], [0], [1], [0, 0, 1, 1], [], []>} : vector<32x32xf32>, vector<32x8xf32>, vector<32x8xf32> -> vector<32x8xf32>
    %c5_49 = arith.constant 5 : index
    %c0_50 = arith.constant 0 : index
    %c0_51 = arith.constant 0 : index
    %96 = vector.load %arg4[%c5_49, %c0_50, %c0_51] : memref<24x1x8xf32, #tpu.memory_space<vmem>>, vector<1x1x8xf32>
    %97 = vector.shape_cast %96 : vector<1x1x8xf32> to vector<1x8xf32>
    %98 = vector.broadcast %97 : vector<1x8xf32> to vector<32x8xf32>
    %99 = arith.addf %95, %98 : vector<32x8xf32>
    %c9 = arith.constant 9 : index
    %c0_52 = arith.constant 0 : index
    %c0_53 = arith.constant 0 : index
    %100 = vector.load %arg3[%c9, %c0_52, %c0_53] : memref<24x32x8xf32, #tpu.memory_space<vmem>>, vector<1x32x8xf32>
    %101 = vector.shape_cast %100 : vector<1x32x8xf32> to vector<32x8xf32>
    %cst_54 = arith.constant dense<0.000000e+00> : vector<32x8xf32>
    %102 = tpu.matmul %37, %101, %cst_54 {dimension_numbers = #tpu.dot_dimension_numbers<[1], [0], [0], [1], [0, 0, 1, 1], [], []>} : vector<32x32xf32>, vector<32x8xf32>, vector<32x8xf32> -> vector<32x8xf32>
    %c9_55 = arith.constant 9 : index
    %c0_56 = arith.constant 0 : index
    %c0_57 = arith.constant 0 : index
    %103 = vector.load %arg4[%c9_55, %c0_56, %c0_57] : memref<24x1x8xf32, #tpu.memory_space<vmem>>, vector<1x1x8xf32>
    %104 = vector.shape_cast %103 : vector<1x1x8xf32> to vector<1x8xf32>
    %105 = vector.broadcast %104 : vector<1x8xf32> to vector<32x8xf32>
    %106 = arith.addf %102, %105 : vector<32x8xf32>
    %107 = vector.shape_cast %92 : vector<32x8xf32> to vector<4x8x8xf32>
    %108 = vector.shape_cast %99 : vector<32x8xf32> to vector<4x8x8xf32>
    %109 = vector.shape_cast %106 : vector<32x8xf32> to vector<4x8x8xf32>
    "tpu.trace_start"() <{level = 10 : i32, message = "nqd,nkd->nqk"}> : () -> ()
    %cst_58 = arith.constant dense<0.000000e+00> : vector<4x8x8xf32>
    %110 = tpu.matmul %107, %108, %cst_58 {dimension_numbers = #tpu.dot_dimension_numbers<[2], [2], [1], [1], [0, 0, 0, 1, 1, 1], [0], [0]>} : vector<4x8x8xf32>, vector<4x8x8xf32>, vector<4x8x8xf32> -> vector<4x8x8xf32>
    "tpu.trace_stop"() : () -> ()
    %cst_59 = arith.constant 0.353553385 : f32
    %111 = vector.broadcast %cst_59 : f32 to vector<4x8x8xf32>
    %112 = arith.mulf %110, %111 : vector<4x8x8xf32>
    %113 = vector.shape_cast %6 : vector<8x8xf32> to vector<1x8x8xf32>
    %114 = vector.broadcast %113 : vector<1x8x8xf32> to vector<4x8x8xf32>
    %115 = arith.addf %112, %114 : vector<4x8x8xf32>
    %cst_60 = arith.constant dense<0xFF800000> : vector<4x8xf32>
    %116 = vector.multi_reduction <maximumf>, %115, %cst_60 [2] : vector<4x8x8xf32> to vector<4x8xf32>
    %cst_61 = arith.constant 0xFF800000 : f32
    %117 = vector.broadcast %cst_61 : f32 to vector<4x8xf32>
    %118 = arith.maximumf %117, %116 : vector<4x8xf32>
    %119 = vector.shape_cast %118 : vector<4x8xf32> to vector<4x8x1xf32>
    %120 = vector.broadcast %119 : vector<4x8x1xf32> to vector<4x8x8xf32>
    %121 = arith.subf %115, %120 : vector<4x8x8xf32>
    %122 = math.exp %121 : vector<4x8x8xf32>
    %cst_62 = arith.constant dense<0.000000e+00> : vector<4x8xf32>
    %123 = vector.multi_reduction <add>, %122, %cst_62 [2] : vector<4x8x8xf32> to vector<4x8xf32>
    %124 = vector.shape_cast %123 : vector<4x8xf32> to vector<4x8x1xf32>
    %125 = vector.broadcast %124 : vector<4x8x1xf32> to vector<4x8x8xf32>
    %126 = arith.divf %122, %125 : vector<4x8x8xf32>
    "tpu.trace_start"() <{level = 10 : i32, message = "nqk,nkd->nqd"}> : () -> ()
    %cst_63 = arith.constant dense<0.000000e+00> : vector<4x8x8xf32>
    %127 = tpu.matmul %126, %109, %cst_63 {dimension_numbers = #tpu.dot_dimension_numbers<[2], [1], [1], [2], [0, 0, 0, 1, 1, 2], [0], [0]>} : vector<4x8x8xf32>, vector<4x8x8xf32>, vector<4x8x8xf32> -> vector<4x8x8xf32>
    "tpu.trace_stop"() : () -> ()
    %128 = vector.shape_cast %127 : vector<4x8x8xf32> to vector<32x8xf32>
    %c1_64 = arith.constant 1 : index
    %c0_65 = arith.constant 0 : index
    %c0_66 = arith.constant 0 : index
    %129 = vector.load %arg5[%c1_64, %c0_65, %c0_66] : memref<8x8x32xf32, #tpu.memory_space<vmem>>, vector<1x8x32xf32>
    %130 = vector.shape_cast %129 : vector<1x8x32xf32> to vector<8x32xf32>
    %cst_67 = arith.constant dense<0.000000e+00> : vector<32x32xf32>
    %131 = tpu.matmul %128, %130, %cst_67 {dimension_numbers = #tpu.dot_dimension_numbers<[1], [0], [0], [1], [0, 0, 1, 1], [], []>} : vector<32x8xf32>, vector<8x32xf32>, vector<32x32xf32> -> vector<32x32xf32>
    %132 = arith.addf %85, %131 : vector<32x32xf32>
    %c2 = arith.constant 2 : index
    %c0_68 = arith.constant 0 : index
    %c0_69 = arith.constant 0 : index
    %133 = vector.load %arg3[%c2, %c0_68, %c0_69] : memref<24x32x8xf32, #tpu.memory_space<vmem>>, vector<1x32x8xf32>
    %134 = vector.shape_cast %133 : vector<1x32x8xf32> to vector<32x8xf32>
    %cst_70 = arith.constant dense<0.000000e+00> : vector<32x8xf32>
    %135 = tpu.matmul %37, %134, %cst_70 {dimension_numbers = #tpu.dot_dimension_numbers<[1], [0], [0], [1], [0, 0, 1, 1], [], []>} : vector<32x32xf32>, vector<32x8xf32>, vector<32x8xf32> -> vector<32x8xf32>
    %c2_71 = arith.constant 2 : index
    %c0_72 = arith.constant 0 : index
    %c0_73 = arith.constant 0 : index
    %136 = vector.load %arg4[%c2_71, %c0_72, %c0_73] : memref<24x1x8xf32, #tpu.memory_space<vmem>>, vector<1x1x8xf32>
    %137 = vector.shape_cast %136 : vector<1x1x8xf32> to vector<1x8xf32>
    %138 = vector.broadcast %137 : vector<1x8xf32> to vector<32x8xf32>
    %139 = arith.addf %135, %138 : vector<32x8xf32>
    %c6 = arith.constant 6 : index
    %c0_74 = arith.constant 0 : index
    %c0_75 = arith.constant 0 : index
    %140 = vector.load %arg3[%c6, %c0_74, %c0_75] : memref<24x32x8xf32, #tpu.memory_space<vmem>>, vector<1x32x8xf32>
    %141 = vector.shape_cast %140 : vector<1x32x8xf32> to vector<32x8xf32>
    %cst_76 = arith.constant dense<0.000000e+00> : vector<32x8xf32>
    %142 = tpu.matmul %37, %141, %cst_76 {dimension_numbers = #tpu.dot_dimension_numbers<[1], [0], [0], [1], [0, 0, 1, 1], [], []>} : vector<32x32xf32>, vector<32x8xf32>, vector<32x8xf32> -> vector<32x8xf32>
    %c6_77 = arith.constant 6 : index
    %c0_78 = arith.constant 0 : index
    %c0_79 = arith.constant 0 : index
    %143 = vector.load %arg4[%c6_77, %c0_78, %c0_79] : memref<24x1x8xf32, #tpu.memory_space<vmem>>, vector<1x1x8xf32>
    %144 = vector.shape_cast %143 : vector<1x1x8xf32> to vector<1x8xf32>
    %145 = vector.broadcast %144 : vector<1x8xf32> to vector<32x8xf32>
    %146 = arith.addf %142, %145 : vector<32x8xf32>
    %c10 = arith.constant 10 : index
    %c0_80 = arith.constant 0 : index
    %c0_81 = arith.constant 0 : index
    %147 = vector.load %arg3[%c10, %c0_80, %c0_81] : memref<24x32x8xf32, #tpu.memory_space<vmem>>, vector<1x32x8xf32>
    %148 = vector.shape_cast %147 : vector<1x32x8xf32> to vector<32x8xf32>
    %cst_82 = arith.constant dense<0.000000e+00> : vector<32x8xf32>
    %149 = tpu.matmul %37, %148, %cst_82 {dimension_numbers = #tpu.dot_dimension_numbers<[1], [0], [0], [1], [0, 0, 1, 1], [], []>} : vector<32x32xf32>, vector<32x8xf32>, vector<32x8xf32> -> vector<32x8xf32>
    %c10_83 = arith.constant 10 : index
    %c0_84 = arith.constant 0 : index
    %c0_85 = arith.constant 0 : index
    %150 = vector.load %arg4[%c10_83, %c0_84, %c0_85] : memref<24x1x8xf32, #tpu.memory_space<vmem>>, vector<1x1x8xf32>
    %151 = vector.shape_cast %150 : vector<1x1x8xf32> to vector<1x8xf32>
    %152 = vector.broadcast %151 : vector<1x8xf32> to vector<32x8xf32>
    %153 = arith.addf %149, %152 : vector<32x8xf32>
    %154 = vector.shape_cast %139 : vector<32x8xf32> to vector<4x8x8xf32>
    %155 = vector.shape_cast %146 : vector<32x8xf32> to vector<4x8x8xf32>
    %156 = vector.shape_cast %153 : vector<32x8xf32> to vector<4x8x8xf32>
    "tpu.trace_start"() <{level = 10 : i32, message = "nqd,nkd->nqk"}> : () -> ()
    %cst_86 = arith.constant dense<0.000000e+00> : vector<4x8x8xf32>
    %157 = tpu.matmul %154, %155, %cst_86 {dimension_numbers = #tpu.dot_dimension_numbers<[2], [2], [1], [1], [0, 0, 0, 1, 1, 1], [0], [0]>} : vector<4x8x8xf32>, vector<4x8x8xf32>, vector<4x8x8xf32> -> vector<4x8x8xf32>
    "tpu.trace_stop"() : () -> ()
    %cst_87 = arith.constant 0.353553385 : f32
    %158 = vector.broadcast %cst_87 : f32 to vector<4x8x8xf32>
    %159 = arith.mulf %157, %158 : vector<4x8x8xf32>
    %160 = vector.shape_cast %6 : vector<8x8xf32> to vector<1x8x8xf32>
    %161 = vector.broadcast %160 : vector<1x8x8xf32> to vector<4x8x8xf32>
    %162 = arith.addf %159, %161 : vector<4x8x8xf32>
    %cst_88 = arith.constant dense<0xFF800000> : vector<4x8xf32>
    %163 = vector.multi_reduction <maximumf>, %162, %cst_88 [2] : vector<4x8x8xf32> to vector<4x8xf32>
    %cst_89 = arith.constant 0xFF800000 : f32
    %164 = vector.broadcast %cst_89 : f32 to vector<4x8xf32>
    %165 = arith.maximumf %164, %163 : vector<4x8xf32>
    %166 = vector.shape_cast %165 : vector<4x8xf32> to vector<4x8x1xf32>
    %167 = vector.broadcast %166 : vector<4x8x1xf32> to vector<4x8x8xf32>
    %168 = arith.subf %162, %167 : vector<4x8x8xf32>
    %169 = math.exp %168 : vector<4x8x8xf32>
    %cst_90 = arith.constant dense<0.000000e+00> : vector<4x8xf32>
    %170 = vector.multi_reduction <add>, %169, %cst_90 [2] : vector<4x8x8xf32> to vector<4x8xf32>
    %171 = vector.shape_cast %170 : vector<4x8xf32> to vector<4x8x1xf32>
    %172 = vector.broadcast %171 : vector<4x8x1xf32> to vector<4x8x8xf32>
    %173 = arith.divf %169, %172 : vector<4x8x8xf32>
    "tpu.trace_start"() <{level = 10 : i32, message = "nqk,nkd->nqd"}> : () -> ()
    %cst_91 = arith.constant dense<0.000000e+00> : vector<4x8x8xf32>
    %174 = tpu.matmul %173, %156, %cst_91 {dimension_numbers = #tpu.dot_dimension_numbers<[2], [1], [1], [2], [0, 0, 0, 1, 1, 2], [0], [0]>} : vector<4x8x8xf32>, vector<4x8x8xf32>, vector<4x8x8xf32> -> vector<4x8x8xf32>
    "tpu.trace_stop"() : () -> ()
    %175 = vector.shape_cast %174 : vector<4x8x8xf32> to vector<32x8xf32>
    %c2_92 = arith.constant 2 : index
    %c0_93 = arith.constant 0 : index
    %c0_94 = arith.constant 0 : index
    %176 = vector.load %arg5[%c2_92, %c0_93, %c0_94] : memref<8x8x32xf32, #tpu.memory_space<vmem>>, vector<1x8x32xf32>
    %177 = vector.shape_cast %176 : vector<1x8x32xf32> to vector<8x32xf32>
    %cst_95 = arith.constant dense<0.000000e+00> : vector<32x32xf32>
    %178 = tpu.matmul %175, %177, %cst_95 {dimension_numbers = #tpu.dot_dimension_numbers<[1], [0], [0], [1], [0, 0, 1, 1], [], []>} : vector<32x8xf32>, vector<8x32xf32>, vector<32x32xf32> -> vector<32x32xf32>
    %179 = arith.addf %132, %178 : vector<32x32xf32>
    %c3 = arith.constant 3 : index
    %c0_96 = arith.constant 0 : index
    %c0_97 = arith.constant 0 : index
    %180 = vector.load %arg3[%c3, %c0_96, %c0_97] : memref<24x32x8xf32, #tpu.memory_space<vmem>>, vector<1x32x8xf32>
    %181 = vector.shape_cast %180 : vector<1x32x8xf32> to vector<32x8xf32>
    %cst_98 = arith.constant dense<0.000000e+00> : vector<32x8xf32>
    %182 = tpu.matmul %37, %181, %cst_98 {dimension_numbers = #tpu.dot_dimension_numbers<[1], [0], [0], [1], [0, 0, 1, 1], [], []>} : vector<32x32xf32>, vector<32x8xf32>, vector<32x8xf32> -> vector<32x8xf32>
    %c3_99 = arith.constant 3 : index
    %c0_100 = arith.constant 0 : index
    %c0_101 = arith.constant 0 : index
    %183 = vector.load %arg4[%c3_99, %c0_100, %c0_101] : memref<24x1x8xf32, #tpu.memory_space<vmem>>, vector<1x1x8xf32>
    %184 = vector.shape_cast %183 : vector<1x1x8xf32> to vector<1x8xf32>
    %185 = vector.broadcast %184 : vector<1x8xf32> to vector<32x8xf32>
    %186 = arith.addf %182, %185 : vector<32x8xf32>
    %c7 = arith.constant 7 : index
    %c0_102 = arith.constant 0 : index
    %c0_103 = arith.constant 0 : index
    %187 = vector.load %arg3[%c7, %c0_102, %c0_103] : memref<24x32x8xf32, #tpu.memory_space<vmem>>, vector<1x32x8xf32>
    %188 = vector.shape_cast %187 : vector<1x32x8xf32> to vector<32x8xf32>
    %cst_104 = arith.constant dense<0.000000e+00> : vector<32x8xf32>
    %189 = tpu.matmul %37, %188, %cst_104 {dimension_numbers = #tpu.dot_dimension_numbers<[1], [0], [0], [1], [0, 0, 1, 1], [], []>} : vector<32x32xf32>, vector<32x8xf32>, vector<32x8xf32> -> vector<32x8xf32>
    %c7_105 = arith.constant 7 : index
    %c0_106 = arith.constant 0 : index
    %c0_107 = arith.constant 0 : index
    %190 = vector.load %arg4[%c7_105, %c0_106, %c0_107] : memref<24x1x8xf32, #tpu.memory_space<vmem>>, vector<1x1x8xf32>
    %191 = vector.shape_cast %190 : vector<1x1x8xf32> to vector<1x8xf32>
    %192 = vector.broadcast %191 : vector<1x8xf32> to vector<32x8xf32>
    %193 = arith.addf %189, %192 : vector<32x8xf32>
    %c11 = arith.constant 11 : index
    %c0_108 = arith.constant 0 : index
    %c0_109 = arith.constant 0 : index
    %194 = vector.load %arg3[%c11, %c0_108, %c0_109] : memref<24x32x8xf32, #tpu.memory_space<vmem>>, vector<1x32x8xf32>
    %195 = vector.shape_cast %194 : vector<1x32x8xf32> to vector<32x8xf32>
    %cst_110 = arith.constant dense<0.000000e+00> : vector<32x8xf32>
    %196 = tpu.matmul %37, %195, %cst_110 {dimension_numbers = #tpu.dot_dimension_numbers<[1], [0], [0], [1], [0, 0, 1, 1], [], []>} : vector<32x32xf32>, vector<32x8xf32>, vector<32x8xf32> -> vector<32x8xf32>
    %c11_111 = arith.constant 11 : index
    %c0_112 = arith.constant 0 : index
    %c0_113 = arith.constant 0 : index
    %197 = vector.load %arg4[%c11_111, %c0_112, %c0_113] : memref<24x1x8xf32, #tpu.memory_space<vmem>>, vector<1x1x8xf32>
    %198 = vector.shape_cast %197 : vector<1x1x8xf32> to vector<1x8xf32>
    %199 = vector.broadcast %198 : vector<1x8xf32> to vector<32x8xf32>
    %200 = arith.addf %196, %199 : vector<32x8xf32>
    %201 = vector.shape_cast %186 : vector<32x8xf32> to vector<4x8x8xf32>
    %202 = vector.shape_cast %193 : vector<32x8xf32> to vector<4x8x8xf32>
    %203 = vector.shape_cast %200 : vector<32x8xf32> to vector<4x8x8xf32>
    "tpu.trace_start"() <{level = 10 : i32, message = "nqd,nkd->nqk"}> : () -> ()
    %cst_114 = arith.constant dense<0.000000e+00> : vector<4x8x8xf32>
    %204 = tpu.matmul %201, %202, %cst_114 {dimension_numbers = #tpu.dot_dimension_numbers<[2], [2], [1], [1], [0, 0, 0, 1, 1, 1], [0], [0]>} : vector<4x8x8xf32>, vector<4x8x8xf32>, vector<4x8x8xf32> -> vector<4x8x8xf32>
    "tpu.trace_stop"() : () -> ()
    %cst_115 = arith.constant 0.353553385 : f32
    %205 = vector.broadcast %cst_115 : f32 to vector<4x8x8xf32>
    %206 = arith.mulf %204, %205 : vector<4x8x8xf32>
    %207 = vector.shape_cast %6 : vector<8x8xf32> to vector<1x8x8xf32>
    %208 = vector.broadcast %207 : vector<1x8x8xf32> to vector<4x8x8xf32>
    %209 = arith.addf %206, %208 : vector<4x8x8xf32>
    %cst_116 = arith.constant dense<0xFF800000> : vector<4x8xf32>
    %210 = vector.multi_reduction <maximumf>, %209, %cst_116 [2] : vector<4x8x8xf32> to vector<4x8xf32>
    %cst_117 = arith.constant 0xFF800000 : f32
    %211 = vector.broadcast %cst_117 : f32 to vector<4x8xf32>
    %212 = arith.maximumf %211, %210 : vector<4x8xf32>
    %213 = vector.shape_cast %212 : vector<4x8xf32> to vector<4x8x1xf32>
    %214 = vector.broadcast %213 : vector<4x8x1xf32> to vector<4x8x8xf32>
    %215 = arith.subf %209, %214 : vector<4x8x8xf32>
    %216 = math.exp %215 : vector<4x8x8xf32>
    %cst_118 = arith.constant dense<0.000000e+00> : vector<4x8xf32>
    %217 = vector.multi_reduction <add>, %216, %cst_118 [2] : vector<4x8x8xf32> to vector<4x8xf32>
    %218 = vector.shape_cast %217 : vector<4x8xf32> to vector<4x8x1xf32>
    %219 = vector.broadcast %218 : vector<4x8x1xf32> to vector<4x8x8xf32>
    %220 = arith.divf %216, %219 : vector<4x8x8xf32>
    "tpu.trace_start"() <{level = 10 : i32, message = "nqk,nkd->nqd"}> : () -> ()
    %cst_119 = arith.constant dense<0.000000e+00> : vector<4x8x8xf32>
    %221 = tpu.matmul %220, %203, %cst_119 {dimension_numbers = #tpu.dot_dimension_numbers<[2], [1], [1], [2], [0, 0, 0, 1, 1, 2], [0], [0]>} : vector<4x8x8xf32>, vector<4x8x8xf32>, vector<4x8x8xf32> -> vector<4x8x8xf32>
    "tpu.trace_stop"() : () -> ()
    %222 = vector.shape_cast %221 : vector<4x8x8xf32> to vector<32x8xf32>
    %c3_120 = arith.constant 3 : index
    %c0_121 = arith.constant 0 : index
    %c0_122 = arith.constant 0 : index
    %223 = vector.load %arg5[%c3_120, %c0_121, %c0_122] : memref<8x8x32xf32, #tpu.memory_space<vmem>>, vector<1x8x32xf32>
    %224 = vector.shape_cast %223 : vector<1x8x32xf32> to vector<8x32xf32>
    %cst_123 = arith.constant dense<0.000000e+00> : vector<32x32xf32>
    %225 = tpu.matmul %222, %224, %cst_123 {dimension_numbers = #tpu.dot_dimension_numbers<[1], [0], [0], [1], [0, 0, 1, 1], [], []>} : vector<32x8xf32>, vector<8x32xf32>, vector<32x32xf32> -> vector<32x32xf32>
    %226 = arith.addf %179, %225 : vector<32x32xf32>
    %227 = arith.addf %0, %226 : vector<32x32xf32>
    %228 = vector.broadcast %11 : vector<1x32xf32> to vector<32x32xf32>
    %229 = arith.addf %227, %228 : vector<32x32xf32>
    %cst_124 = arith.constant dense<0.000000e+00> : vector<32xf32>
    %230 = vector.multi_reduction <add>, %229, %cst_124 [1] : vector<32x32xf32> to vector<32xf32>
    %231 = vector.shape_cast %230 : vector<32xf32> to vector<32x1xf32>
    %cst_125 = arith.constant 3.200000e+01 : f32
    %232 = vector.broadcast %cst_125 : f32 to vector<32x1xf32>
    %233 = arith.divf %231, %232 : vector<32x1xf32>
    %234 = vector.broadcast %233 : vector<32x1xf32> to vector<32x32xf32>
    %235 = arith.subf %229, %234 : vector<32x32xf32>
    %236 = arith.mulf %235, %235 : vector<32x32xf32>
    %cst_126 = arith.constant dense<0.000000e+00> : vector<32xf32>
    %237 = vector.multi_reduction <add>, %236, %cst_126 [1] : vector<32x32xf32> to vector<32xf32>
    %238 = vector.shape_cast %237 : vector<32xf32> to vector<32x1xf32>
    %cst_127 = arith.constant 3.200000e+01 : f32
    %239 = vector.broadcast %cst_127 : f32 to vector<32x1xf32>
    %240 = arith.divf %238, %239 : vector<32x1xf32>
    %241 = vector.broadcast %233 : vector<32x1xf32> to vector<32x32xf32>
    %242 = arith.subf %229, %241 : vector<32x32xf32>
    %cst_128 = arith.constant 9.99999974E-6 : f32
    %243 = vector.broadcast %cst_128 : f32 to vector<32x1xf32>
    %244 = arith.addf %240, %243 : vector<32x1xf32>
    %245 = math.rsqrt %244 : vector<32x1xf32>
    %246 = vector.broadcast %245 : vector<32x1xf32> to vector<32x32xf32>
    %247 = arith.mulf %242, %246 : vector<32x32xf32>
    %248 = vector.broadcast %12 : vector<1x32xf32> to vector<32x32xf32>
    %249 = arith.mulf %247, %248 : vector<32x32xf32>
    %250 = vector.broadcast %13 : vector<1x32xf32> to vector<32x32xf32>
    %251 = arith.addf %249, %250 : vector<32x32xf32>
    %c0_129 = arith.constant 0 : index
    %c0_130 = arith.constant 0 : index
    %c0_131 = arith.constant 0 : index
    %252 = vector.load %arg6[%c0_129, %c0_130, %c0_131] : memref<2x32x128xf32, #tpu.memory_space<vmem>>, vector<1x32x128xf32>
    %253 = vector.shape_cast %252 : vector<1x32x128xf32> to vector<32x128xf32>
    %cst_132 = arith.constant dense<0.000000e+00> : vector<32x128xf32>
    %254 = tpu.matmul %251, %253, %cst_132 {dimension_numbers = #tpu.dot_dimension_numbers<[1], [0], [0], [1], [0, 0, 1, 1], [], []>} : vector<32x32xf32>, vector<32x128xf32>, vector<32x128xf32> -> vector<32x128xf32>
    %255 = vector.broadcast %15 : vector<1x128xf32> to vector<32x128xf32>
    %256 = arith.addf %254, %255 : vector<32x128xf32>
    %cst_133 = arith.constant 1.702000e+00 : f32
    %257 = vector.broadcast %cst_133 : f32 to vector<32x128xf32>
    %258 = arith.mulf %257, %256 : vector<32x128xf32>
    %259 = arith.negf %258 : vector<32x128xf32>
    %260 = math.exp %259 : vector<32x128xf32>
    %cst_134 = arith.constant 1.000000e+00 : f32
    %261 = vector.broadcast %cst_134 : f32 to vector<32x128xf32>
    %262 = arith.addf %261, %260 : vector<32x128xf32>
    %263 = arith.divf %261, %262 : vector<32x128xf32>
    %264 = arith.mulf %256, %263 : vector<32x128xf32>
    %c0_135 = arith.constant 0 : index
    %c0_136 = arith.constant 0 : index
    %c0_137 = arith.constant 0 : index
    %265 = vector.load %arg7[%c0_135, %c0_136, %c0_137] : memref<2x128x32xf32, #tpu.memory_space<vmem>>, vector<1x128x32xf32>
    %266 = vector.shape_cast %265 : vector<1x128x32xf32> to vector<128x32xf32>
    %cst_138 = arith.constant dense<0.000000e+00> : vector<32x32xf32>
    %267 = tpu.matmul %264, %266, %cst_138 {dimension_numbers = #tpu.dot_dimension_numbers<[1], [0], [0], [1], [0, 0, 1, 1], [], []>} : vector<32x128xf32>, vector<128x32xf32>, vector<32x32xf32> -> vector<32x32xf32>
    %268 = arith.addf %229, %267 : vector<32x32xf32>
    %269 = vector.broadcast %14 : vector<1x32xf32> to vector<32x32xf32>
    %270 = arith.addf %268, %269 : vector<32x32xf32>
    %c1_139 = arith.constant 1 : index
    %c0_140 = arith.constant 0 : index
    %c0_141 = arith.constant 0 : index
    %271 = vector.load %arg8[%c1_139, %c0_140, %c0_141] : memref<2x7x128xf32, #tpu.memory_space<vmem>>, vector<1x7x128xf32>
    %272 = vector.shape_cast %271 : vector<1x7x128xf32> to vector<7x128xf32>
    %273 = vector.extract_strided_slice %272 {offsets = [0, 0], sizes = [1, 32], strides = [1, 1]} : vector<7x128xf32> to vector<1x32xf32>
    %274 = vector.extract_strided_slice %272 {offsets = [1, 0], sizes = [1, 32], strides = [1, 1]} : vector<7x128xf32> to vector<1x32xf32>
    %275 = vector.extract_strided_slice %272 {offsets = [2, 0], sizes = [1, 32], strides = [1, 1]} : vector<7x128xf32> to vector<1x32xf32>
    %276 = vector.extract_strided_slice %272 {offsets = [3, 0], sizes = [1, 32], strides = [1, 1]} : vector<7x128xf32> to vector<1x32xf32>
    %277 = vector.extract_strided_slice %272 {offsets = [4, 0], sizes = [1, 32], strides = [1, 1]} : vector<7x128xf32> to vector<1x32xf32>
    %278 = vector.extract_strided_slice %272 {offsets = [5, 0], sizes = [1, 32], strides = [1, 1]} : vector<7x128xf32> to vector<1x32xf32>
    %279 = vector.extract_strided_slice %272 {offsets = [6, 0], sizes = [1, 128], strides = [1, 1]} : vector<7x128xf32> to vector<1x128xf32>
    %cst_142 = arith.constant dense<0.000000e+00> : vector<32xf32>
    %280 = vector.multi_reduction <add>, %270, %cst_142 [1] : vector<32x32xf32> to vector<32xf32>
    %281 = vector.shape_cast %280 : vector<32xf32> to vector<32x1xf32>
    %cst_143 = arith.constant 3.200000e+01 : f32
    %282 = vector.broadcast %cst_143 : f32 to vector<32x1xf32>
    %283 = arith.divf %281, %282 : vector<32x1xf32>
    %284 = vector.broadcast %283 : vector<32x1xf32> to vector<32x32xf32>
    %285 = arith.subf %270, %284 : vector<32x32xf32>
    %286 = arith.mulf %285, %285 : vector<32x32xf32>
    %cst_144 = arith.constant dense<0.000000e+00> : vector<32xf32>
    %287 = vector.multi_reduction <add>, %286, %cst_144 [1] : vector<32x32xf32> to vector<32xf32>
    %288 = vector.shape_cast %287 : vector<32xf32> to vector<32x1xf32>
    %cst_145 = arith.constant 3.200000e+01 : f32
    %289 = vector.broadcast %cst_145 : f32 to vector<32x1xf32>
    %290 = arith.divf %288, %289 : vector<32x1xf32>
    %291 = vector.broadcast %283 : vector<32x1xf32> to vector<32x32xf32>
    %292 = arith.subf %270, %291 : vector<32x32xf32>
    %cst_146 = arith.constant 9.99999974E-6 : f32
    %293 = vector.broadcast %cst_146 : f32 to vector<32x1xf32>
    %294 = arith.addf %290, %293 : vector<32x1xf32>
    %295 = math.rsqrt %294 : vector<32x1xf32>
    %296 = vector.broadcast %295 : vector<32x1xf32> to vector<32x32xf32>
    %297 = arith.mulf %292, %296 : vector<32x32xf32>
    %298 = vector.broadcast %273 : vector<1x32xf32> to vector<32x32xf32>
    %299 = arith.mulf %297, %298 : vector<32x32xf32>
    %300 = vector.broadcast %274 : vector<1x32xf32> to vector<32x32xf32>
    %301 = arith.addf %299, %300 : vector<32x32xf32>
    %cst_147 = arith.constant 0.000000e+00 : f32
    %302 = vector.broadcast %cst_147 : f32 to vector<32x32xf32>
    %c12 = arith.constant 12 : index
    %c0_148 = arith.constant 0 : index
    %c0_149 = arith.constant 0 : index
    %303 = vector.load %arg3[%c12, %c0_148, %c0_149] : memref<24x32x8xf32, #tpu.memory_space<vmem>>, vector<1x32x8xf32>
    %304 = vector.shape_cast %303 : vector<1x32x8xf32> to vector<32x8xf32>
    %cst_150 = arith.constant dense<0.000000e+00> : vector<32x8xf32>
    %305 = tpu.matmul %301, %304, %cst_150 {dimension_numbers = #tpu.dot_dimension_numbers<[1], [0], [0], [1], [0, 0, 1, 1], [], []>} : vector<32x32xf32>, vector<32x8xf32>, vector<32x8xf32> -> vector<32x8xf32>
    %c12_151 = arith.constant 12 : index
    %c0_152 = arith.constant 0 : index
    %c0_153 = arith.constant 0 : index
    %306 = vector.load %arg4[%c12_151, %c0_152, %c0_153] : memref<24x1x8xf32, #tpu.memory_space<vmem>>, vector<1x1x8xf32>
    %307 = vector.shape_cast %306 : vector<1x1x8xf32> to vector<1x8xf32>
    %308 = vector.broadcast %307 : vector<1x8xf32> to vector<32x8xf32>
    %309 = arith.addf %305, %308 : vector<32x8xf32>
    %c16 = arith.constant 16 : index
    %c0_154 = arith.constant 0 : index
    %c0_155 = arith.constant 0 : index
    %310 = vector.load %arg3[%c16, %c0_154, %c0_155] : memref<24x32x8xf32, #tpu.memory_space<vmem>>, vector<1x32x8xf32>
    %311 = vector.shape_cast %310 : vector<1x32x8xf32> to vector<32x8xf32>
    %cst_156 = arith.constant dense<0.000000e+00> : vector<32x8xf32>
    %312 = tpu.matmul %301, %311, %cst_156 {dimension_numbers = #tpu.dot_dimension_numbers<[1], [0], [0], [1], [0, 0, 1, 1], [], []>} : vector<32x32xf32>, vector<32x8xf32>, vector<32x8xf32> -> vector<32x8xf32>
    %c16_157 = arith.constant 16 : index
    %c0_158 = arith.constant 0 : index
    %c0_159 = arith.constant 0 : index
    %313 = vector.load %arg4[%c16_157, %c0_158, %c0_159] : memref<24x1x8xf32, #tpu.memory_space<vmem>>, vector<1x1x8xf32>
    %314 = vector.shape_cast %313 : vector<1x1x8xf32> to vector<1x8xf32>
    %315 = vector.broadcast %314 : vector<1x8xf32> to vector<32x8xf32>
    %316 = arith.addf %312, %315 : vector<32x8xf32>
    %c20 = arith.constant 20 : index
    %c0_160 = arith.constant 0 : index
    %c0_161 = arith.constant 0 : index
    %317 = vector.load %arg3[%c20, %c0_160, %c0_161] : memref<24x32x8xf32, #tpu.memory_space<vmem>>, vector<1x32x8xf32>
    %318 = vector.shape_cast %317 : vector<1x32x8xf32> to vector<32x8xf32>
    %cst_162 = arith.constant dense<0.000000e+00> : vector<32x8xf32>
    %319 = tpu.matmul %301, %318, %cst_162 {dimension_numbers = #tpu.dot_dimension_numbers<[1], [0], [0], [1], [0, 0, 1, 1], [], []>} : vector<32x32xf32>, vector<32x8xf32>, vector<32x8xf32> -> vector<32x8xf32>
    %c20_163 = arith.constant 20 : index
    %c0_164 = arith.constant 0 : index
    %c0_165 = arith.constant 0 : index
    %320 = vector.load %arg4[%c20_163, %c0_164, %c0_165] : memref<24x1x8xf32, #tpu.memory_space<vmem>>, vector<1x1x8xf32>
    %321 = vector.shape_cast %320 : vector<1x1x8xf32> to vector<1x8xf32>
    %322 = vector.broadcast %321 : vector<1x8xf32> to vector<32x8xf32>
    %323 = arith.addf %319, %322 : vector<32x8xf32>
    %324 = vector.shape_cast %309 : vector<32x8xf32> to vector<4x8x8xf32>
    %325 = vector.shape_cast %316 : vector<32x8xf32> to vector<4x8x8xf32>
    %326 = vector.shape_cast %323 : vector<32x8xf32> to vector<4x8x8xf32>
    "tpu.trace_start"() <{level = 10 : i32, message = "nqd,nkd->nqk"}> : () -> ()
    %cst_166 = arith.constant dense<0.000000e+00> : vector<4x8x8xf32>
    %327 = tpu.matmul %324, %325, %cst_166 {dimension_numbers = #tpu.dot_dimension_numbers<[2], [2], [1], [1], [0, 0, 0, 1, 1, 1], [0], [0]>} : vector<4x8x8xf32>, vector<4x8x8xf32>, vector<4x8x8xf32> -> vector<4x8x8xf32>
    "tpu.trace_stop"() : () -> ()
    %cst_167 = arith.constant 0.353553385 : f32
    %328 = vector.broadcast %cst_167 : f32 to vector<4x8x8xf32>
    %329 = arith.mulf %327, %328 : vector<4x8x8xf32>
    %330 = vector.shape_cast %6 : vector<8x8xf32> to vector<1x8x8xf32>
    %331 = vector.broadcast %330 : vector<1x8x8xf32> to vector<4x8x8xf32>
    %332 = arith.addf %329, %331 : vector<4x8x8xf32>
    %cst_168 = arith.constant dense<0xFF800000> : vector<4x8xf32>
    %333 = vector.multi_reduction <maximumf>, %332, %cst_168 [2] : vector<4x8x8xf32> to vector<4x8xf32>
    %cst_169 = arith.constant 0xFF800000 : f32
    %334 = vector.broadcast %cst_169 : f32 to vector<4x8xf32>
    %335 = arith.maximumf %334, %333 : vector<4x8xf32>
    %336 = vector.shape_cast %335 : vector<4x8xf32> to vector<4x8x1xf32>
    %337 = vector.broadcast %336 : vector<4x8x1xf32> to vector<4x8x8xf32>
    %338 = arith.subf %332, %337 : vector<4x8x8xf32>
    %339 = math.exp %338 : vector<4x8x8xf32>
    %cst_170 = arith.constant dense<0.000000e+00> : vector<4x8xf32>
    %340 = vector.multi_reduction <add>, %339, %cst_170 [2] : vector<4x8x8xf32> to vector<4x8xf32>
    %341 = vector.shape_cast %340 : vector<4x8xf32> to vector<4x8x1xf32>
    %342 = vector.broadcast %341 : vector<4x8x1xf32> to vector<4x8x8xf32>
    %343 = arith.divf %339, %342 : vector<4x8x8xf32>
    "tpu.trace_start"() <{level = 10 : i32, message = "nqk,nkd->nqd"}> : () -> ()
    %cst_171 = arith.constant dense<0.000000e+00> : vector<4x8x8xf32>
    %344 = tpu.matmul %343, %326, %cst_171 {dimension_numbers = #tpu.dot_dimension_numbers<[2], [1], [1], [2], [0, 0, 0, 1, 1, 2], [0], [0]>} : vector<4x8x8xf32>, vector<4x8x8xf32>, vector<4x8x8xf32> -> vector<4x8x8xf32>
    "tpu.trace_stop"() : () -> ()
    %345 = vector.shape_cast %344 : vector<4x8x8xf32> to vector<32x8xf32>
    %c4_172 = arith.constant 4 : index
    %c0_173 = arith.constant 0 : index
    %c0_174 = arith.constant 0 : index
    %346 = vector.load %arg5[%c4_172, %c0_173, %c0_174] : memref<8x8x32xf32, #tpu.memory_space<vmem>>, vector<1x8x32xf32>
    %347 = vector.shape_cast %346 : vector<1x8x32xf32> to vector<8x32xf32>
    %cst_175 = arith.constant dense<0.000000e+00> : vector<32x32xf32>
    %348 = tpu.matmul %345, %347, %cst_175 {dimension_numbers = #tpu.dot_dimension_numbers<[1], [0], [0], [1], [0, 0, 1, 1], [], []>} : vector<32x8xf32>, vector<8x32xf32>, vector<32x32xf32> -> vector<32x32xf32>
    %349 = arith.addf %302, %348 : vector<32x32xf32>
    %c13 = arith.constant 13 : index
    %c0_176 = arith.constant 0 : index
    %c0_177 = arith.constant 0 : index
    %350 = vector.load %arg3[%c13, %c0_176, %c0_177] : memref<24x32x8xf32, #tpu.memory_space<vmem>>, vector<1x32x8xf32>
    %351 = vector.shape_cast %350 : vector<1x32x8xf32> to vector<32x8xf32>
    %cst_178 = arith.constant dense<0.000000e+00> : vector<32x8xf32>
    %352 = tpu.matmul %301, %351, %cst_178 {dimension_numbers = #tpu.dot_dimension_numbers<[1], [0], [0], [1], [0, 0, 1, 1], [], []>} : vector<32x32xf32>, vector<32x8xf32>, vector<32x8xf32> -> vector<32x8xf32>
    %c13_179 = arith.constant 13 : index
    %c0_180 = arith.constant 0 : index
    %c0_181 = arith.constant 0 : index
    %353 = vector.load %arg4[%c13_179, %c0_180, %c0_181] : memref<24x1x8xf32, #tpu.memory_space<vmem>>, vector<1x1x8xf32>
    %354 = vector.shape_cast %353 : vector<1x1x8xf32> to vector<1x8xf32>
    %355 = vector.broadcast %354 : vector<1x8xf32> to vector<32x8xf32>
    %356 = arith.addf %352, %355 : vector<32x8xf32>
    %c17 = arith.constant 17 : index
    %c0_182 = arith.constant 0 : index
    %c0_183 = arith.constant 0 : index
    %357 = vector.load %arg3[%c17, %c0_182, %c0_183] : memref<24x32x8xf32, #tpu.memory_space<vmem>>, vector<1x32x8xf32>
    %358 = vector.shape_cast %357 : vector<1x32x8xf32> to vector<32x8xf32>
    %cst_184 = arith.constant dense<0.000000e+00> : vector<32x8xf32>
    %359 = tpu.matmul %301, %358, %cst_184 {dimension_numbers = #tpu.dot_dimension_numbers<[1], [0], [0], [1], [0, 0, 1, 1], [], []>} : vector<32x32xf32>, vector<32x8xf32>, vector<32x8xf32> -> vector<32x8xf32>
    %c17_185 = arith.constant 17 : index
    %c0_186 = arith.constant 0 : index
    %c0_187 = arith.constant 0 : index
    %360 = vector.load %arg4[%c17_185, %c0_186, %c0_187] : memref<24x1x8xf32, #tpu.memory_space<vmem>>, vector<1x1x8xf32>
    %361 = vector.shape_cast %360 : vector<1x1x8xf32> to vector<1x8xf32>
    %362 = vector.broadcast %361 : vector<1x8xf32> to vector<32x8xf32>
    %363 = arith.addf %359, %362 : vector<32x8xf32>
    %c21 = arith.constant 21 : index
    %c0_188 = arith.constant 0 : index
    %c0_189 = arith.constant 0 : index
    %364 = vector.load %arg3[%c21, %c0_188, %c0_189] : memref<24x32x8xf32, #tpu.memory_space<vmem>>, vector<1x32x8xf32>
    %365 = vector.shape_cast %364 : vector<1x32x8xf32> to vector<32x8xf32>
    %cst_190 = arith.constant dense<0.000000e+00> : vector<32x8xf32>
    %366 = tpu.matmul %301, %365, %cst_190 {dimension_numbers = #tpu.dot_dimension_numbers<[1], [0], [0], [1], [0, 0, 1, 1], [], []>} : vector<32x32xf32>, vector<32x8xf32>, vector<32x8xf32> -> vector<32x8xf32>
    %c21_191 = arith.constant 21 : index
    %c0_192 = arith.constant 0 : index
    %c0_193 = arith.constant 0 : index
    %367 = vector.load %arg4[%c21_191, %c0_192, %c0_193] : memref<24x1x8xf32, #tpu.memory_space<vmem>>, vector<1x1x8xf32>
    %368 = vector.shape_cast %367 : vector<1x1x8xf32> to vector<1x8xf32>
    %369 = vector.broadcast %368 : vector<1x8xf32> to vector<32x8xf32>
    %370 = arith.addf %366, %369 : vector<32x8xf32>
    %371 = vector.shape_cast %356 : vector<32x8xf32> to vector<4x8x8xf32>
    %372 = vector.shape_cast %363 : vector<32x8xf32> to vector<4x8x8xf32>
    %373 = vector.shape_cast %370 : vector<32x8xf32> to vector<4x8x8xf32>
    "tpu.trace_start"() <{level = 10 : i32, message = "nqd,nkd->nqk"}> : () -> ()
    %cst_194 = arith.constant dense<0.000000e+00> : vector<4x8x8xf32>
    %374 = tpu.matmul %371, %372, %cst_194 {dimension_numbers = #tpu.dot_dimension_numbers<[2], [2], [1], [1], [0, 0, 0, 1, 1, 1], [0], [0]>} : vector<4x8x8xf32>, vector<4x8x8xf32>, vector<4x8x8xf32> -> vector<4x8x8xf32>
    "tpu.trace_stop"() : () -> ()
    %cst_195 = arith.constant 0.353553385 : f32
    %375 = vector.broadcast %cst_195 : f32 to vector<4x8x8xf32>
    %376 = arith.mulf %374, %375 : vector<4x8x8xf32>
    %377 = vector.shape_cast %6 : vector<8x8xf32> to vector<1x8x8xf32>
    %378 = vector.broadcast %377 : vector<1x8x8xf32> to vector<4x8x8xf32>
    %379 = arith.addf %376, %378 : vector<4x8x8xf32>
    %cst_196 = arith.constant dense<0xFF800000> : vector<4x8xf32>
    %380 = vector.multi_reduction <maximumf>, %379, %cst_196 [2] : vector<4x8x8xf32> to vector<4x8xf32>
    %cst_197 = arith.constant 0xFF800000 : f32
    %381 = vector.broadcast %cst_197 : f32 to vector<4x8xf32>
    %382 = arith.maximumf %381, %380 : vector<4x8xf32>
    %383 = vector.shape_cast %382 : vector<4x8xf32> to vector<4x8x1xf32>
    %384 = vector.broadcast %383 : vector<4x8x1xf32> to vector<4x8x8xf32>
    %385 = arith.subf %379, %384 : vector<4x8x8xf32>
    %386 = math.exp %385 : vector<4x8x8xf32>
    %cst_198 = arith.constant dense<0.000000e+00> : vector<4x8xf32>
    %387 = vector.multi_reduction <add>, %386, %cst_198 [2] : vector<4x8x8xf32> to vector<4x8xf32>
    %388 = vector.shape_cast %387 : vector<4x8xf32> to vector<4x8x1xf32>
    %389 = vector.broadcast %388 : vector<4x8x1xf32> to vector<4x8x8xf32>
    %390 = arith.divf %386, %389 : vector<4x8x8xf32>
    "tpu.trace_start"() <{level = 10 : i32, message = "nqk,nkd->nqd"}> : () -> ()
    %cst_199 = arith.constant dense<0.000000e+00> : vector<4x8x8xf32>
    %391 = tpu.matmul %390, %373, %cst_199 {dimension_numbers = #tpu.dot_dimension_numbers<[2], [1], [1], [2], [0, 0, 0, 1, 1, 2], [0], [0]>} : vector<4x8x8xf32>, vector<4x8x8xf32>, vector<4x8x8xf32> -> vector<4x8x8xf32>
    "tpu.trace_stop"() : () -> ()
    %392 = vector.shape_cast %391 : vector<4x8x8xf32> to vector<32x8xf32>
    %c5_200 = arith.constant 5 : index
    %c0_201 = arith.constant 0 : index
    %c0_202 = arith.constant 0 : index
    %393 = vector.load %arg5[%c5_200, %c0_201, %c0_202] : memref<8x8x32xf32, #tpu.memory_space<vmem>>, vector<1x8x32xf32>
    %394 = vector.shape_cast %393 : vector<1x8x32xf32> to vector<8x32xf32>
    %cst_203 = arith.constant dense<0.000000e+00> : vector<32x32xf32>
    %395 = tpu.matmul %392, %394, %cst_203 {dimension_numbers = #tpu.dot_dimension_numbers<[1], [0], [0], [1], [0, 0, 1, 1], [], []>} : vector<32x8xf32>, vector<8x32xf32>, vector<32x32xf32> -> vector<32x32xf32>
    %396 = arith.addf %349, %395 : vector<32x32xf32>
    %c14 = arith.constant 14 : index
    %c0_204 = arith.constant 0 : index
    %c0_205 = arith.constant 0 : index
    %397 = vector.load %arg3[%c14, %c0_204, %c0_205] : memref<24x32x8xf32, #tpu.memory_space<vmem>>, vector<1x32x8xf32>
    %398 = vector.shape_cast %397 : vector<1x32x8xf32> to vector<32x8xf32>
    %cst_206 = arith.constant dense<0.000000e+00> : vector<32x8xf32>
    %399 = tpu.matmul %301, %398, %cst_206 {dimension_numbers = #tpu.dot_dimension_numbers<[1], [0], [0], [1], [0, 0, 1, 1], [], []>} : vector<32x32xf32>, vector<32x8xf32>, vector<32x8xf32> -> vector<32x8xf32>
    %c14_207 = arith.constant 14 : index
    %c0_208 = arith.constant 0 : index
    %c0_209 = arith.constant 0 : index
    %400 = vector.load %arg4[%c14_207, %c0_208, %c0_209] : memref<24x1x8xf32, #tpu.memory_space<vmem>>, vector<1x1x8xf32>
    %401 = vector.shape_cast %400 : vector<1x1x8xf32> to vector<1x8xf32>
    %402 = vector.broadcast %401 : vector<1x8xf32> to vector<32x8xf32>
    %403 = arith.addf %399, %402 : vector<32x8xf32>
    %c18 = arith.constant 18 : index
    %c0_210 = arith.constant 0 : index
    %c0_211 = arith.constant 0 : index
    %404 = vector.load %arg3[%c18, %c0_210, %c0_211] : memref<24x32x8xf32, #tpu.memory_space<vmem>>, vector<1x32x8xf32>
    %405 = vector.shape_cast %404 : vector<1x32x8xf32> to vector<32x8xf32>
    %cst_212 = arith.constant dense<0.000000e+00> : vector<32x8xf32>
    %406 = tpu.matmul %301, %405, %cst_212 {dimension_numbers = #tpu.dot_dimension_numbers<[1], [0], [0], [1], [0, 0, 1, 1], [], []>} : vector<32x32xf32>, vector<32x8xf32>, vector<32x8xf32> -> vector<32x8xf32>
    %c18_213 = arith.constant 18 : index
    %c0_214 = arith.constant 0 : index
    %c0_215 = arith.constant 0 : index
    %407 = vector.load %arg4[%c18_213, %c0_214, %c0_215] : memref<24x1x8xf32, #tpu.memory_space<vmem>>, vector<1x1x8xf32>
    %408 = vector.shape_cast %407 : vector<1x1x8xf32> to vector<1x8xf32>
    %409 = vector.broadcast %408 : vector<1x8xf32> to vector<32x8xf32>
    %410 = arith.addf %406, %409 : vector<32x8xf32>
    %c22 = arith.constant 22 : index
    %c0_216 = arith.constant 0 : index
    %c0_217 = arith.constant 0 : index
    %411 = vector.load %arg3[%c22, %c0_216, %c0_217] : memref<24x32x8xf32, #tpu.memory_space<vmem>>, vector<1x32x8xf32>
    %412 = vector.shape_cast %411 : vector<1x32x8xf32> to vector<32x8xf32>
    %cst_218 = arith.constant dense<0.000000e+00> : vector<32x8xf32>
    %413 = tpu.matmul %301, %412, %cst_218 {dimension_numbers = #tpu.dot_dimension_numbers<[1], [0], [0], [1], [0, 0, 1, 1], [], []>} : vector<32x32xf32>, vector<32x8xf32>, vector<32x8xf32> -> vector<32x8xf32>
    %c22_219 = arith.constant 22 : index
    %c0_220 = arith.constant 0 : index
    %c0_221 = arith.constant 0 : index
    %414 = vector.load %arg4[%c22_219, %c0_220, %c0_221] : memref<24x1x8xf32, #tpu.memory_space<vmem>>, vector<1x1x8xf32>
    %415 = vector.shape_cast %414 : vector<1x1x8xf32> to vector<1x8xf32>
    %416 = vector.broadcast %415 : vector<1x8xf32> to vector<32x8xf32>
    %417 = arith.addf %413, %416 : vector<32x8xf32>
    %418 = vector.shape_cast %403 : vector<32x8xf32> to vector<4x8x8xf32>
    %419 = vector.shape_cast %410 : vector<32x8xf32> to vector<4x8x8xf32>
    %420 = vector.shape_cast %417 : vector<32x8xf32> to vector<4x8x8xf32>
    "tpu.trace_start"() <{level = 10 : i32, message = "nqd,nkd->nqk"}> : () -> ()
    %cst_222 = arith.constant dense<0.000000e+00> : vector<4x8x8xf32>
    %421 = tpu.matmul %418, %419, %cst_222 {dimension_numbers = #tpu.dot_dimension_numbers<[2], [2], [1], [1], [0, 0, 0, 1, 1, 1], [0], [0]>} : vector<4x8x8xf32>, vector<4x8x8xf32>, vector<4x8x8xf32> -> vector<4x8x8xf32>
    "tpu.trace_stop"() : () -> ()
    %cst_223 = arith.constant 0.353553385 : f32
    %422 = vector.broadcast %cst_223 : f32 to vector<4x8x8xf32>
    %423 = arith.mulf %421, %422 : vector<4x8x8xf32>
    %424 = vector.shape_cast %6 : vector<8x8xf32> to vector<1x8x8xf32>
    %425 = vector.broadcast %424 : vector<1x8x8xf32> to vector<4x8x8xf32>
    %426 = arith.addf %423, %425 : vector<4x8x8xf32>
    %cst_224 = arith.constant dense<0xFF800000> : vector<4x8xf32>
    %427 = vector.multi_reduction <maximumf>, %426, %cst_224 [2] : vector<4x8x8xf32> to vector<4x8xf32>
    %cst_225 = arith.constant 0xFF800000 : f32
    %428 = vector.broadcast %cst_225 : f32 to vector<4x8xf32>
    %429 = arith.maximumf %428, %427 : vector<4x8xf32>
    %430 = vector.shape_cast %429 : vector<4x8xf32> to vector<4x8x1xf32>
    %431 = vector.broadcast %430 : vector<4x8x1xf32> to vector<4x8x8xf32>
    %432 = arith.subf %426, %431 : vector<4x8x8xf32>
    %433 = math.exp %432 : vector<4x8x8xf32>
    %cst_226 = arith.constant dense<0.000000e+00> : vector<4x8xf32>
    %434 = vector.multi_reduction <add>, %433, %cst_226 [2] : vector<4x8x8xf32> to vector<4x8xf32>
    %435 = vector.shape_cast %434 : vector<4x8xf32> to vector<4x8x1xf32>
    %436 = vector.broadcast %435 : vector<4x8x1xf32> to vector<4x8x8xf32>
    %437 = arith.divf %433, %436 : vector<4x8x8xf32>
    "tpu.trace_start"() <{level = 10 : i32, message = "nqk,nkd->nqd"}> : () -> ()
    %cst_227 = arith.constant dense<0.000000e+00> : vector<4x8x8xf32>
    %438 = tpu.matmul %437, %420, %cst_227 {dimension_numbers = #tpu.dot_dimension_numbers<[2], [1], [1], [2], [0, 0, 0, 1, 1, 2], [0], [0]>} : vector<4x8x8xf32>, vector<4x8x8xf32>, vector<4x8x8xf32> -> vector<4x8x8xf32>
    "tpu.trace_stop"() : () -> ()
    %439 = vector.shape_cast %438 : vector<4x8x8xf32> to vector<32x8xf32>
    %c6_228 = arith.constant 6 : index
    %c0_229 = arith.constant 0 : index
    %c0_230 = arith.constant 0 : index
    %440 = vector.load %arg5[%c6_228, %c0_229, %c0_230] : memref<8x8x32xf32, #tpu.memory_space<vmem>>, vector<1x8x32xf32>
    %441 = vector.shape_cast %440 : vector<1x8x32xf32> to vector<8x32xf32>
    %cst_231 = arith.constant dense<0.000000e+00> : vector<32x32xf32>
    %442 = tpu.matmul %439, %441, %cst_231 {dimension_numbers = #tpu.dot_dimension_numbers<[1], [0], [0], [1], [0, 0, 1, 1], [], []>} : vector<32x8xf32>, vector<8x32xf32>, vector<32x32xf32> -> vector<32x32xf32>
    %443 = arith.addf %396, %442 : vector<32x32xf32>
    %c15 = arith.constant 15 : index
    %c0_232 = arith.constant 0 : index
    %c0_233 = arith.constant 0 : index
    %444 = vector.load %arg3[%c15, %c0_232, %c0_233] : memref<24x32x8xf32, #tpu.memory_space<vmem>>, vector<1x32x8xf32>
    %445 = vector.shape_cast %444 : vector<1x32x8xf32> to vector<32x8xf32>
    %cst_234 = arith.constant dense<0.000000e+00> : vector<32x8xf32>
    %446 = tpu.matmul %301, %445, %cst_234 {dimension_numbers = #tpu.dot_dimension_numbers<[1], [0], [0], [1], [0, 0, 1, 1], [], []>} : vector<32x32xf32>, vector<32x8xf32>, vector<32x8xf32> -> vector<32x8xf32>
    %c15_235 = arith.constant 15 : index
    %c0_236 = arith.constant 0 : index
    %c0_237 = arith.constant 0 : index
    %447 = vector.load %arg4[%c15_235, %c0_236, %c0_237] : memref<24x1x8xf32, #tpu.memory_space<vmem>>, vector<1x1x8xf32>
    %448 = vector.shape_cast %447 : vector<1x1x8xf32> to vector<1x8xf32>
    %449 = vector.broadcast %448 : vector<1x8xf32> to vector<32x8xf32>
    %450 = arith.addf %446, %449 : vector<32x8xf32>
    %c19 = arith.constant 19 : index
    %c0_238 = arith.constant 0 : index
    %c0_239 = arith.constant 0 : index
    %451 = vector.load %arg3[%c19, %c0_238, %c0_239] : memref<24x32x8xf32, #tpu.memory_space<vmem>>, vector<1x32x8xf32>
    %452 = vector.shape_cast %451 : vector<1x32x8xf32> to vector<32x8xf32>
    %cst_240 = arith.constant dense<0.000000e+00> : vector<32x8xf32>
    %453 = tpu.matmul %301, %452, %cst_240 {dimension_numbers = #tpu.dot_dimension_numbers<[1], [0], [0], [1], [0, 0, 1, 1], [], []>} : vector<32x32xf32>, vector<32x8xf32>, vector<32x8xf32> -> vector<32x8xf32>
    %c19_241 = arith.constant 19 : index
    %c0_242 = arith.constant 0 : index
    %c0_243 = arith.constant 0 : index
    %454 = vector.load %arg4[%c19_241, %c0_242, %c0_243] : memref<24x1x8xf32, #tpu.memory_space<vmem>>, vector<1x1x8xf32>
    %455 = vector.shape_cast %454 : vector<1x1x8xf32> to vector<1x8xf32>
    %456 = vector.broadcast %455 : vector<1x8xf32> to vector<32x8xf32>
    %457 = arith.addf %453, %456 : vector<32x8xf32>
    %c23 = arith.constant 23 : index
    %c0_244 = arith.constant 0 : index
    %c0_245 = arith.constant 0 : index
    %458 = vector.load %arg3[%c23, %c0_244, %c0_245] : memref<24x32x8xf32, #tpu.memory_space<vmem>>, vector<1x32x8xf32>
    %459 = vector.shape_cast %458 : vector<1x32x8xf32> to vector<32x8xf32>
    %cst_246 = arith.constant dense<0.000000e+00> : vector<32x8xf32>
    %460 = tpu.matmul %301, %459, %cst_246 {dimension_numbers = #tpu.dot_dimension_numbers<[1], [0], [0], [1], [0, 0, 1, 1], [], []>} : vector<32x32xf32>, vector<32x8xf32>, vector<32x8xf32> -> vector<32x8xf32>
    %c23_247 = arith.constant 23 : index
    %c0_248 = arith.constant 0 : index
    %c0_249 = arith.constant 0 : index
    %461 = vector.load %arg4[%c23_247, %c0_248, %c0_249] : memref<24x1x8xf32, #tpu.memory_space<vmem>>, vector<1x1x8xf32>
    %462 = vector.shape_cast %461 : vector<1x1x8xf32> to vector<1x8xf32>
    %463 = vector.broadcast %462 : vector<1x8xf32> to vector<32x8xf32>
    %464 = arith.addf %460, %463 : vector<32x8xf32>
    %465 = vector.shape_cast %450 : vector<32x8xf32> to vector<4x8x8xf32>
    %466 = vector.shape_cast %457 : vector<32x8xf32> to vector<4x8x8xf32>
    %467 = vector.shape_cast %464 : vector<32x8xf32> to vector<4x8x8xf32>
    "tpu.trace_start"() <{level = 10 : i32, message = "nqd,nkd->nqk"}> : () -> ()
    %cst_250 = arith.constant dense<0.000000e+00> : vector<4x8x8xf32>
    %468 = tpu.matmul %465, %466, %cst_250 {dimension_numbers = #tpu.dot_dimension_numbers<[2], [2], [1], [1], [0, 0, 0, 1, 1, 1], [0], [0]>} : vector<4x8x8xf32>, vector<4x8x8xf32>, vector<4x8x8xf32> -> vector<4x8x8xf32>
    "tpu.trace_stop"() : () -> ()
    %cst_251 = arith.constant 0.353553385 : f32
    %469 = vector.broadcast %cst_251 : f32 to vector<4x8x8xf32>
    %470 = arith.mulf %468, %469 : vector<4x8x8xf32>
    %471 = vector.shape_cast %6 : vector<8x8xf32> to vector<1x8x8xf32>
    %472 = vector.broadcast %471 : vector<1x8x8xf32> to vector<4x8x8xf32>
    %473 = arith.addf %470, %472 : vector<4x8x8xf32>
    %cst_252 = arith.constant dense<0xFF800000> : vector<4x8xf32>
    %474 = vector.multi_reduction <maximumf>, %473, %cst_252 [2] : vector<4x8x8xf32> to vector<4x8xf32>
    %cst_253 = arith.constant 0xFF800000 : f32
    %475 = vector.broadcast %cst_253 : f32 to vector<4x8xf32>
    %476 = arith.maximumf %475, %474 : vector<4x8xf32>
    %477 = vector.shape_cast %476 : vector<4x8xf32> to vector<4x8x1xf32>
    %478 = vector.broadcast %477 : vector<4x8x1xf32> to vector<4x8x8xf32>
    %479 = arith.subf %473, %478 : vector<4x8x8xf32>
    %480 = math.exp %479 : vector<4x8x8xf32>
    %cst_254 = arith.constant dense<0.000000e+00> : vector<4x8xf32>
    %481 = vector.multi_reduction <add>, %480, %cst_254 [2] : vector<4x8x8xf32> to vector<4x8xf32>
    %482 = vector.shape_cast %481 : vector<4x8xf32> to vector<4x8x1xf32>
    %483 = vector.broadcast %482 : vector<4x8x1xf32> to vector<4x8x8xf32>
    %484 = arith.divf %480, %483 : vector<4x8x8xf32>
    "tpu.trace_start"() <{level = 10 : i32, message = "nqk,nkd->nqd"}> : () -> ()
    %cst_255 = arith.constant dense<0.000000e+00> : vector<4x8x8xf32>
    %485 = tpu.matmul %484, %467, %cst_255 {dimension_numbers = #tpu.dot_dimension_numbers<[2], [1], [1], [2], [0, 0, 0, 1, 1, 2], [0], [0]>} : vector<4x8x8xf32>, vector<4x8x8xf32>, vector<4x8x8xf32> -> vector<4x8x8xf32>
    "tpu.trace_stop"() : () -> ()
    %486 = vector.shape_cast %485 : vector<4x8x8xf32> to vector<32x8xf32>
    %c7_256 = arith.constant 7 : index
    %c0_257 = arith.constant 0 : index
    %c0_258 = arith.constant 0 : index
    %487 = vector.load %arg5[%c7_256, %c0_257, %c0_258] : memref<8x8x32xf32, #tpu.memory_space<vmem>>, vector<1x8x32xf32>
    %488 = vector.shape_cast %487 : vector<1x8x32xf32> to vector<8x32xf32>
    %cst_259 = arith.constant dense<0.000000e+00> : vector<32x32xf32>
    %489 = tpu.matmul %486, %488, %cst_259 {dimension_numbers = #tpu.dot_dimension_numbers<[1], [0], [0], [1], [0, 0, 1, 1], [], []>} : vector<32x8xf32>, vector<8x32xf32>, vector<32x32xf32> -> vector<32x32xf32>
    %490 = arith.addf %443, %489 : vector<32x32xf32>
    %491 = arith.addf %270, %490 : vector<32x32xf32>
    %492 = vector.broadcast %275 : vector<1x32xf32> to vector<32x32xf32>
    %493 = arith.addf %491, %492 : vector<32x32xf32>
    %cst_260 = arith.constant dense<0.000000e+00> : vector<32xf32>
    %494 = vector.multi_reduction <add>, %493, %cst_260 [1] : vector<32x32xf32> to vector<32xf32>
    %495 = vector.shape_cast %494 : vector<32xf32> to vector<32x1xf32>
    %cst_261 = arith.constant 3.200000e+01 : f32
    %496 = vector.broadcast %cst_261 : f32 to vector<32x1xf32>
    %497 = arith.divf %495, %496 : vector<32x1xf32>
    %498 = vector.broadcast %497 : vector<32x1xf32> to vector<32x32xf32>
    %499 = arith.subf %493, %498 : vector<32x32xf32>
    %500 = arith.mulf %499, %499 : vector<32x32xf32>
    %cst_262 = arith.constant dense<0.000000e+00> : vector<32xf32>
    %501 = vector.multi_reduction <add>, %500, %cst_262 [1] : vector<32x32xf32> to vector<32xf32>
    %502 = vector.shape_cast %501 : vector<32xf32> to vector<32x1xf32>
    %cst_263 = arith.constant 3.200000e+01 : f32
    %503 = vector.broadcast %cst_263 : f32 to vector<32x1xf32>
    %504 = arith.divf %502, %503 : vector<32x1xf32>
    %505 = vector.broadcast %497 : vector<32x1xf32> to vector<32x32xf32>
    %506 = arith.subf %493, %505 : vector<32x32xf32>
    %cst_264 = arith.constant 9.99999974E-6 : f32
    %507 = vector.broadcast %cst_264 : f32 to vector<32x1xf32>
    %508 = arith.addf %504, %507 : vector<32x1xf32>
    %509 = math.rsqrt %508 : vector<32x1xf32>
    %510 = vector.broadcast %509 : vector<32x1xf32> to vector<32x32xf32>
    %511 = arith.mulf %506, %510 : vector<32x32xf32>
    %512 = vector.broadcast %276 : vector<1x32xf32> to vector<32x32xf32>
    %513 = arith.mulf %511, %512 : vector<32x32xf32>
    %514 = vector.broadcast %277 : vector<1x32xf32> to vector<32x32xf32>
    %515 = arith.addf %513, %514 : vector<32x32xf32>
    %c1_265 = arith.constant 1 : index
    %c0_266 = arith.constant 0 : index
    %c0_267 = arith.constant 0 : index
    %516 = vector.load %arg6[%c1_265, %c0_266, %c0_267] : memref<2x32x128xf32, #tpu.memory_space<vmem>>, vector<1x32x128xf32>
    %517 = vector.shape_cast %516 : vector<1x32x128xf32> to vector<32x128xf32>
    %cst_268 = arith.constant dense<0.000000e+00> : vector<32x128xf32>
    %518 = tpu.matmul %515, %517, %cst_268 {dimension_numbers = #tpu.dot_dimension_numbers<[1], [0], [0], [1], [0, 0, 1, 1], [], []>} : vector<32x32xf32>, vector<32x128xf32>, vector<32x128xf32> -> vector<32x128xf32>
    %519 = vector.broadcast %279 : vector<1x128xf32> to vector<32x128xf32>
    %520 = arith.addf %518, %519 : vector<32x128xf32>
    %cst_269 = arith.constant 1.702000e+00 : f32
    %521 = vector.broadcast %cst_269 : f32 to vector<32x128xf32>
    %522 = arith.mulf %521, %520 : vector<32x128xf32>
    %523 = arith.negf %522 : vector<32x128xf32>
    %524 = math.exp %523 : vector<32x128xf32>
    %cst_270 = arith.constant 1.000000e+00 : f32
    %525 = vector.broadcast %cst_270 : f32 to vector<32x128xf32>
    %526 = arith.addf %525, %524 : vector<32x128xf32>
    %527 = arith.divf %525, %526 : vector<32x128xf32>
    %528 = arith.mulf %520, %527 : vector<32x128xf32>
    %c1_271 = arith.constant 1 : index
    %c0_272 = arith.constant 0 : index
    %c0_273 = arith.constant 0 : index
    %529 = vector.load %arg7[%c1_271, %c0_272, %c0_273] : memref<2x128x32xf32, #tpu.memory_space<vmem>>, vector<1x128x32xf32>
    %530 = vector.shape_cast %529 : vector<1x128x32xf32> to vector<128x32xf32>
    %cst_274 = arith.constant dense<0.000000e+00> : vector<32x32xf32>
    %531 = tpu.matmul %528, %530, %cst_274 {dimension_numbers = #tpu.dot_dimension_numbers<[1], [0], [0], [1], [0, 0, 1, 1], [], []>} : vector<32x128xf32>, vector<128x32xf32>, vector<32x32xf32> -> vector<32x32xf32>
    %532 = arith.addf %493, %531 : vector<32x32xf32>
    %533 = vector.broadcast %278 : vector<1x32xf32> to vector<32x32xf32>
    %534 = arith.addf %532, %533 : vector<32x32xf32>
    %535 = tpu.iota {dimensions = array<i32: 1>} : vector<1x32xi32>
    %c0_275 = arith.constant 0 : index
    %536 = memref.load %arg1[%c0_275] : memref<4xi32, #tpu.memory_space<smem>>
    %c0_i32 = arith.constant 0 : i32
    %537 = arith.addi %c0_i32, %536 : i32
    %538 = vector.broadcast %537 : i32 to vector<1x32xi32>
    %539 = arith.cmpi eq, %535, %538 : vector<1x32xi32>
    %540 = arith.extui %539 : vector<1x32xi1> to vector<1x32xi32>
    %541 = arith.sitofp %540 : vector<1x32xi32> to vector<1x32xf32>
    %c1_276 = arith.constant 1 : index
    %542 = memref.load %arg1[%c1_276] : memref<4xi32, #tpu.memory_space<smem>>
    %c8_i32 = arith.constant 8 : i32
    %543 = arith.addi %c8_i32, %542 : i32
    %544 = vector.broadcast %543 : i32 to vector<1x32xi32>
    %545 = arith.cmpi eq, %535, %544 : vector<1x32xi32>
    %546 = arith.extui %545 : vector<1x32xi1> to vector<1x32xi32>
    %547 = arith.sitofp %546 : vector<1x32xi32> to vector<1x32xf32>
    %c2_277 = arith.constant 2 : index
    %548 = memref.load %arg1[%c2_277] : memref<4xi32, #tpu.memory_space<smem>>
    %c16_i32 = arith.constant 16 : i32
    %549 = arith.addi %c16_i32, %548 : i32
    %550 = vector.broadcast %549 : i32 to vector<1x32xi32>
    %551 = arith.cmpi eq, %535, %550 : vector<1x32xi32>
    %552 = arith.extui %551 : vector<1x32xi1> to vector<1x32xi32>
    %553 = arith.sitofp %552 : vector<1x32xi32> to vector<1x32xf32>
    %c3_278 = arith.constant 3 : index
    %554 = memref.load %arg1[%c3_278] : memref<4xi32, #tpu.memory_space<smem>>
    %c24_i32 = arith.constant 24 : i32
    %555 = arith.addi %c24_i32, %554 : i32
    %556 = vector.broadcast %555 : i32 to vector<1x32xi32>
    %557 = arith.cmpi eq, %535, %556 : vector<1x32xi32>
    %558 = arith.extui %557 : vector<1x32xi1> to vector<1x32xi32>
    %559 = arith.sitofp %558 : vector<1x32xi32> to vector<1x32xf32>
    %560 = tpu.concatenate %541, %547, %553, %559 in 0 : vector<1x32xf32>, vector<1x32xf32>, vector<1x32xf32>, vector<1x32xf32> -> vector<4x32xf32>
    %cst_279 = arith.constant dense<0.000000e+00> : vector<4x32xf32>
    %561 = tpu.matmul %560, %534, %cst_279 {dimension_numbers = #tpu.dot_dimension_numbers<[1], [0], [0], [1], [0, 0, 1, 1], [], []>} : vector<4x32xf32>, vector<32x32xf32>, vector<4x32xf32> -> vector<4x32xf32>
    %c0_280 = arith.constant 0 : index
    %c0_281 = arith.constant 0 : index
    %562 = vector.load %arg9[%c0_280, %c0_281] : memref<2x32xf32, #tpu.memory_space<vmem>>, vector<2x32xf32>
    %563 = vector.extract_strided_slice %562 {offsets = [0, 0], sizes = [1, 32], strides = [1, 1]} : vector<2x32xf32> to vector<1x32xf32>
    %564 = vector.extract_strided_slice %562 {offsets = [1, 0], sizes = [1, 32], strides = [1, 1]} : vector<2x32xf32> to vector<1x32xf32>
    %cst_282 = arith.constant dense<0.000000e+00> : vector<4xf32>
    %565 = vector.multi_reduction <add>, %561, %cst_282 [1] : vector<4x32xf32> to vector<4xf32>
    %566 = vector.shape_cast %565 : vector<4xf32> to vector<4x1xf32>
    %cst_283 = arith.constant 3.200000e+01 : f32
    %567 = vector.broadcast %cst_283 : f32 to vector<4x1xf32>
    %568 = arith.divf %566, %567 : vector<4x1xf32>
    %569 = vector.broadcast %568 : vector<4x1xf32> to vector<4x32xf32>
    %570 = arith.subf %561, %569 : vector<4x32xf32>
    %571 = arith.mulf %570, %570 : vector<4x32xf32>
    %cst_284 = arith.constant dense<0.000000e+00> : vector<4xf32>
    %572 = vector.multi_reduction <add>, %571, %cst_284 [1] : vector<4x32xf32> to vector<4xf32>
    %573 = vector.shape_cast %572 : vector<4xf32> to vector<4x1xf32>
    %cst_285 = arith.constant 3.200000e+01 : f32
    %574 = vector.broadcast %cst_285 : f32 to vector<4x1xf32>
    %575 = arith.divf %573, %574 : vector<4x1xf32>
    %576 = vector.broadcast %568 : vector<4x1xf32> to vector<4x32xf32>
    %577 = arith.subf %561, %576 : vector<4x32xf32>
    %cst_286 = arith.constant 9.99999974E-6 : f32
    %578 = vector.broadcast %cst_286 : f32 to vector<4x1xf32>
    %579 = arith.addf %575, %578 : vector<4x1xf32>
    %580 = math.rsqrt %579 : vector<4x1xf32>
    %581 = vector.broadcast %580 : vector<4x1xf32> to vector<4x32xf32>
    %582 = arith.mulf %577, %581 : vector<4x32xf32>
    %583 = vector.broadcast %563 : vector<1x32xf32> to vector<4x32xf32>
    %584 = arith.mulf %582, %583 : vector<4x32xf32>
    %585 = vector.broadcast %564 : vector<1x32xf32> to vector<4x32xf32>
    %586 = arith.addf %584, %585 : vector<4x32xf32>
    %c0_287 = arith.constant 0 : index
    %c0_288 = arith.constant 0 : index
    %587 = vector.load %arg10[%c0_287, %c0_288] : memref<32x16xf32, #tpu.memory_space<vmem>>, vector<32x16xf32>
    %cst_289 = arith.constant dense<0.000000e+00> : vector<4x16xf32>
    %588 = tpu.matmul %586, %587, %cst_289 {dimension_numbers = #tpu.dot_dimension_numbers<[1], [0], [0], [1], [0, 0, 1, 1], [], []>} : vector<4x32xf32>, vector<32x16xf32>, vector<4x16xf32> -> vector<4x16xf32>
    %c0_290 = arith.constant 0 : index
    %c0_291 = arith.constant 0 : index
    %589 = vector.load %arg11[%c0_290, %c0_291] : memref<4x16xf32, #tpu.memory_space<vmem>>, vector<4x16xf32>
    tpu.vector_store %arg11[%c0_290, %c0_291], %588 {strides = array<i32>} : memref<4x16xf32, #tpu.memory_space<vmem>>, vector<4x16xf32>,
    return
  }
  func.func @transform_0(%arg0: i32, %arg1: memref<4xi32, #tpu.memory_space<smem>>) -> (i32, i32) {
    %c0_i32 = arith.constant 0 : i32
    %c0_i32_0 = arith.constant 0 : i32
    %c0_i32_1 = arith.constant 0 : i32
    return %c0_i32, %c0_i32_0 : i32, i32
  }
  func.func @transform_1(%arg0: i32, %arg1: memref<4xi32, #tpu.memory_space<smem>>) -> (i32, i32, i32) {
    %c0_i32 = arith.constant 0 : i32
    %c0_i32_0 = arith.constant 0 : i32
    %c0_i32_1 = arith.constant 0 : i32
    %c0_i32_2 = arith.constant 0 : i32
    return %c0_i32, %c0_i32_0, %c0_i32_1 : i32, i32, i32
  }
  func.func @transform_2(%arg0: i32, %arg1: memref<4xi32, #tpu.memory_space<smem>>) -> (i32, i32, i32) {
    %c0_i32 = arith.constant 0 : i32
    %c0_i32_0 = arith.constant 0 : i32
    %c0_i32_1 = arith.constant 0 : i32
    %c0_i32_2 = arith.constant 0 : i32
    return %c0_i32, %c0_i32_0, %c0_i32_1 : i32, i32, i32
  }
  func.func @transform_3(%arg0: i32, %arg1: memref<4xi32, #tpu.memory_space<smem>>) -> (i32, i32, i32) {
    %c0_i32 = arith.constant 0 : i32
    %c0_i32_0 = arith.constant 0 : i32
    %c0_i32_1 = arith.constant 0 : i32
    %c0_i32_2 = arith.constant 0 : i32
    return %c0_i32, %c0_i32_0, %c0_i32_1 : i32, i32, i32
  }
  func.func @transform_4(%arg0: i32, %arg1: memref<4xi32, #tpu.memory_space<smem>>) -> (i32, i32, i32) {
    %c0_i32 = arith.constant 0 : i32
    %c0_i32_0 = arith.constant 0 : i32
    %c0_i32_1 = arith.constant 0 : i32
    %c0_i32_2 = arith.constant 0 : i32
    return %c0_i32, %c0_i32_0, %c0_i32_1 : i32, i32, i32
  }
  func.func @transform_5(%arg0: i32, %arg1: memref<4xi32, #tpu.memory_space<smem>>) -> (i32, i32, i32) {
    %c0_i32 = arith.constant 0 : i32
    %c0_i32_0 = arith.constant 0 : i32
    %c0_i32_1 = arith.constant 0 : i32
    %c0_i32_2 = arith.constant 0 : i32
    return %c0_i32, %c0_i32_0, %c0_i32_1 : i32, i32, i32
  }
  func.func @transform_6(%arg0: i32, %arg1: memref<4xi32, #tpu.memory_space<smem>>) -> (i32, i32, i32) {
    %c0_i32 = arith.constant 0 : i32
    %c0_i32_0 = arith.constant 0 : i32
    %c0_i32_1 = arith.constant 0 : i32
    %c0_i32_2 = arith.constant 0 : i32
    return %c0_i32, %c0_i32_0, %c0_i32_1 : i32, i32, i32
  }
  func.func @transform_7(%arg0: i32, %arg1: memref<4xi32, #tpu.memory_space<smem>>) -> (i32, i32) {
    %c0_i32 = arith.constant 0 : i32
    %c0_i32_0 = arith.constant 0 : i32
    %c0_i32_1 = arith.constant 0 : i32
    return %c0_i32, %c0_i32_0 : i32, i32
  }
  func.func @transform_8(%arg0: i32, %arg1: memref<4xi32, #tpu.memory_space<smem>>) -> (i32, i32) {
    %c0_i32 = arith.constant 0 : i32
    %c0_i32_0 = arith.constant 0 : i32
    %c0_i32_1 = arith.constant 0 : i32
    return %c0_i32, %c0_i32_0 : i32, i32
  }
  func.func @transform_9(%arg0: i32, %arg1: memref<4xi32, #tpu.memory_space<smem>>) -> (i32, i32) {
    %c0_i32 = arith.constant 0 : i32
    %c0_i32_0 = arith.constant 0 : i32
    %c0_i32_1 = arith.constant 0 : i32
    return %c0_i32, %c0_i32_0 : i32, i32
  }
}

</mosaic_0001>

<bundles_post_ra>
// kernel: encode_text.1
= control target key start
LH: loop header
LB: loop body
LE: loop exit
PB: predicated region body
PF: predicated region fallthrough
CT: control target
= control target key end

     0   :  { %s13213_s0 = inlined_call_operand.vmem [shape: s32[4], index: 0, kind: input, shape index: {}]   ;;  %s13214_s1 = inlined_call_operand.vmem [shape: f32[32,32], index: 1, kind: input, shape index: {}]   ;;  %s13215_s2 = inlined_call_operand.vmem [shape: f32[24,32,8], index: 2, kind: input, shape index: {}]   ;;  %s13216_s3 = inlined_call_operand.vmem [shape: f32[24,1,8], index: 3, kind: input, shape index: {}]   ;;  %s13217_s4 = inlined_call_operand.vmem [shape: f32[8,8,32], index: 4, kind: input, shape index: {}]   ;;  %s13218_s5 = inlined_call_operand.vmem [shape: f32[2,32,128], index: 5, kind: input, shape index: {}]   ;;  %s13219_s6 = inlined_call_operand.vmem [shape: f32[2,128,32], index: 6, kind: input, shape index: {}]   ;;  %s13220_s7 = inlined_call_operand.vmem [shape: f32[2,7,128], index: 7, kind: input, shape index: {}]   ;;  %s13221_s8 = inlined_call_operand.vmem [shape: f32[2,32], index: 8, kind: input, shape index: {}]   ;;  %s13222_s9 = inlined_call_operand.vmem [shape: f32[32,16], index: 9, kind: input, shape index: {}]   ;;  %s13223_s10 = inlined_call_operand.hbm [shape: f32[4,16], index: 10, kind: output, shape index: {}]  }
   0x1   :  { %s15_s15 = sshll.u32 %s13213_s0, 4  ;;  %s16_s15 = int_to_ptr.vmem [resolvable:$true] %s15_s15 }
   0x2   :  { %s11641_s16 = scalar_lea.vmem %s16_s15, 16  ;;  %p11646_p1 = scmp.lt.s32.totalorder %s16_s15, %s16_s15 }
   0x3   :  { %p11642_p0 = scmp.ne.s32.totalorder %s16_s15, %s11641_s16  ;;  %p11647_p2 = scmp.lt.s32.totalorder %s11641_s16, %s11641_s16 }
   0x5   :  { %p11648_p3 = por %p11647_p2, %p11646_p1 }
   0x7   :  { %p11649_p4 = pnand %p11648_p3, %p11642_p0 }
   0x9   :  { %11652 = shalt.err (!%p11649_p4)  }
   0xa   :  { %s11679_s17 = smov [#allocation3]  }
   0xb   :  { %18 = dma.vmem_to_smem %s16_s15, 16, %s11679_s17, [#allocation2] }
   0xc   :  { %11675 = dma.done.wait [#allocation2], 16 }
   0xd   :  { %11676 = vsyncadd [#allocation2], 4294967280 }
   0xe   :  { %20 = sfence }
   0xf   :  { %v40_v0 = vld [vmem:[%s13214_s1] sm:$0xff]  ;;  %vm51_vm0 = vcmask 261120   ;;  %v42_v1 = vld [vmem:[%s13214_s1 + $0x10] sm:$0xff]  ;;  %v41_v2 = vld [vmem:[%s13214_s1 + $0x8] sm:$0xff] }
  0x10   :  { %v52_v3 = vsel %vm51_vm0, %v40_v0, 0.0  ;;  %v58_v4 = vsel %vm51_vm0, %v42_v1, 0.0  ;;  %v43_v5 = vld [vmem:[%s13214_s1 + $0x18] sm:$0xff] }
  0x11   :  { %21 = vsyncpa [#allocation5], 0  ;;  %53 = vadd.xlane.f32.xlu0 %v52_v3  ;;  %59 = vadd.xlane.f32.xlu1 %v58_v4  ;;  %v55_v6 = vsel %vm51_vm0, %v41_v2, 0.0  ;;  %v61_v7 = vsel %vm51_vm0, %v43_v5, 0.0  ;;  %v121_v28 = vld [vmem:[%s13215_s2] sm:$0xff]  ;;  %v122_v29 = vld [vmem:[%s13215_s2 + $0x8] sm:$0xff]  ;;  %v44_v45 = vlaneseq }
  0x12   :  { %v9444_v30 = vld [vmem:[%s13215_s2 + $0x80] sm:$0xff]  ;;  %v11127_v31 = vpack.c.bf16 %v122_v29, %v121_v28  ;;  %v9445_v32 = vld [vmem:[%s13215_s2 + $0x88] sm:$0xff]  ;;  %v123_v34 = vld [vmem:[%s13215_s2 + $0x10] sm:$0xff]  ;;  %vm11681_vm1 = vmmov 0   ;;  %vm425_vm2 = vcmask 64512   ;;  %s9849_s21 = sld [smem:[#allocation3 + $0x2]] }
  0x13   :  { %v11135_v33 = vpack.c.bf16 %v9445_v32, %v9444_v30  ;;  %v124_v35 = vld [vmem:[%s13215_s2 + $0x18] sm:$0xff]  ;;  %v9446_v36 = vld [vmem:[%s13215_s2 + $0x90] sm:$0xff]  ;;  %v9454_v40 = vld [vmem:[%s13215_s2 + $0x100] sm:$0xff]  ;;  %v11810_v51 = vshrl.u32 %v44_v45, 7  ;;  %s9219_s22 = sld [smem:[#allocation3]]  ;;  %s9851_s23 = sld [smem:[#allocation3 + $0x3]] }
  0x14   :  { %11128 = vmatprep.subr.bf16.mxu0 %v11127_v31  ;;  %v11131_v37 = vpack.c.bf16 %v124_v35, %v123_v34  ;;  %v9447_v38 = vld [vmem:[%s13215_s2 + $0x98] sm:$0xff]  ;;  %v9455_v41 = vld [vmem:[%s13215_s2 + $0x108] sm:$0xff]  ;;  %v50_v57 = vld [vmem:[%s13220_s7] sm:$0x7f]  ;;  %vm9242_vm7 = vcmask 1040384   ;;  %vm9244_vm9 = vcmask 1041408  }
  0x15   :  { %56 = vadd.xlane.f32.xlu0 %v55_v6  ;;  %62 = vadd.xlane.f32.xlu1 %v61_v7  ;;  %v11139_v39 = vpack.c.bf16 %v9447_v38, %v9446_v36  ;;  %v11143_v42 = vpack.c.bf16 %v9455_v41, %v9454_v40  ;;  %v11813_v56 = vsub.s32 0, %v11810_v51  ;;  %v11819_v59 = vsub.s32 1, %v11810_v51  ;;  %v9456_v7 = vld [vmem:[%s13215_s2 + $0x110] sm:$0xff]  ;;  %v9459_v32 = vld [vmem:[%s13216_s3 + $0x8] ss:$0 sm:$0xff] }
  0x16   :  { %11136 = vmatprep.subr.bf16.mxu1 %v11135_v33  ;;  %11130 = vmatpush3.bf16.msra.mxu0 %v11127_v31  ;;  %vm9246_vm10 = vcmask 1042432   ;;  %vm9322_vm11 = vcmask 257024   ;;  %vm9423_vm12 = vcmask 125952  }
  0x17   :  { %11138 = vmatpush3.bf16.msra.mxu1 %v11135_v33  ;;  %11132 = vmatprep.subr.bf16.mxu0 %v11131_v37  ;;  %v108_v60 = vrot.slane %v50_v57, %v11813_v56  ;;  %v116_v62 = vrot.slane %v50_v57, %v11819_v59 }
  0x18   :  { %11140 = vmatprep.subr.bf16.mxu1 %v11139_v39 }
  0x19   :  { %s9237_s25 = sadd.s32 24, %s9851_s23 }
  0x1a   :  { %11134 = vmatpush3.bf16.msra.mxu0 %v11131_v37 }
  0x1b   :  { %11142 = vmatpush3.bf16.msra.mxu1 %v11139_v39  ;;  %11144 = vmatprep.subr.bf16.mxu0 %v11143_v42 }
  0x9e   :  { %v54_v8 = vpop.xlane.xlu0 %53  ;;  %v60_v9 = vpop.xlane.xlu1 %59 }
  0x9f   :  { %v65_v10 = vmul.f32 0.03125, %v54_v8  ;;  %v67_v11 = vmul.f32 0.03125, %v60_v9  ;;  %v9457_v8 = vld [vmem:[%s13215_s2 + $0x118] sm:$0xff] }
  0xa1   :  { %v11759_v12 = vsub.f32 %v40_v0, %v65_v10  ;;  %v11761_v13 = vsub.f32 %v42_v1, %v67_v11 }
  0xa2   :  { %v57_v14 = vpop.xlane.xlu0 %56  ;;  %v63_v15 = vpop.xlane.xlu1 %62 }
  0xa3   :  { %v66_v16 = vmul.f32 0.03125, %v57_v14  ;;  %v68_v17 = vmul.f32 0.03125, %v63_v15  ;;  %v73_v18 = vmul.f32 %v11759_v12, %v11759_v12  ;;  %v75_v19 = vmul.f32 %v11761_v13, %v11761_v13 }
  0xa4   :  { %v11147_v14 = vpack.c.bf16 %v9457_v8, %v9456_v7 }
  0xa5   :  { %v11767_v20 = vsub.f32 %v41_v2, %v66_v16  ;;  %v11769_v21 = vsub.f32 %v43_v5, %v68_v17  ;;  %v77_v22 = vsel %vm51_vm0, %v73_v18, 0.0  ;;  %v83_v23 = vsel %vm51_vm0, %v75_v19, 0.0  ;;  %v9449_v18 = vld [vmem:[%s13216_s3 + $0x4] ss:$0 sm:$0xff] }
  0xa6   :  { %78 = vadd.xlane.f32.xlu0 %v77_v22  ;;  %v11680_v17 = vmov 0.0  }
  0xa7   :  { %v74_v24 = vmul.f32 %v11767_v20, %v11767_v20  ;;  %v76_v25 = vmul.f32 %v11769_v21, %v11769_v21  ;;  %10323 = vmatprep.subr.mxu1 %v11680_v17 }
  0xa9   :  { %v80_v26 = vsel %vm51_vm0, %v74_v24, 0.0  ;;  %v86_v27 = vsel %vm51_vm0, %v76_v25, 0.0 }
  0xaa   :  { %84 = vadd.xlane.f32.xlu0 %v83_v23  ;;  %81 = vadd.xlane.f32.xlu1 %v80_v26  ;;  %v9439_v23 = vld [vmem:[%s13216_s3] ss:$0 sm:$0xff] }
  0xae   :  { %87 = vadd.xlane.f32.xlu1 %v86_v27 }
 0x133   :  { %v79_v43 = vpop.xlane.xlu0 %78 }
 0x134   :  { %v89_v44 = vmul.f32 0.03125, %v79_v43 }
 0x136   :  { %v93_v46 = vadd.f32 1e-05, %v89_v44 }
 0x137   :  { %v82_v47 = vpop.xlane.xlu1 %81  ;;  %v85_v48 = vpop.xlane.xlu0 %84 }
 0x138   :  { %11441 = vrsqrt.f32 %v93_v46  ;;  %v90_v49 = vmul.f32 0.03125, %v82_v47  ;;  %v91_v50 = vmul.f32 0.03125, %v85_v48  ;;  %v11907_v46 = vand.u32 127, %v44_v45 }
 0x139   :  { %v11682_v47 = vmov -1e+09  }
 0x13a   :  { %v94_v52 = vadd.f32 1e-05, %v90_v49  ;;  %v95_v53 = vadd.f32 1e-05, %v91_v50  ;;  %vm48_vm3 = vcmp.le.s32.totalorder %v11907_v46, %v11810_v51 }
 0x13b   :  { %v88_v54 = vpop.xlane.xlu1 %87  ;;  %v11911_v48 = vsel %vm48_vm3, 0.0, %v11682_v47 }
 0x13c   :  { %11443 = vrsqrt.f32 %v94_v52  ;;  %v92_v55 = vmul.f32 0.03125, %v88_v54 }
 0x13d   :  { %11445 = vrsqrt.f32 %v95_v53 }
 0x13e   :  { %v96_v58 = vadd.f32 1e-05, %v92_v55 }
 0x140   :  { %11447 = vrsqrt.f32 %v96_v58 }
 0x142   :  { %v11442_v61 = vpop.eup %11441 }
 0x143   :  { %v101_v63 = vmul.f32 %v11442_v61, %v11759_v12 }
 0x145   :  { %v109_v0 = vmul.f32 %v108_v60, %v101_v63 }
 0x146   :  { %v11444_v1 = vpop.eup %11443 }
 0x147   :  { %v11446_v2 = vpop.eup %11445  ;;  %v11824_v3 = vadd.f32 %v116_v62, %v109_v0  ;;  %v102_v4 = vmul.f32 %v11444_v1, %v11767_v20 }
 0x148   :  { %v103_v5 = vmul.f32 %v11446_v2, %v11761_v13 }
 0x149   :  { %v110_v6 = vmul.f32 %v108_v60, %v102_v4  ;;  %10289 = vmatprep.mubr.msk.f32.mxu0 %vm51_vm0, %v11824_v3  ;;  %10303 = vmatprep.mubr.msk.f32.mxu1 %vm51_vm0, %v11824_v3 }
 0x14a   :  { %v11448_v9 = vpop.eup %11447  ;;  %v111_v10 = vmul.f32 %v108_v60, %v103_v5 }
 0x14b   :  { %v11838_v11 = vadd.f32 %v116_v62, %v110_v6  ;;  %v104_v12 = vmul.f32 %v11448_v9, %v11769_v21 }
 0x14c   :  { %v11841_v13 = vadd.f32 %v116_v62, %v111_v10 }
 0x14d   :  { %v112_v15 = vmul.f32 %v108_v60, %v104_v12  ;;  %10290 = vmatmul.mubr.msk.f32.vlgmr.msra.gmra.mrb[0].mxu0 %vm51_vm0, %v11838_v11  ;;  %10304 = vmatmul.mubr.msk.f32.vlgmr.msra.gmra.mrb[0].mxu1 %vm51_vm0, %v11838_v11 }
 0x14e   :  { %10292 = vmatprep.mubr.msk.f32.mxu0 %vm51_vm0, %v11841_v13  ;;  %10306 = vmatprep.mubr.msk.f32.mxu1 %vm51_vm0, %v11841_v13 }
 0x14f   :  { %v11851_v16 = vadd.f32 %v116_v62, %v112_v15  ;;  %11146 = vmatpush3.bf16.msra.mxu0 %v11143_v42 }
 0x150   :  { %11148 = vmatprep.subr.bf16.mxu0 %v11147_v14 }
 0x151   :  { %10293 = vmatmul.mubr.msk.f32.gmra.mrb[2].mxu0 %vm51_vm0, %v11851_v16  ;;  %10307 = vmatmul.mubr.msk.f32.gmra.mrb[2].mxu1 %vm51_vm0, %v11851_v16 }
 0x152   :  { %10317 = vmatprep.mubr.msk.f32.mxu0 %vm51_vm0, %v11824_v3  ;;  %10325 = vmatprep.mubr.msk.f32.mxu1 %vm11681_vm1, %v11680_v17 }
 0x153   :  { %11150 = vmatpush3.bf16.msra.mxu0 %v11147_v14 }
 0x154   :  { %10333 = vmatprep.subr.mxu0 %v11680_v17 }
 0x156   :  { %10318 = vmatmul.mubr.msk.f32.vlgmr.msra.gmra.mrb[4].mxu0 %vm51_vm0, %v11838_v11 }
 0x157   :  { %10320 = vmatprep.mubr.msk.f32.mxu0 %vm51_vm0, %v11841_v13 }
 0x15a   :  { %10321 = vmatmul.mubr.msk.f32.gmra.mrb[6].mxu0 %vm51_vm0, %v11851_v16 }
 0x15b   :  { %10335 = vmatprep.mubr.msk.f32.mxu0 %vm11681_vm1, %v11680_v17 }
 0x220   :  { %v10291_v19 = vpop.f32.mrb[0].mxu0  ;;  %v10305_v20 = vpop.f32.mrb[0].mxu1 }
 0x221   :  { %v210_v21 = vpop.f32.mrb[1].mxu0  ;;  %v308_v22 = vpop.f32.mrb[1].mxu1  ;;  %v314_v30 = vadd.f32 %v10305_v20, %v9449_v18  ;;  %v216_v33 = vadd.f32 %v10291_v19, %v9439_v23 }
 0x222   :  { %v309_v24 = vadd.f32 %v9449_v18, %v308_v22  ;;  %v211_v27 = vadd.f32 %v9439_v23, %v210_v21 }
 0x224   :  { %v10294_v25 = vpop.f32.mrb[2].mxu0  ;;  %v10308_v26 = vpop.f32.mrb[2].mxu1  ;;  %10324 = vmatpush3.xpose.msk.msra.mxu1 %vm425_vm2, %v309_v24 }
 0x225   :  { %v220_v28 = vpop.f32.mrb[3].mxu0  ;;  %v318_v29 = vpop.f32.mrb[3].mxu1  ;;  %10328 = vmatprep.subr.mxu1 %v11680_v17  ;;  %v324_v36 = vadd.f32 %v10308_v26, %v9449_v18  ;;  %v226_v39 = vadd.f32 %v10294_v25, %v9439_v23 }
 0x226   :  { %v319_v31 = vadd.f32 %v9449_v18, %v318_v29  ;;  %v221_v34 = vadd.f32 %v9439_v23, %v220_v28 }
 0x227   :  { %10326 = vmatmul.mubr.msk.f32.vlgmr.msra.gmra.mrb[4].mxu1 %vm425_vm2, %v211_v27 }
 0x228   :  { %10329 = vmatpush3.xpose.msk.msra.mxu1 %vm425_vm2, %v314_v30  ;;  %10334 = vmatpush3.xpose.msk.msra.mxu0 %vm425_vm2, %v319_v31 }
 0x229   :  { %v10319_v35 = vpop.f32.mrb[4].mxu0  ;;  %10330 = vmatprep.mubr.msk.f32.mxu1 %vm11681_vm1, %v11680_v17  ;;  %10338 = vmatprep.subr.mxu1 %v11680_v17 }
 0x22a   :  { %v406_v37 = vpop.f32.mrb[5].mxu0  ;;  %10343 = vmatprep.subr.mxu0 %v11680_v17  ;;  %v412_v41 = vadd.f32 %v10319_v35, %v9459_v32 }
 0x22b   :  { %v407_v38 = vadd.f32 %v9459_v32, %v406_v37  ;;  %10331 = vmatmul.mubr.msk.f32.vlgmr.msra.gmra.mrb[6].mxu1 %vm425_vm2, %v216_v33  ;;  %10336 = vmatmul.mubr.msk.f32.vlgmr.msra.gmra.mrb[8].mxu0 %vm425_vm2, %v221_v34  ;;  %v9477_v37 = vld [vmem:[%s13215_s2 + $0x28] sm:$0xff] }
 0x22c   :  { %10339 = vmatpush3.xpose.msk.msra.mxu1 %vm425_vm2, %v324_v36  ;;  %10340 = vmatprep.mubr.msk.f32.mxu1 %vm11681_vm1, %v11680_v17  ;;  %v9476_v36 = vld [vmem:[%s13215_s2 + $0x20] sm:$0xff] }
 0x22d   :  { %v10322_v40 = vpop.f32.mrb[6].mxu0  ;;  %10344 = vmatpush3.msra.mxu0 %v407_v38  ;;  %10348 = vmatprep.subr.mxu1 %v11680_v17 }
 0x22e   :  { %v11895_v42 = vadd.f32 %v10322_v40, %v9459_v32  ;;  %v416_v43 = vpop.f32.mrb[7].mxu0  ;;  %10345 = vmatprep.mubr.msk.f32.mxu0 %vm11681_vm1, %v11680_v17  ;;  %10353 = vmatprep.subr.mxu0 %v11680_v17  ;;  %v11151_v40 = vpack.c.bf16 %v9477_v37, %v9476_v36 }
 0x22f   :  { %v11900_v44 = vadd.f32 %v9459_v32, %v416_v43  ;;  %10341 = vmatmul.mubr.msk.f32.vlgmr.msra.gmra.mrb[8].mxu1 %vm425_vm2, %v226_v39  ;;  %v9479_v43 = vld [vmem:[%s13215_s2 + $0x38] sm:$0xff] }
 0x230   :  { %10349 = vmatpush3.msra.mxu1 %v412_v41  ;;  %10350 = vmatprep.mubr.msk.f32.mxu1 %vm11681_vm1, %v11680_v17  ;;  %v9478_v41 = vld [vmem:[%s13215_s2 + $0x30] sm:$0xff] }
 0x231   :  { %10358 = vmatprep.subr.mxu1 %v11680_v17 }
 0x2fa   :  { %v498_v49 = vpop.f32.mrb[4].mxu1 }
 0x2fb   :  { %v730_v50 = vmul.f32 0.35355338, %v498_v49  ;;  %v10327_v52 = vpop.f32.mrb[5].mxu1  ;;  %v9486_v49 = vld [vmem:[%s13215_s2 + $0xa0] sm:$0xff] }
 0x2fd   :  { %v734_v53 = vadd.f32 %v730_v50, %v11911_v48  ;;  %v9487_v50 = vld [vmem:[%s13215_s2 + $0xa8] sm:$0xff] }
 0x2fe   :  { %v574_v54 = vpop.f32.mrb[6].mxu1  ;;  %v650_v55 = vpop.f32.mrb[8].mxu0 }
 0x2ff   :  { %v731_v57 = vmul.f32 0.35355338, %v574_v54  ;;  %v732_v58 = vmul.f32 0.35355338, %v650_v55  ;;  %v10332_v60 = vpop.f32.mrb[7].mxu1  ;;  %v10337_v61 = vpop.f32.mrb[9].mxu0  ;;  %v11155_v55 = vpack.c.bf16 %v9479_v43, %v9478_v41 }
 0x300   :  { %v738_v45 = vsel %vm425_vm2, %v734_v53, -inf  ;;  %v11159_v60 = vpack.c.bf16 %v9487_v50, %v9486_v49  ;;  %v9497_v61 = vld [vmem:[%s13215_s2 + $0x128] sm:$0xff] }
 0x301   :  { %739 = vmax.xlane.f32.xlu1 %v738_v45  ;;  %v735_v62 = vadd.f32 %v731_v57, %v11911_v48  ;;  %v736_v63 = vadd.f32 %v732_v58, %v11911_v48  ;;  %v9488_v57 = vld [vmem:[%s13215_s2 + $0xb0] sm:$0xff]  ;;  %v9489_v58 = vld [vmem:[%s13215_s2 + $0xb8] sm:$0xff] }
 0x302   :  { %v726_v0 = vpop.f32.mrb[8].mxu1 }
 0x303   :  { %v733_v1 = vmul.f32 0.35355338, %v726_v0  ;;  %v10342_v2 = vpop.f32.mrb[9].mxu1  ;;  %v741_v4 = vsel %vm425_vm2, %v735_v62, -inf  ;;  %v744_v5 = vsel %vm425_vm2, %v736_v63, -inf }
 0x304   :  { %742 = vmax.xlane.f32.xlu0 %v741_v4 }
 0x305   :  { %745 = vmax.xlane.f32.xlu1 %v744_v5  ;;  %v737_v6 = vadd.f32 %v733_v1, %v11911_v48  ;;  %v9498_v1 = vld [vmem:[%s13215_s2 + $0x130] sm:$0xff] }
 0x307   :  { %v747_v7 = vsel %vm425_vm2, %v737_v6, -inf }
 0x308   :  { %748 = vmax.xlane.f32.xlu0 %v747_v7 }
 0x38e   :  { %v740_v8 = vpop.xlane.xlu1 %739 }
 0x38f   :  { %v750_v9 = vsub.f32 %v734_v53, %v740_v8 }
 0x391   :  { %v754_v10 = vmul.f32 1.442695, %v750_v9  ;;  %v743_v12 = vpop.xlane.xlu0 %742 }
 0x392   :  { %v751_v14 = vsub.f32 %v735_v62, %v743_v12  ;;  %v746_v15 = vpop.xlane.xlu1 %745 }
 0x393   :  { %11449 = vpow2.f32 %v754_v10  ;;  %v752_v18 = vsub.f32 %v736_v63, %v746_v15  ;;  %v11163_v63 = vpack.c.bf16 %v9489_v58, %v9488_v57 }
 0x394   :  { %v756_v19 = vmul.f32 1.442695, %v751_v14 }
 0x395   :  { %v758_v20 = vmul.f32 1.442695, %v752_v18  ;;  %v749_v21 = vpop.xlane.xlu0 %748  ;;  %v9491_v18 = vld [vmem:[%s13216_s3 + $0x5] ss:$0 sm:$0xff] }
 0x396   :  { %11451 = vpow2.f32 %v756_v19  ;;  %v753_v22 = vsub.f32 %v737_v6, %v749_v21 }
 0x397   :  { %11453 = vpow2.f32 %v758_v20 }
 0x398   :  { %v760_v23 = vmul.f32 1.442695, %v753_v22  ;;  %v9481_v22 = vld [vmem:[%s13216_s3 + $0x1] ss:$0 sm:$0xff] }
 0x39a   :  { %11455 = vpow2.f32 %v760_v23 }
 0x39d   :  { %v11450_v24 = vpop.eup %11449 }
 0x39e   :  { %v762_v25 = vsel %vm425_vm2, %v11450_v24, 0.0 }
 0x39f   :  { %763 = vadd.xlane.f32.xlu1 %v762_v25 }
 0x3a0   :  { %v11452_v26 = vpop.eup %11451 }
 0x3a1   :  { %v11454_v27 = vpop.eup %11453  ;;  %v765_v28 = vsel %vm425_vm2, %v11452_v26, 0.0 }
 0x3a2   :  { %766 = vadd.xlane.f32.xlu0 %v765_v28  ;;  %v768_v29 = vsel %vm425_vm2, %v11454_v27, 0.0 }
 0x3a3   :  { %769 = vadd.xlane.f32.xlu1 %v768_v29 }
 0x3a4   :  { %v11456_v30 = vpop.eup %11455 }
 0x3a5   :  { %v771_v31 = vsel %vm425_vm2, %v11456_v30, 0.0 }
 0x3a6   :  { %772 = vadd.xlane.f32.xlu0 %v771_v31 }
 0x42c   :  { %v764_v32 = vpop.xlane.xlu1 %763 }
 0x42d   :  { %11457 = vrcp.f32 %v764_v32  ;;  %v9501_v32 = vld [vmem:[%s13216_s3 + $0x9] ss:$0 sm:$0xff] }
 0x42f   :  { %v767_v33 = vpop.xlane.xlu0 %766 }
 0x430   :  { %11459 = vrcp.f32 %v767_v33  ;;  %v770_v34 = vpop.xlane.xlu1 %769 }
 0x431   :  { %11461 = vrcp.f32 %v770_v34 }
 0x433   :  { %v773_v35 = vpop.xlane.xlu0 %772 }
 0x434   :  { %11463 = vrcp.f32 %v773_v35 }
 0x437   :  { %v11458_v38 = vpop.eup %11457 }
 0x438   :  { %v775_v39 = vmul.f32 %v11458_v38, %v11450_v24 }
 0x43a   :  { %v11460_v47 = vpop.eup %11459  ;;  %10346 = vmatmul.mubr.msk.f32.vlgmr.msra.gmra.mrb[10].mxu0 %vm425_vm2, %v775_v39 }
 0x43b   :  { %v11462_v52 = vpop.eup %11461  ;;  %v777_v53 = vmul.f32 %v11460_v47, %v11452_v26  ;;  %10354 = vmatpush3.msra.mxu0 %v11900_v44  ;;  %10355 = vmatprep.mubr.msk.f32.mxu0 %vm11681_vm1, %v11680_v17  ;;  %v9496_v44 = vld [vmem:[%s13215_s2 + $0x120] sm:$0xff] }
 0x43c   :  { %v779_v54 = vmul.f32 %v11462_v52, %v11454_v27  ;;  %11152 = vmatprep.subr.bf16.mxu0 %v11151_v40  ;;  %v11167_v0 = vpack.c.bf16 %v9497_v61, %v9496_v44 }
 0x43d   :  { %10351 = vmatmul.mubr.msk.f32.vlgmr.msra.gmra.mrb[10].mxu1 %vm425_vm2, %v777_v53 }
 0x43e   :  { %v11464_v45 = vpop.eup %11463  ;;  %10356 = vmatmul.mubr.msk.f32.vlgmr.msra.gmra.mrb[12].mxu0 %vm425_vm2, %v779_v54  ;;  %10359 = vmatpush3.msra.mxu1 %v11895_v42  ;;  %v9499_v42 = vld [vmem:[%s13215_s2 + $0x138] sm:$0xff] }
 0x43f   :  { %v781_v62 = vmul.f32 %v11464_v45, %v11456_v30  ;;  %11154 = vmatpush3.bf16.msra.mxu0 %v11151_v40  ;;  %10371 = vmatprep.mubr.msk.f32.mxu0 %vm51_vm0, %v11824_v3  ;;  %v11171_v2 = vpack.c.bf16 %v9499_v42, %v9498_v1 }
 0x440   :  { %10360 = vmatprep.mubr.msk.f32.mxu1 %vm11681_vm1, %v11680_v17  ;;  %11156 = vmatprep.subr.bf16.mxu0 %v11155_v55 }
 0x441   :  { %11160 = vmatprep.subr.bf16.mxu1 %v11159_v60  ;;  %10361 = vmatmul.mubr.msk.f32.vlgmr.msra.gmra.mrb[12].mxu1 %vm425_vm2, %v781_v62 }
 0x442   :  { %11162 = vmatpush3.bf16.msra.mxu1 %v11159_v60  ;;  %10385 = vmatprep.mubr.msk.f32.mxu1 %vm51_vm0, %v11824_v3 }
 0x443   :  { %11158 = vmatpush3.bf16.msra.mxu0 %v11155_v55  ;;  %11164 = vmatprep.subr.bf16.mxu1 %v11163_v63 }
 0x444   :  { %11168 = vmatprep.subr.bf16.mxu0 %v11167_v0 }
 0x446   :  { %10372 = vmatmul.mubr.msk.f32.vlgmr.msra.gmra.mrb[14].mxu0 %vm51_vm0, %v11838_v11  ;;  %11166 = vmatpush3.bf16.msra.mxu1 %v11163_v63 }
 0x447   :  { %10374 = vmatprep.mubr.msk.f32.mxu0 %vm51_vm0, %v11841_v13  ;;  %11170 = vmatpush3.bf16.msra.mxu0 %v11167_v0 }
 0x448   :  { %11172 = vmatprep.subr.bf16.mxu0 %v11171_v2  ;;  %10405 = vmatprep.subr.mxu1 %v11680_v17 }
 0x449   :  { %10386 = vmatmul.mubr.msk.f32.vlgmr.msra.gmra.mrb[14].mxu1 %vm51_vm0, %v11838_v11 }
 0x44a   :  { %10375 = vmatmul.mubr.msk.f32.gmra.mrb[16].mxu0 %vm51_vm0, %v11851_v16  ;;  %10388 = vmatprep.mubr.msk.f32.mxu1 %vm51_vm0, %v11841_v13 }
 0x44b   :  { %11174 = vmatpush3.bf16.msra.mxu0 %v11171_v2  ;;  %10399 = vmatprep.mubr.msk.f32.mxu0 %vm51_vm0, %v11824_v3 }
 0x44c   :  { %10415 = vmatprep.subr.mxu0 %v11680_v17 }
 0x44d   :  { %10389 = vmatmul.mubr.msk.f32.gmra.mrb[16].mxu1 %vm51_vm0, %v11851_v16 }
 0x44e   :  { %10400 = vmatmul.mubr.msk.f32.vlgmr.msra.gmra.mrb[18].mxu0 %vm51_vm0, %v11838_v11  ;;  %10407 = vmatprep.mubr.msk.f32.mxu1 %vm11681_vm1, %v11680_v17 }
 0x44f   :  { %10402 = vmatprep.mubr.msk.f32.mxu0 %vm51_vm0, %v11841_v13 }
 0x452   :  { %10403 = vmatmul.mubr.msk.f32.gmra.mrb[20].mxu0 %vm51_vm0, %v11851_v16 }
 0x453   :  { %10417 = vmatprep.mubr.msk.f32.mxu0 %vm11681_vm1, %v11680_v17 }
 0x50d   :  { %v12001_v4 = vpop.f32.mrb[10].mxu0 }
 0x50e   :  { %v10347_v5 = vpop.f32.mrb[11].mxu0 }
 0x510   :  { %v12003_v6 = vpop.f32.mrb[10].mxu1 }
 0x511   :  { %v12005_v7 = vpop.f32.mrb[12].mxu0  ;;  %v10352_v8 = vpop.f32.mrb[11].mxu1 }
 0x512   :  { %v10357_v9 = vpop.f32.mrb[13].mxu0 }
 0x514   :  { %v12007_v10 = vpop.f32.mrb[12].mxu1 }
 0x515   :  { %v10362_v12 = vpop.f32.mrb[13].mxu1 }
 0x519   :  { %v10373_v14 = vpop.f32.mrb[14].mxu0 }
 0x51a   :  { %v1154_v15 = vpop.f32.mrb[15].mxu0  ;;  %v1160_v33 = vadd.f32 %v10373_v14, %v9481_v22 }
 0x51b   :  { %v1155_v26 = vadd.f32 %v9481_v22, %v1154_v15 }
 0x51c   :  { %v10387_v19 = vpop.f32.mrb[14].mxu1 }
 0x51d   :  { %v10376_v20 = vpop.f32.mrb[16].mxu0  ;;  %v1252_v21 = vpop.f32.mrb[15].mxu1  ;;  %v1258_v29 = vadd.f32 %v10387_v19, %v9491_v18 }
 0x51e   :  { %v1164_v23 = vpop.f32.mrb[17].mxu0  ;;  %v1253_v24 = vadd.f32 %v9491_v18, %v1252_v21  ;;  %v1170_v41 = vadd.f32 %v10376_v20, %v9481_v22 }
 0x51f   :  { %v1165_v34 = vadd.f32 %v9481_v22, %v1164_v23 }
 0x520   :  { %v10390_v25 = vpop.f32.mrb[16].mxu1  ;;  %10406 = vmatpush3.xpose.msk.msra.mxu1 %vm425_vm2, %v1253_v24 }
 0x521   :  { %v10401_v27 = vpop.f32.mrb[18].mxu0  ;;  %v1262_v28 = vpop.f32.mrb[17].mxu1  ;;  %10410 = vmatprep.subr.mxu1 %v11680_v17  ;;  %v1268_v36 = vadd.f32 %v10390_v25, %v9491_v18 }
 0x522   :  { %v1263_v30 = vadd.f32 %v9491_v18, %v1262_v28  ;;  %v1350_v31 = vpop.f32.mrb[19].mxu0  ;;  %v1356_v43 = vadd.f32 %v10401_v27, %v9501_v32 }
 0x523   :  { %10408 = vmatmul.mubr.msk.f32.vlgmr.msra.gmra.mrb[18].mxu1 %vm425_vm2, %v1155_v26  ;;  %v1351_v37 = vadd.f32 %v9501_v32, %v1350_v31 }
 0x524   :  { %10411 = vmatpush3.xpose.msk.msra.mxu1 %vm425_vm2, %v1258_v29  ;;  %10416 = vmatpush3.xpose.msk.msra.mxu0 %vm425_vm2, %v1263_v30 }
 0x525   :  { %v10404_v35 = vpop.f32.mrb[20].mxu0  ;;  %10412 = vmatprep.mubr.msk.f32.mxu1 %vm11681_vm1, %v11680_v17  ;;  %10420 = vmatprep.subr.mxu1 %v11680_v17 }
 0x526   :  { %v12026_v38 = vadd.f32 %v10404_v35, %v9501_v32  ;;  %v1360_v39 = vpop.f32.mrb[21].mxu0  ;;  %10425 = vmatprep.subr.mxu0 %v11680_v17 }
 0x527   :  { %v12029_v40 = vadd.f32 %v9501_v32, %v1360_v39  ;;  %10413 = vmatmul.mubr.msk.f32.vlgmr.msra.gmra.mrb[20].mxu1 %vm425_vm2, %v1160_v33  ;;  %10418 = vmatmul.mubr.msk.f32.vlgmr.msra.gmra.mrb[22].mxu0 %vm425_vm2, %v1165_v34 }
 0x528   :  { %10421 = vmatpush3.xpose.msk.msra.mxu1 %vm425_vm2, %v1268_v36  ;;  %10426 = vmatpush3.msra.mxu0 %v1351_v37 }
 0x529   :  { %10422 = vmatprep.mubr.msk.f32.mxu1 %vm11681_vm1, %v11680_v17  ;;  %10430 = vmatprep.subr.mxu1 %v11680_v17 }
 0x52a   :  { %10427 = vmatprep.mubr.msk.f32.mxu0 %vm11681_vm1, %v11680_v17  ;;  %10435 = vmatprep.subr.mxu0 %v11680_v17 }
 0x52b   :  { %10423 = vmatmul.mubr.msk.f32.vlgmr.msra.gmra.mrb[22].mxu1 %vm425_vm2, %v1170_v41  ;;  %v9527_v41 = vld [vmem:[%s13215_s2 + $0x40] sm:$0xff] }
 0x52c   :  { %10431 = vmatpush3.msra.mxu1 %v1356_v43  ;;  %10432 = vmatprep.mubr.msk.f32.mxu1 %vm11681_vm1, %v11680_v17  ;;  %v9528_v43 = vld [vmem:[%s13215_s2 + $0x48] sm:$0xff] }
 0x52d   :  { %10440 = vmatprep.subr.mxu1 %v11680_v17 }
 0x5f6   :  { %v1441_v47 = vpop.f32.mrb[18].mxu1 }
 0x5f7   :  { %v1673_v49 = vmul.f32 0.35355338, %v1441_v47  ;;  %v10409_v50 = vpop.f32.mrb[19].mxu1 }
 0x5f9   :  { %v1677_v52 = vadd.f32 %v1673_v49, %v11911_v48 }
 0x5fa   :  { %v1517_v53 = vpop.f32.mrb[20].mxu1  ;;  %v1593_v54 = vpop.f32.mrb[22].mxu0 }
 0x5fb   :  { %v1674_v55 = vmul.f32 0.35355338, %v1517_v53  ;;  %v1675_v57 = vmul.f32 0.35355338, %v1593_v54  ;;  %v10414_v58 = vpop.f32.mrb[21].mxu1  ;;  %v10419_v60 = vpop.f32.mrb[23].mxu0 }
 0x5fc   :  { %v1681_v44 = vsel %vm425_vm2, %v1677_v52, -inf  ;;  %v9529_v54 = vld [vmem:[%s13215_s2 + $0x50] sm:$0xff]  ;;  %v9537_v60 = vld [vmem:[%s13215_s2 + $0xc0] sm:$0xff] }
 0x5fd   :  { %1682 = vmax.xlane.f32.xlu1 %v1681_v44  ;;  %v1679_v61 = vadd.f32 %v1675_v57, %v11911_v48  ;;  %v1678_v45 = vadd.f32 %v1674_v55, %v11911_v48  ;;  %v9530_v55 = vld [vmem:[%s13215_s2 + $0x58] sm:$0xff]  ;;  %v9538_v44 = vld [vmem:[%s13215_s2 + $0xc8] sm:$0xff] }
 0x5fe   :  { %v1669_v62 = vpop.f32.mrb[22].mxu1  ;;  %v11179_v58 = vpack.c.bf16 %v9530_v55, %v9529_v54 }
 0x5ff   :  { %v1676_v63 = vmul.f32 0.35355338, %v1669_v62  ;;  %v10424_v0 = vpop.f32.mrb[23].mxu1  ;;  %v1687_v1 = vsel %vm425_vm2, %v1679_v61, -inf  ;;  %v1684_v42 = vsel %vm425_vm2, %v1678_v45, -inf }
 0x600   :  { %1685 = vmax.xlane.f32.xlu0 %v1684_v42  ;;  %v1074_v0 = vld [vmem:[%s13217_s4] sm:$0xff]  ;;  %v9548_v42 = vld [vmem:[%s13215_s2 + $0x148] sm:$0xff] }
 0x601   :  { %1688 = vmax.xlane.f32.xlu1 %v1687_v1  ;;  %v1680_v2 = vadd.f32 %v1676_v63, %v11911_v48  ;;  %v9518_v63 = vld [vmem:[%s13217_s4 + $0x8] sm:$0xff]  ;;  %v9547_v1 = vld [vmem:[%s13215_s2 + $0x140] sm:$0xff] }
 0x603   :  { %v1690_v5 = vsel %vm425_vm2, %v1680_v2, -inf }
 0x604   :  { %1691 = vmax.xlane.f32.xlu0 %v1690_v5 }
 0x68a   :  { %v1683_v8 = vpop.xlane.xlu1 %1682 }
 0x68b   :  { %v1693_v9 = vsub.f32 %v1677_v52, %v1683_v8  ;;  %v11175_v52 = vpack.c.bf16 %v9528_v43, %v9527_v41  ;;  %v11191_v8 = vpack.c.bf16 %v9548_v42, %v9547_v1 }
 0x68d   :  { %v1697_v12 = vmul.f32 1.442695, %v1693_v9  ;;  %v1686_v14 = vpop.xlane.xlu0 %1685 }
 0x68e   :  { %v1689_v15 = vpop.xlane.xlu1 %1688  ;;  %v1694_v18 = vsub.f32 %v1678_v45, %v1686_v14  ;;  %v9540_v45 = vld [vmem:[%s13215_s2 + $0xd8] sm:$0xff] }
 0x68f   :  { %11465 = vpow2.f32 %v1697_v12  ;;  %v1695_v19 = vsub.f32 %v1679_v61, %v1689_v15  ;;  %v9539_v61 = vld [vmem:[%s13215_s2 + $0xd0] sm:$0xff] }
 0x690   :  { %v1699_v20 = vmul.f32 1.442695, %v1694_v18  ;;  %v11187_v62 = vpack.c.bf16 %v9540_v45, %v9539_v61 }
 0x691   :  { %v1701_v21 = vmul.f32 1.442695, %v1695_v19  ;;  %v1692_v22 = vpop.xlane.xlu0 %1691  ;;  %v9549_v19 = vld [vmem:[%s13215_s2 + $0x150] sm:$0xff] }
 0x692   :  { %11467 = vpow2.f32 %v1699_v20  ;;  %v1696_v23 = vsub.f32 %v1680_v2, %v1692_v22  ;;  %v9550_v20 = vld [vmem:[%s13215_s2 + $0x158] sm:$0xff] }
 0x693   :  { %11469 = vpow2.f32 %v1701_v21  ;;  %v11195_v22 = vpack.c.bf16 %v9550_v20, %v9549_v19 }
 0x694   :  { %v1703_v24 = vmul.f32 1.442695, %v1696_v23 }
 0x696   :  { %11471 = vpow2.f32 %v1703_v24 }
 0x699   :  { %v11466_v25 = vpop.eup %11465 }
 0x69a   :  { %v1705_v26 = vsel %vm425_vm2, %v11466_v25, 0.0 }
 0x69b   :  { %1706 = vadd.xlane.f32.xlu1 %v1705_v26 }
 0x69c   :  { %v11468_v27 = vpop.eup %11467 }
 0x69d   :  { %v11470_v28 = vpop.eup %11469  ;;  %v1708_v29 = vsel %vm425_vm2, %v11468_v27, 0.0 }
 0x69e   :  { %v1711_v30 = vsel %vm425_vm2, %v11470_v28, 0.0  ;;  %1709 = vadd.xlane.f32.xlu0 %v1708_v29 }
 0x69f   :  { %1712 = vadd.xlane.f32.xlu1 %v1711_v30 }
 0x6a0   :  { %v11472_v31 = vpop.eup %11471 }
 0x6a1   :  { %v1714_v32 = vsel %vm425_vm2, %v11472_v31, 0.0 }
 0x6a2   :  { %1715 = vadd.xlane.f32.xlu0 %v1714_v32 }
 0x728   :  { %v1707_v33 = vpop.xlane.xlu1 %1706 }
 0x729   :  { %11473 = vrcp.f32 %v1707_v33 }
 0x72b   :  { %v1710_v34 = vpop.xlane.xlu0 %1709 }
 0x72c   :  { %v1713_v35 = vpop.xlane.xlu1 %1712  ;;  %11475 = vrcp.f32 %v1710_v34 }
 0x72d   :  { %11477 = vrcp.f32 %v1713_v35 }
 0x72f   :  { %v1716_v36 = vpop.xlane.xlu0 %1715 }
 0x730   :  { %11479 = vrcp.f32 %v1716_v36 }
 0x733   :  { %v11474_v37 = vpop.eup %11473 }
 0x734   :  { %v1718_v39 = vmul.f32 %v11474_v37, %v11466_v25  ;;  %v9552_v37 = vld [vmem:[%s13216_s3 + $0xa] ss:$0 sm:$0xff] }
 0x736   :  { %v11476_v47 = vpop.eup %11475  ;;  %10428 = vmatmul.mubr.msk.f32.vlgmr.msra.gmra.mrb[24].mxu0 %vm425_vm2, %v1718_v39 }
 0x737   :  { %v11478_v49 = vpop.eup %11477  ;;  %v1720_v50 = vmul.f32 %v11476_v47, %v11468_v27  ;;  %10436 = vmatpush3.msra.mxu0 %v12029_v40  ;;  %10437 = vmatprep.mubr.msk.f32.mxu0 %vm11681_vm1, %v11680_v17 }
 0x738   :  { %v1722_v53 = vmul.f32 %v11478_v49, %v11470_v28  ;;  %10445 = vmatprep.subr.mxu0 %v9518_v63 }
 0x739   :  { %10433 = vmatmul.mubr.msk.f32.vlgmr.msra.gmra.mrb[24].mxu1 %vm425_vm2, %v1720_v50 }
 0x73a   :  { %v11480_v57 = vpop.eup %11479  ;;  %10438 = vmatmul.mubr.msk.f32.vlgmr.msra.gmra.mrb[26].mxu0 %vm425_vm2, %v1722_v53  ;;  %10441 = vmatpush3.msra.mxu1 %v12026_v38  ;;  %v11183_v38 = vpack.c.bf16 %v9538_v44, %v9537_v60 }
 0x73b   :  { %v1724_v40 = vmul.f32 %v11480_v57, %v11472_v31  ;;  %10442 = vmatprep.mubr.msk.f32.mxu1 %vm11681_vm1, %v11680_v17  ;;  %11176 = vmatprep.subr.bf16.mxu1 %v11175_v52 }
 0x73c   :  { %10446 = vmatpush3.msra.mxu0 %v9518_v63 }
 0x73d   :  { %10443 = vmatmul.mubr.msk.f32.vlgmr.msra.gmra.mrb[26].mxu1 %vm425_vm2, %v1724_v40  ;;  %10453 = vmatprep.subr.mxu0 %v1074_v0 }
 0x73e   :  { %11178 = vmatpush3.bf16.msra.mxu1 %v11175_v52  ;;  %10469 = vmatprep.mubr.msk.f32.mxu1 %vm51_vm0, %v11824_v3 }
 0x73f   :  { %11180 = vmatprep.subr.bf16.mxu1 %v11179_v58 }
 0x742   :  { %11182 = vmatpush3.bf16.msra.mxu1 %v11179_v58 }
 0x743   :  { %11184 = vmatprep.subr.bf16.mxu1 %v11183_v38 }
 0x745   :  { %10470 = vmatmul.mubr.msk.f32.vlgmr.msra.gmra.mrb[28].mxu1 %vm51_vm0, %v11838_v11 }
 0x746   :  { %10472 = vmatprep.mubr.msk.f32.mxu1 %vm51_vm0, %v11841_v13  ;;  %11186 = vmatpush3.bf16.msra.mxu1 %v11183_v38 }
 0x747   :  { %11188 = vmatprep.subr.bf16.mxu1 %v11187_v62 }
 0x749   :  { %10473 = vmatmul.mubr.msk.f32.gmra.mrb[30].mxu1 %vm51_vm0, %v11851_v16 }
 0x74a   :  { %11190 = vmatpush3.bf16.msra.mxu1 %v11187_v62  ;;  %10483 = vmatprep.mubr.msk.f32.mxu1 %vm51_vm0, %v11824_v3 }
 0x74b   :  { %10503 = vmatprep.subr.mxu1 %v11680_v17 }
 0x74d   :  { %10484 = vmatmul.mubr.msk.f32.vlgmr.msra.gmra.mrb[32].mxu1 %vm51_vm0, %v11838_v11 }
 0x74e   :  { %10486 = vmatprep.mubr.msk.f32.mxu1 %vm51_vm0, %v11841_v13 }
 0x751   :  { %10487 = vmatmul.mubr.msk.f32.gmra.mrb[34].mxu1 %vm51_vm0, %v11851_v16 }
 0x752   :  { %10505 = vmatprep.mubr.msk.f32.mxu1 %vm11681_vm1, %v11680_v17 }
 0x809   :  { %v1794_v2 = vpop.f32.mrb[24].mxu0 }
 0x80a   :  { %v10429_v5 = vpop.f32.mrb[25].mxu0  ;;  %10447 = vmatprep.mubr.msk.f32.mxu0 %vm425_vm2, %v1794_v2 }
 0x80c   :  { %v1867_v9 = vpop.f32.mrb[24].mxu1 }
 0x80d   :  { %v1940_v12 = vpop.f32.mrb[26].mxu0  ;;  %v10434_v14 = vpop.f32.mrb[25].mxu1  ;;  %10448 = vmatmul.mubr.msk.f32.vlgmr.msra.gmra.mrb[28].mxu0 %vm425_vm2, %v1867_v9 }
 0x80e   :  { %v10439_v15 = vpop.f32.mrb[27].mxu0  ;;  %10450 = vmatprep.mubr.msk.f32.mxu0 %vm425_vm2, %v1940_v12  ;;  %10454 = vmatpush3.msra.mxu0 %v1074_v0 }
 0x80f   :  { %11192 = vmatprep.subr.bf16.mxu0 %v11191_v8 }
 0x810   :  { %v2013_v18 = vpop.f32.mrb[26].mxu1 }
 0x811   :  { %v10444_v21 = vpop.f32.mrb[27].mxu1  ;;  %10451 = vmatmul.mubr.msk.f32.gmra.mrb[30].mxu0 %vm425_vm2, %v2013_v18 }
 0x812   :  { %10455 = vmatprep.mubr.msk.f32.mxu0 %vm425_vm2, %v12001_v4 }
 0x815   :  { %10456 = vmatmul.mubr.msk.f32.vlgmr.msra.gmra.mrb[28].mxu0 %vm425_vm2, %v12003_v6  ;;  %v9542_v6 = vld [vmem:[%s13216_s3 + $0x6] ss:$0 sm:$0xff] }
 0x816   :  { %11194 = vmatpush3.bf16.msra.mxu0 %v11191_v8  ;;  %10458 = vmatprep.mubr.msk.f32.mxu0 %vm425_vm2, %v12005_v7 }
 0x817   :  { %11196 = vmatprep.subr.bf16.mxu0 %v11195_v22 }
 0x818   :  { %v10471_v23 = vpop.f32.mrb[28].mxu1 }
 0x819   :  { %v2292_v24 = vpop.f32.mrb[29].mxu1  ;;  %10459 = vmatmul.mubr.msk.f32.gmra.mrb[30].mxu0 %vm425_vm2, %v12007_v10  ;;  %v9532_v10 = vld [vmem:[%s13216_s3 + $0x2] ss:$0 sm:$0xff] }
 0x81a   :  { %11198 = vmatpush3.bf16.msra.mxu0 %v11195_v22  ;;  %10497 = vmatprep.mubr.msk.f32.mxu0 %vm51_vm0, %v11824_v3  ;;  %v2298_v29 = vadd.f32 %v10471_v23, %v9532_v10  ;;  %v2293_v31 = vadd.f32 %v9532_v10, %v2292_v24 }
 0x81b   :  { %10508 = vmatprep.subr.mxu0 %v11680_v17 }
 0x81c   :  { %v10474_v4 = vpop.f32.mrb[30].mxu1 }
 0x81d   :  { %v2302_v25 = vpop.f32.mrb[31].mxu1  ;;  %10498 = vmatmul.mubr.msk.f32.vlgmr.msra.gmra.mrb[32].mxu0 %vm51_vm0, %v11838_v11  ;;  %v2308_v35 = vadd.f32 %v10474_v4, %v9532_v10 }
 0x81e   :  { %10500 = vmatprep.mubr.msk.f32.mxu0 %vm51_vm0, %v11841_v13  ;;  %v2303_v36 = vadd.f32 %v9532_v10, %v2302_v25 }
 0x820   :  { %v10485_v7 = vpop.f32.mrb[32].mxu1 }
 0x821   :  { %v2396_v26 = vadd.f32 %v10485_v7, %v9542_v6  ;;  %v2390_v27 = vpop.f32.mrb[33].mxu1  ;;  %10501 = vmatmul.mubr.msk.f32.gmra.mrb[34].mxu0 %vm51_vm0, %v11851_v16 }
 0x822   :  { %v2391_v28 = vadd.f32 %v9542_v6, %v2390_v27  ;;  %10510 = vmatprep.mubr.msk.f32.mxu0 %vm11681_vm1, %v11680_v17 }
 0x823   :  { %10509 = vmatpush3.xpose.msk.msra.mxu0 %vm425_vm2, %v2396_v26 }
 0x824   :  { %v10488_v30 = vpop.f32.mrb[34].mxu1  ;;  %10504 = vmatpush3.xpose.msk.msra.mxu1 %vm425_vm2, %v2391_v28  ;;  %10518 = vmatprep.subr.mxu0 %v11680_v17 }
 0x825   :  { %v2406_v32 = vadd.f32 %v10488_v30, %v9542_v6  ;;  %v2400_v33 = vpop.f32.mrb[35].mxu1  ;;  %10513 = vmatprep.subr.mxu1 %v11680_v17 }
 0x826   :  { %v2401_v34 = vadd.f32 %v9542_v6, %v2400_v33  ;;  %10511 = vmatmul.mubr.msk.f32.vlgmr.msra.gmra.mrb[36].mxu0 %vm425_vm2, %v2298_v29 }
 0x827   :  { %10506 = vmatmul.mubr.msk.f32.vlgmr.msra.gmra.mrb[36].mxu1 %vm425_vm2, %v2293_v31  ;;  %10519 = vmatpush3.xpose.msk.msra.mxu0 %vm425_vm2, %v2406_v32 }
 0x828   :  { %10514 = vmatpush3.xpose.msk.msra.mxu1 %vm425_vm2, %v2401_v34  ;;  %10520 = vmatprep.mubr.msk.f32.mxu0 %vm11681_vm1, %v11680_v17 }
 0x829   :  { %10515 = vmatprep.mubr.msk.f32.mxu1 %vm11681_vm1, %v11680_v17  ;;  %10528 = vmatprep.subr.mxu0 %v11680_v17 }
 0x82a   :  { %10521 = vmatmul.mubr.msk.f32.vlgmr.msra.gmra.mrb[38].mxu0 %vm425_vm2, %v2308_v35  ;;  %10523 = vmatprep.subr.mxu1 %v11680_v17 }
 0x82b   :  { %10516 = vmatmul.mubr.msk.f32.vlgmr.msra.gmra.mrb[38].mxu1 %vm425_vm2, %v2303_v36  ;;  %10530 = vmatprep.mubr.msk.f32.mxu0 %vm11681_vm1, %v11680_v17  ;;  %v9574_v36 = vld [vmem:[%s13215_s2 + $0x60] sm:$0xff] }
 0x82c   :  { %10525 = vmatprep.mubr.msk.f32.mxu1 %vm11681_vm1, %v11680_v17 }
 0x8f0   :  { %v10499_v39 = vpop.f32.mrb[32].mxu0 }
 0x8f1   :  { %v2494_v41 = vadd.f32 %v10499_v39, %v9552_v37  ;;  %v2488_v43 = vpop.f32.mrb[33].mxu0 }
 0x8f2   :  { %v2489_v47 = vadd.f32 %v9552_v37, %v2488_v43 }
 0x8f3   :  { %10529 = vmatpush3.msra.mxu0 %v2494_v41 }
 0x8f4   :  { %v10502_v49 = vpop.f32.mrb[34].mxu0  ;;  %10524 = vmatpush3.msra.mxu1 %v2489_v47  ;;  %10538 = vmatprep.subr.mxu0 %v11680_v17 }
 0x8f5   :  { %v12180_v50 = vadd.f32 %v10502_v49, %v9552_v37  ;;  %v2498_v52 = vpop.f32.mrb[35].mxu0  ;;  %10533 = vmatprep.subr.mxu1 %v11680_v17 }
 0x8f6   :  { %v12183_v53 = vadd.f32 %v9552_v37, %v2498_v52  ;;  %v9575_v37 = vld [vmem:[%s13215_s2 + $0x68] sm:$0xff]  ;;  %v9576_v52 = vld [vmem:[%s13215_s2 + $0x70] sm:$0xff] }
 0x8f7   :  { %v11199_v49 = vpack.c.bf16 %v9575_v37, %v9574_v36 }
 0x8f9   :  { %v2655_v54 = vpop.f32.mrb[36].mxu0 }
 0x8fa   :  { %v2812_v55 = vmul.f32 0.35355338, %v2655_v54  ;;  %v2579_v57 = vpop.f32.mrb[36].mxu1  ;;  %v10512_v40 = vpop.f32.mrb[37].mxu0  ;;  %v9577_v54 = vld [vmem:[%s13215_s2 + $0x78] sm:$0xff] }
 0x8fb   :  { %v2811_v58 = vmul.f32 0.35355338, %v2579_v57  ;;  %v10507_v60 = vpop.f32.mrb[37].mxu1 }
 0x8fc   :  { %v2816_v44 = vadd.f32 %v2812_v55, %v11911_v48  ;;  %v11203_v60 = vpack.c.bf16 %v9577_v54, %v9576_v52 }
 0x8fd   :  { %v2807_v38 = vpop.f32.mrb[38].mxu0  ;;  %v2815_v61 = vadd.f32 %v2811_v58, %v11911_v48 }
 0x8fe   :  { %v2814_v45 = vmul.f32 0.35355338, %v2807_v38  ;;  %v2731_v62 = vpop.f32.mrb[38].mxu1  ;;  %v10522_v63 = vpop.f32.mrb[39].mxu0  ;;  %v2822_v0 = vsel %vm425_vm2, %v2816_v44, -inf  ;;  %v9596_v38 = vld [vmem:[%s13215_s2 + $0x170] sm:$0xff] }
 0x8ff   :  { %v2813_v1 = vmul.f32 0.35355338, %v2731_v62  ;;  %2823 = vmax.xlane.f32.xlu1 %v2822_v0  ;;  %v10517_v42 = vpop.f32.mrb[39].mxu1  ;;  %v2819_v2 = vsel %vm425_vm2, %v2815_v61, -inf  ;;  %v9569_v62 = vld [vmem:[%s13217_s4 + $0x10] sm:$0xff]  ;;  %v9584_v63 = vld [vmem:[%s13215_s2 + $0xe0] sm:$0xff] }
 0x900   :  { %2820 = vmax.xlane.f32.xlu0 %v2819_v2  ;;  %v2818_v5 = vadd.f32 %v2814_v45, %v11911_v48  ;;  %v9585_v0 = vld [vmem:[%s13215_s2 + $0xe8] sm:$0xff]  ;;  %v9586_v42 = vld [vmem:[%s13215_s2 + $0xf0] sm:$0xff]  ;;  %v9587_v2 = vld [vmem:[%s13215_s2 + $0xf8] sm:$0xff] }
 0x901   :  { %v2817_v8 = vadd.f32 %v2813_v1, %v11911_v48  ;;  %v11207_v1 = vpack.c.bf16 %v9585_v0, %v9584_v63 }
 0x902   :  { %v2828_v9 = vsel %vm425_vm2, %v2818_v5, -inf }
 0x903   :  { %2829 = vmax.xlane.f32.xlu1 %v2828_v9  ;;  %v2825_v12 = vsel %vm425_vm2, %v2817_v8, -inf }
 0x904   :  { %2826 = vmax.xlane.f32.xlu0 %v2825_v12  ;;  %v11211_v12 = vpack.c.bf16 %v9587_v2, %v9586_v42 }
 0x98c   :  { %v2824_v14 = vpop.xlane.xlu1 %2823 }
 0x98d   :  { %v2832_v15 = vsub.f32 %v2816_v44, %v2824_v14  ;;  %v2821_v18 = vpop.xlane.xlu0 %2820  ;;  %v9595_v44 = vld [vmem:[%s13215_s2 + $0x168] sm:$0xff] }
 0x98e   :  { %v2831_v19 = vsub.f32 %v2815_v61, %v2821_v18  ;;  %v9597_v61 = vld [vmem:[%s13215_s2 + $0x178] sm:$0xff] }
 0x98f   :  { %v2837_v20 = vmul.f32 1.442695, %v2832_v15  ;;  %v11219_v45 = vpack.c.bf16 %v9597_v61, %v9596_v38 }
 0x990   :  { %v2835_v21 = vmul.f32 1.442695, %v2831_v19  ;;  %v2830_v22 = vpop.xlane.xlu1 %2829 }
 0x991   :  { %11481 = vpow2.f32 %v2837_v20  ;;  %v2834_v23 = vsub.f32 %v2818_v5, %v2830_v22  ;;  %v2827_v24 = vpop.xlane.xlu0 %2826 }
 0x992   :  { %11483 = vpow2.f32 %v2835_v21  ;;  %v2833_v4 = vsub.f32 %v2817_v8, %v2827_v24 }
 0x993   :  { %v2841_v25 = vmul.f32 1.442695, %v2834_v23 }
 0x994   :  { %v2839_v6 = vmul.f32 1.442695, %v2833_v4 }
 0x995   :  { %11485 = vpow2.f32 %v2841_v25  ;;  %v9599_v25 = vld [vmem:[%s13216_s3 + $0xb] ss:$0 sm:$0xff] }
 0x996   :  { %11487 = vpow2.f32 %v2839_v6 }
 0x99b   :  { %v11482_v7 = vpop.eup %11481 }
 0x99c   :  { %v11484_v10 = vpop.eup %11483  ;;  %v2846_v26 = vsel %vm425_vm2, %v11482_v7, 0.0 }
 0x99d   :  { %2847 = vadd.xlane.f32.xlu1 %v2846_v26  ;;  %v2843_v27 = vsel %vm425_vm2, %v11484_v10, 0.0  ;;  %v9579_v26 = vld [vmem:[%s13216_s3 + $0x3] ss:$0 sm:$0xff] }
 0x99e   :  { %2844 = vadd.xlane.f32.xlu0 %v2843_v27 }
 0x99f   :  { %v11486_v28 = vpop.eup %11485 }
 0x9a0   :  { %v11488_v29 = vpop.eup %11487  ;;  %v2852_v30 = vsel %vm425_vm2, %v11486_v28, 0.0 }
 0x9a1   :  { %2853 = vadd.xlane.f32.xlu1 %v2852_v30  ;;  %v2849_v31 = vsel %vm425_vm2, %v11488_v29, 0.0 }
 0x9a2   :  { %2850 = vadd.xlane.f32.xlu0 %v2849_v31 }
 0xa2a   :  { %v2848_v32 = vpop.xlane.xlu1 %2847 }
 0xa2b   :  { %11489 = vrcp.f32 %v2848_v32  ;;  %v2845_v33 = vpop.xlane.xlu0 %2844 }
 0xa2c   :  { %11491 = vrcp.f32 %v2845_v33 }
 0xa2e   :  { %v2854_v34 = vpop.xlane.xlu1 %2853 }
 0xa2f   :  { %11493 = vrcp.f32 %v2854_v34  ;;  %v2851_v35 = vpop.xlane.xlu0 %2850 }
 0xa30   :  { %11495 = vrcp.f32 %v2851_v35 }
 0xa35   :  { %v11490_v39 = vpop.eup %11489 }
 0xa36   :  { %v11492_v41 = vpop.eup %11491  ;;  %v2858_v43 = vmul.f32 %v11490_v39, %v11482_v7 }
 0xa37   :  { %v2856_v47 = vmul.f32 %v11492_v41, %v11484_v10 }
 0xa38   :  { %10531 = vmatmul.mubr.msk.f32.vlgmr.msra.gmra.mrb[40].mxu0 %vm425_vm2, %v2858_v43 }
 0xa39   :  { %v11494_v55 = vpop.eup %11493  ;;  %10539 = vmatpush3.msra.mxu0 %v12180_v50  ;;  %10526 = vmatmul.mubr.msk.f32.vlgmr.msra.gmra.mrb[40].mxu1 %vm425_vm2, %v2856_v47  ;;  %v9594_v50 = vld [vmem:[%s13215_s2 + $0x160] sm:$0xff] }
 0xa3a   :  { %v11496_v57 = vpop.eup %11495  ;;  %v2862_v40 = vmul.f32 %v11494_v55, %v11486_v28  ;;  %10534 = vmatpush3.msra.mxu1 %v12183_v53  ;;  %10540 = vmatprep.mubr.msk.f32.mxu0 %vm11681_vm1, %v11680_v17  ;;  %v11215_v53 = vpack.c.bf16 %v9595_v44, %v9594_v50 }
 0xa3b   :  { %v2860_v58 = vmul.f32 %v11496_v57, %v11488_v29  ;;  %10535 = vmatprep.mubr.msk.f32.mxu1 %vm11681_vm1, %v11680_v17  ;;  %11200 = vmatprep.subr.bf16.mxu1 %v11199_v49 }
 0xa3c   :  { %10541 = vmatmul.mubr.msk.f32.vlgmr.msra.gmra.mrb[42].mxu0 %vm425_vm2, %v2862_v40  ;;  %10543 = vmatprep.subr.mxu0 %v9569_v62 }
 0xa3d   :  { %10536 = vmatmul.mubr.msk.f32.vlgmr.msra.gmra.mrb[42].mxu1 %vm425_vm2, %v2860_v58  ;;  %10544 = vmatpush3.msra.mxu0 %v9569_v62 }
 0xa3e   :  { %11202 = vmatpush3.bf16.msra.mxu1 %v11199_v49  ;;  %10559 = vmatprep.mubr.msk.f32.mxu1 %vm51_vm0, %v11824_v3 }
 0xa3f   :  { %11204 = vmatprep.subr.bf16.mxu1 %v11203_v60  ;;  %11208 = vmatprep.subr.bf16.mxu0 %v11207_v1 }
 0xa42   :  { %11206 = vmatpush3.bf16.msra.mxu1 %v11203_v60 }
 0xa43   :  { %11216 = vmatprep.subr.bf16.mxu1 %v11215_v53 }
 0xa45   :  { %10560 = vmatmul.mubr.msk.f32.vlgmr.msra.gmra.mrb[44].mxu1 %vm51_vm0, %v11838_v11 }
 0xa46   :  { %10562 = vmatprep.mubr.msk.f32.mxu1 %vm51_vm0, %v11841_v13  ;;  %11218 = vmatpush3.bf16.msra.mxu1 %v11215_v53 }
 0xa47   :  { %11220 = vmatprep.subr.bf16.mxu1 %v11219_v45 }
 0xa49   :  { %10563 = vmatmul.mubr.msk.f32.gmra.mrb[46].mxu1 %vm51_vm0, %v11851_v16 }
 0xa4a   :  { %11222 = vmatpush3.bf16.msra.mxu1 %v11219_v45  ;;  %10587 = vmatprep.mubr.msk.f32.mxu1 %vm51_vm0, %v11824_v3 }
 0xa4b   :  { %10598 = vmatprep.subr.mxu1 %v11680_v17 }
 0xa4d   :  { %10588 = vmatmul.mubr.msk.f32.vlgmr.msra.gmra.mrb[48].mxu1 %vm51_vm0, %v11838_v11 }
 0xa4e   :  { %10590 = vmatprep.mubr.msk.f32.mxu1 %vm51_vm0, %v11841_v13 }
 0xa51   :  { %10591 = vmatmul.mubr.msk.f32.gmra.mrb[50].mxu1 %vm51_vm0, %v11851_v16 }
 0xa52   :  { %10600 = vmatprep.mubr.msk.f32.mxu1 %vm11681_vm1, %v11680_v17 }
 0xb0b   :  { %v3005_v5 = vpop.f32.mrb[40].mxu0 }
 0xb0c   :  { %v2932_v8 = vpop.f32.mrb[40].mxu1  ;;  %v10532_v9 = vpop.f32.mrb[41].mxu0 }
 0xb0d   :  { %v10527_v14 = vpop.f32.mrb[41].mxu1  ;;  %10545 = vmatprep.mubr.msk.f32.mxu0 %vm425_vm2, %v2932_v8 }
 0xb0e   :  { %10546 = vmatmul.mubr.msk.f32.vlgmr.msra.gmra.mrb[28].mxu0 %vm425_vm2, %v3005_v5 }
 0xb0f   :  { %v3151_v15 = vpop.f32.mrb[42].mxu0  ;;  %11210 = vmatpush3.bf16.msra.mxu0 %v11207_v1 }
 0xb10   :  { %v3078_v18 = vpop.f32.mrb[42].mxu1  ;;  %v10542_v19 = vpop.f32.mrb[43].mxu0  ;;  %11212 = vmatprep.subr.bf16.mxu0 %v11211_v12 }
 0xb11   :  { %v10537_v20 = vpop.f32.mrb[43].mxu1  ;;  %10548 = vmatprep.mubr.msk.f32.mxu0 %vm425_vm2, %v3078_v18 }
 0xb12   :  { %10549 = vmatmul.mubr.msk.f32.gmra.mrb[30].mxu0 %vm425_vm2, %v3151_v15 }
 0xb13   :  { %11214 = vmatpush3.bf16.msra.mxu0 %v11211_v12  ;;  %10573 = vmatprep.mubr.msk.f32.mxu0 %vm51_vm0, %v11824_v3 }
 0xb14   :  { %10593 = vmatprep.subr.mxu0 %v11680_v17 }
 0xb16   :  { %10574 = vmatmul.mubr.msk.f32.vlgmr.msra.gmra.mrb[44].mxu0 %vm51_vm0, %v11838_v11 }
 0xb17   :  { %10576 = vmatprep.mubr.msk.f32.mxu0 %vm51_vm0, %v11841_v13 }
 0xb18   :  { %v10561_v21 = vpop.f32.mrb[44].mxu1 }
 0xb19   :  { %v3337_v22 = vpop.f32.mrb[45].mxu1  ;;  %v3343_v30 = vadd.f32 %v10561_v21, %v9579_v26 }
 0xb1a   :  { %10577 = vmatmul.mubr.msk.f32.gmra.mrb[46].mxu0 %vm51_vm0, %v11851_v16  ;;  %v9589_v16 = vld [vmem:[%s13216_s3 + $0x7] ss:$0 sm:$0xff]  ;;  %v3338_v32 = vadd.f32 %v9579_v26, %v3337_v22 }
 0xb1b   :  { %10595 = vmatprep.mubr.msk.f32.mxu0 %vm11681_vm1, %v11680_v17 }
 0xb1c   :  { %v10564_v23 = vpop.f32.mrb[46].mxu1 }
 0xb1d   :  { %v3347_v24 = vpop.f32.mrb[47].mxu1  ;;  %v3353_v36 = vadd.f32 %v10564_v23, %v9579_v26 }
 0xb1e   :  { %v3348_v37 = vadd.f32 %v9579_v26, %v3347_v24 }
 0xb20   :  { %v10589_v4 = vpop.f32.mrb[48].mxu1 }
 0xb21   :  { %v3533_v3 = vpop.f32.mrb[49].mxu1  ;;  %v3539_v39 = vadd.f32 %v10589_v4, %v9599_v25 }
 0xb22   :  { %v3534_v41 = vadd.f32 %v9599_v25, %v3533_v3 }
 0xb24   :  { %v10592_v11 = vpop.f32.mrb[50].mxu1 }
 0xb25   :  { %v12283_v6 = vadd.f32 %v10592_v11, %v9599_v25  ;;  %v3543_v13 = vpop.f32.mrb[51].mxu1 }
 0xb26   :  { %v12285_v7 = vadd.f32 %v9599_v25, %v3543_v13 }
 0xbe9   :  { %v10575_v10 = vpop.f32.mrb[44].mxu0 }
 0xbea   :  { %v3441_v27 = vadd.f32 %v10575_v10, %v9589_v16  ;;  %v3435_v28 = vpop.f32.mrb[45].mxu0 }
 0xbeb   :  { %v3436_v29 = vadd.f32 %v9589_v16, %v3435_v28 }
 0xbec   :  { %10599 = vmatpush3.xpose.msk.msra.mxu1 %vm425_vm2, %v3441_v27 }
 0xbed   :  { %v10578_v31 = vpop.f32.mrb[46].mxu0  ;;  %10594 = vmatpush3.xpose.msk.msra.mxu0 %vm425_vm2, %v3436_v29  ;;  %10608 = vmatprep.subr.mxu1 %v11680_v17 }
 0xbee   :  { %v3451_v33 = vadd.f32 %v10578_v31, %v9589_v16  ;;  %v3445_v34 = vpop.f32.mrb[47].mxu0  ;;  %10603 = vmatprep.subr.mxu0 %v11680_v17 }
 0xbef   :  { %v3446_v35 = vadd.f32 %v9589_v16, %v3445_v34  ;;  %10601 = vmatmul.mubr.msk.f32.vlgmr.msra.gmra.mrb[52].mxu1 %vm425_vm2, %v3343_v30 }
 0xbf0   :  { %10596 = vmatmul.mubr.msk.f32.vlgmr.msra.gmra.mrb[48].mxu0 %vm425_vm2, %v3338_v32  ;;  %10609 = vmatpush3.xpose.msk.msra.mxu1 %vm425_vm2, %v3451_v33 }
 0xbf1   :  { %10604 = vmatpush3.xpose.msk.msra.mxu0 %vm425_vm2, %v3446_v35  ;;  %10610 = vmatprep.mubr.msk.f32.mxu1 %vm11681_vm1, %v11680_v17 }
 0xbf2   :  { %10605 = vmatprep.mubr.msk.f32.mxu0 %vm11681_vm1, %v11680_v17  ;;  %10618 = vmatprep.subr.mxu1 %v11680_v17 }
 0xbf3   :  { %10611 = vmatmul.mubr.msk.f32.vlgmr.msra.gmra.mrb[54].mxu1 %vm425_vm2, %v3353_v36  ;;  %10613 = vmatprep.subr.mxu0 %v11680_v17 }
 0xbf4   :  { %10606 = vmatmul.mubr.msk.f32.vlgmr.msra.gmra.mrb[50].mxu0 %vm425_vm2, %v3348_v37  ;;  %10619 = vmatpush3.msra.mxu1 %v3539_v39 }
 0xbf5   :  { %10614 = vmatpush3.msra.mxu0 %v3534_v41  ;;  %10620 = vmatprep.mubr.msk.f32.mxu1 %vm11681_vm1, %v11680_v17 }
 0xbf6   :  { %10628 = vmatprep.subr.mxu1 %v11680_v17  ;;  %10615 = vmatprep.mubr.msk.f32.mxu0 %vm11681_vm1, %v11680_v17 }
 0xbf7   :  { %10623 = vmatprep.subr.mxu0 %v11680_v17 }
 0xcc2   :  { %v3700_v43 = vpop.f32.mrb[52].mxu1 }
 0xcc3   :  { %v3857_v47 = vmul.f32 0.35355338, %v3700_v43  ;;  %v3624_v49 = vpop.f32.mrb[48].mxu0  ;;  %v10602_v52 = vpop.f32.mrb[53].mxu1 }
 0xcc4   :  { %v3856_v54 = vmul.f32 0.35355338, %v3624_v49  ;;  %v10597_v55 = vpop.f32.mrb[49].mxu0  ;;  %v4309_v52 = vsub.s32 2, %v11810_v51 }
 0xcc5   :  { %v3861_v57 = vadd.f32 %v3857_v47, %v11911_v48 }
 0xcc6   :  { %v3852_v40 = vpop.f32.mrb[54].mxu1  ;;  %v3860_v58 = vadd.f32 %v3856_v54, %v11911_v48  ;;  %v12348_v54 = vld [vmem:[%s13220_s7] sm:$0x7f] }
 0xcc7   :  { %v3859_v60 = vmul.f32 0.35355338, %v3852_v40  ;;  %v3776_v50 = vpop.f32.mrb[50].mxu0  ;;  %v10612_v44 = vpop.f32.mrb[55].mxu1  ;;  %v3867_v53 = vsel %vm425_vm2, %v3861_v57, -inf  ;;  %v4310_v55 = vrot.slane %v12348_v54, %v4309_v52  ;;  %v11636_v40 = vld [vmem:[%s13214_s1 + $0x8] sm:$0xff] }
 0xcc8   :  { %v3858_v38 = vmul.f32 0.35355338, %v3776_v50  ;;  %3868 = vmax.xlane.f32.xlu1 %v3867_v53  ;;  %v10607_v61 = vpop.f32.mrb[51].mxu0  ;;  %v3864_v45 = vsel %vm425_vm2, %v3860_v58, -inf  ;;  %v11637_v50 = vld [vmem:[%s13214_s1] sm:$0xff] }
 0xcc9   :  { %3865 = vmax.xlane.f32.xlu0 %v3864_v45  ;;  %v3863_v62 = vadd.f32 %v3859_v60, %v11911_v48  ;;  %v11638_v45 = vld [vmem:[%s13214_s1 + $0x18] sm:$0xff] }
 0xcca   :  { %v3862_v63 = vadd.f32 %v3858_v38, %v11911_v48 }
 0xccb   :  { %v3873_v0 = vsel %vm425_vm2, %v3863_v62, -inf }
 0xccc   :  { %3874 = vmax.xlane.f32.xlu1 %v3873_v0  ;;  %v3870_v1 = vsel %vm425_vm2, %v3862_v63, -inf }
 0xccd   :  { %3871 = vmax.xlane.f32.xlu0 %v3870_v1  ;;  %v11639_v1 = vld [vmem:[%s13214_s1 + $0x10] sm:$0xff] }
 0xd55   :  { %v3869_v42 = vpop.xlane.xlu1 %3868 }
 0xd56   :  { %v3877_v2 = vsub.f32 %v3861_v57, %v3869_v42  ;;  %v3866_v5 = vpop.xlane.xlu0 %3865 }
 0xd57   :  { %v3876_v8 = vsub.f32 %v3860_v58, %v3866_v5 }
 0xd58   :  { %v3882_v9 = vmul.f32 1.442695, %v3877_v2 }
 0xd59   :  { %v3880_v12 = vmul.f32 1.442695, %v3876_v8  ;;  %v3875_v14 = vpop.xlane.xlu1 %3874 }
 0xd5a   :  { %11497 = vpow2.f32 %v3882_v9  ;;  %v3879_v15 = vsub.f32 %v3863_v62, %v3875_v14  ;;  %v3872_v18 = vpop.xlane.xlu0 %3871 }
 0xd5b   :  { %11499 = vpow2.f32 %v3880_v12  ;;  %v3878_v19 = vsub.f32 %v3862_v63, %v3872_v18 }
 0xd5c   :  { %v3886_v20 = vmul.f32 1.442695, %v3879_v15 }
 0xd5d   :  { %v3884_v21 = vmul.f32 1.442695, %v3878_v19 }
 0xd5e   :  { %11501 = vpow2.f32 %v3886_v20 }
 0xd5f   :  { %11503 = vpow2.f32 %v3884_v21 }
 0xd64   :  { %v11498_v22 = vpop.eup %11497 }
 0xd65   :  { %v11500_v23 = vpop.eup %11499  ;;  %v3891_v24 = vsel %vm425_vm2, %v11498_v22, 0.0 }
 0xd66   :  { %3892 = vadd.xlane.f32.xlu1 %v3891_v24  ;;  %v3888_v4 = vsel %vm425_vm2, %v11500_v23, 0.0 }
 0xd67   :  { %3889 = vadd.xlane.f32.xlu0 %v3888_v4 }
 0xd68   :  { %v11502_v3 = vpop.eup %11501 }
 0xd69   :  { %v11504_v25 = vpop.eup %11503  ;;  %v3897_v11 = vsel %vm425_vm2, %v11502_v3, 0.0 }
 0xd6a   :  { %3898 = vadd.xlane.f32.xlu1 %v3897_v11  ;;  %v3894_v13 = vsel %vm425_vm2, %v11504_v25, 0.0 }
 0xd6b   :  { %3895 = vadd.xlane.f32.xlu0 %v3894_v13 }
 0xdf3   :  { %v3893_v16 = vpop.xlane.xlu1 %3892 }
 0xdf4   :  { %11505 = vrcp.f32 %v3893_v16  ;;  %v3890_v10 = vpop.xlane.xlu0 %3889 }
 0xdf5   :  { %11507 = vrcp.f32 %v3890_v10 }
 0xdf7   :  { %v3899_v26 = vpop.xlane.xlu1 %3898 }
 0xdf8   :  { %11509 = vrcp.f32 %v3899_v26  ;;  %v3896_v27 = vpop.xlane.xlu0 %3895 }
 0xdf9   :  { %11511 = vrcp.f32 %v3896_v27 }
 0xdfe   :  { %v11506_v28 = vpop.eup %11505 }
 0xdff   :  { %v11508_v29 = vpop.eup %11507  ;;  %v3903_v30 = vmul.f32 %v11506_v28, %v11498_v22 }
 0xe00   :  { %v3901_v31 = vmul.f32 %v11508_v29, %v11500_v23 }
 0xe01   :  { %10621 = vmatmul.mubr.msk.f32.vlgmr.msra.gmra.mrb[56].mxu1 %vm425_vm2, %v3903_v30  ;;  %v4383_v30 = vld [vmem:[%s13218_s5] sm:$0xff] }
 0xe02   :  { %v11510_v32 = vpop.eup %11509  ;;  %10629 = vmatpush3.msra.mxu1 %v12283_v6  ;;  %10616 = vmatmul.mubr.msk.f32.vlgmr.msra.gmra.mrb[52].mxu0 %vm425_vm2, %v3901_v31  ;;  %v9616_v6 = vld [vmem:[%s13217_s4 + $0x18] sm:$0xff]  ;;  %v4384_v31 = vld [vmem:[%s13218_s5 + $0x8] sm:$0xff] }
 0xe03   :  { %v11512_v33 = vpop.eup %11511  ;;  %v3907_v34 = vmul.f32 %v11510_v32, %v11502_v3  ;;  %10624 = vmatpush3.msra.mxu0 %v12285_v7  ;;  %10630 = vmatprep.mubr.msk.f32.mxu1 %vm11681_vm1, %v11680_v17  ;;  %v11223_v32 = vpack.c.bf16 %v4384_v31, %v4383_v30  ;;  %v4530_v31 = vld [vmem:[%s13219_s6 + $0x50] sm:$0xff] }
 0xe04   :  { %v3905_v35 = vmul.f32 %v11512_v33, %v11504_v25  ;;  %10625 = vmatprep.mubr.msk.f32.mxu0 %vm11681_vm1, %v11680_v17  ;;  %10633 = vmatprep.subr.mxu0 %v9616_v6  ;;  %v4385_v33 = vld [vmem:[%s13218_s5 + $0x10] sm:$0xff] }
 0xe05   :  { %10631 = vmatmul.mubr.msk.f32.vlgmr.msra.gmra.mrb[58].mxu1 %vm425_vm2, %v3907_v34  ;;  %v4386_v34 = vld [vmem:[%s13218_s5 + $0x18] sm:$0xff]  ;;  %11224 = vmatprep.subr.bf16.mxu1 %v11223_v32 }
 0xe06   :  { %10626 = vmatmul.mubr.msk.f32.vlgmr.msra.gmra.mrb[54].mxu0 %vm425_vm2, %v3905_v35  ;;  %v11227_v35 = vpack.c.bf16 %v4386_v34, %v4385_v33  ;;  %11226 = vmatpush3.bf16.msra.mxu1 %v11223_v32  ;;  %v4531_v32 = vld [vmem:[%s13219_s6 + $0x58] sm:$0xff]  ;;  %v4532_v34 = vld [vmem:[%s13219_s6 + $0x60] sm:$0xff] }
 0xe07   :  { %10634 = vmatpush3.msra.mxu0 %v9616_v6  ;;  %v11251_v33 = vpack.c.bf16 %v4531_v32, %v4530_v31 }
 0xe08   :  { %11228 = vmatprep.subr.bf16.mxu1 %v11227_v35 }
 0xe0a   :  { %11230 = vmatpush3.bf16.msra.mxu1 %v11227_v35  ;;  %v4533_v35 = vld [vmem:[%s13219_s6 + $0x68] sm:$0xff] }
 0xed4   :  { %v4050_v36 = vpop.f32.mrb[56].mxu1 }
 0xed5   :  { %v3977_v37 = vpop.f32.mrb[52].mxu0  ;;  %v10622_v7 = vpop.f32.mrb[57].mxu1 }
 0xed6   :  { %v10617_v39 = vpop.f32.mrb[53].mxu0  ;;  %10635 = vmatprep.mubr.msk.f32.mxu0 %vm425_vm2, %v3977_v37 }
 0xed7   :  { %10636 = vmatmul.mubr.msk.f32.vlgmr.msra.gmra.mrb[28].mxu0 %vm425_vm2, %v4050_v36 }
 0xed8   :  { %v4196_v41 = vpop.f32.mrb[58].mxu1 }
 0xed9   :  { %v4123_v43 = vpop.f32.mrb[54].mxu0  ;;  %v10632_v47 = vpop.f32.mrb[59].mxu1 }
 0xeda   :  { %v10627_v49 = vpop.f32.mrb[55].mxu0  ;;  %10638 = vmatprep.mubr.msk.f32.mxu0 %vm425_vm2, %v4123_v43 }
 0xedb   :  { %10639 = vmatmul.mubr.msk.f32.gmra.mrb[30].mxu0 %vm425_vm2, %v4196_v41 }
 0xfaa   :  { %v10637_v57 = vpop.f32.mrb[28].mxu0 }
 0xfab   :  { %v4304_v58 = vadd.f32 %v11636_v40, %v10637_v57  ;;  %v4280_v60 = vpop.f32.mrb[29].mxu0 }
 0xfac   :  { %v4303_v44 = vadd.f32 %v11637_v50, %v4280_v60  ;;  %v4377_v60 = vsub.s32 4, %v11810_v51 }
 0xfad   :  { %v12359_v53 = vadd.f32 %v4310_v55, %v4304_v58  ;;  %v4369_v58 = vsub.s32 3, %v11810_v51 }
 0xfae   :  { %v12361_v38 = vadd.f32 %v4310_v55, %v4303_v44  ;;  %v10640_v61 = vpop.f32.mrb[30].mxu0 }
 0xfaf   :  { %v4306_v62 = vadd.f32 %v11638_v45, %v10640_v61  ;;  %v4290_v63 = vpop.f32.mrb[31].mxu0  ;;  %v4318_v0 = vsel %vm51_vm0, %v12359_v53, 0.0  ;;  %v4370_v50 = vrot.slane %v12348_v54, %v4369_v58 }
 0xfb0   :  { %v4305_v42 = vadd.f32 %v11639_v1, %v4290_v63  ;;  %4319 = vadd.xlane.f32.xlu1 %v4318_v0  ;;  %v4315_v2 = vsel %vm51_vm0, %v12361_v38, 0.0  ;;  %v4378_v63 = vrot.slane %v12348_v54, %v4377_v60 }
 0xfb1   :  { %v12373_v5 = vadd.f32 %v4310_v55, %v4306_v62  ;;  %4316 = vadd.xlane.f32.xlu0 %v4315_v2 }
 0xfb2   :  { %v12375_v8 = vadd.f32 %v4310_v55, %v4305_v42 }
 0xfb3   :  { %v4324_v9 = vsel %vm51_vm0, %v12373_v5, 0.0 }
 0xfb4   :  { %4325 = vadd.xlane.f32.xlu1 %v4324_v9  ;;  %v4321_v12 = vsel %vm51_vm0, %v12375_v8, 0.0 }
 0xfb5   :  { %4322 = vadd.xlane.f32.xlu0 %v4321_v12 }
0x103d   :  { %v4320_v14 = vpop.xlane.xlu1 %4319 }
0x103e   :  { %v4328_v15 = vmul.f32 0.03125, %v4320_v14  ;;  %v4317_v18 = vpop.xlane.xlu0 %4316 }
0x103f   :  { %v4327_v19 = vmul.f32 0.03125, %v4317_v18 }
0x1040   :  { %v4332_v20 = vsub.f32 %v12359_v53, %v4328_v15 }
0x1041   :  { %v4331_v21 = vsub.f32 %v12361_v38, %v4327_v19  ;;  %v4326_v22 = vpop.xlane.xlu1 %4325 }
0x1042   :  { %v4330_v23 = vmul.f32 0.03125, %v4326_v22  ;;  %v4323_v24 = vpop.xlane.xlu0 %4322  ;;  %v4336_v4 = vmul.f32 %v4332_v20, %v4332_v20  ;;  %v4520_v22 = vld [vmem:[%s13219_s6] sm:$0xff] }
0x1043   :  { %v4329_v3 = vmul.f32 0.03125, %v4323_v24  ;;  %v4335_v25 = vmul.f32 %v4331_v21, %v4331_v21 }
0x1044   :  { %v4334_v11 = vsub.f32 %v12373_v5, %v4330_v23  ;;  %v4342_v13 = vsel %vm51_vm0, %v4336_v4, 0.0  ;;  %v4521_v23 = vld [vmem:[%s13219_s6 + $0x8] sm:$0xff]  ;;  %v4522_v4 = vld [vmem:[%s13219_s6 + $0x10] sm:$0xff] }
0x1045   :  { %v4333_v16 = vsub.f32 %v12375_v8, %v4329_v3  ;;  %4343 = vadd.xlane.f32.xlu1 %v4342_v13  ;;  %v4339_v10 = vsel %vm51_vm0, %v4335_v25, 0.0  ;;  %v11231_v24 = vpack.c.bf16 %v4521_v23, %v4520_v22  ;;  %v4523_v3 = vld [vmem:[%s13219_s6 + $0x18] sm:$0xff]  ;;  %v4525_v13 = vld [vmem:[%s13219_s6 + $0x28] sm:$0xff] }
0x1046   :  { %4340 = vadd.xlane.f32.xlu0 %v4339_v10  ;;  %v4338_v26 = vmul.f32 %v4334_v11, %v4334_v11  ;;  %v11235_v25 = vpack.c.bf16 %v4523_v3, %v4522_v4  ;;  %v4526_v10 = vld [vmem:[%s13219_s6 + $0x30] sm:$0xff] }
0x1047   :  { %v4337_v27 = vmul.f32 %v4333_v16, %v4333_v16  ;;  %11232 = vmatprep.subr.bf16.mxu0 %v11231_v24 }
0x1048   :  { %v4348_v28 = vsel %vm51_vm0, %v4338_v26, 0.0  ;;  %11234 = vmatpush3.bf16.msra.mxu0 %v11231_v24  ;;  %v4527_v26 = vld [vmem:[%s13219_s6 + $0x38] sm:$0xff] }
0x1049   :  { %4349 = vadd.xlane.f32.xlu1 %v4348_v28  ;;  %v4345_v29 = vsel %vm51_vm0, %v4337_v27, 0.0  ;;  %11236 = vmatprep.subr.bf16.mxu0 %v11235_v25  ;;  %v11243_v27 = vpack.c.bf16 %v4527_v26, %v4526_v10  ;;  %v4528_v28 = vld [vmem:[%s13219_s6 + $0x40] sm:$0xff] }
0x104a   :  { %4346 = vadd.xlane.f32.xlu0 %v4345_v29  ;;  %v4529_v29 = vld [vmem:[%s13219_s6 + $0x48] sm:$0xff] }
0x104b   :  { %v11247_v30 = vpack.c.bf16 %v4529_v29, %v4528_v28 }
0x104c   :  { %11238 = vmatpush3.bf16.msra.mxu0 %v11235_v25 }
0x10d2   :  { %v4344_v6 = vpop.xlane.xlu1 %4343 }
0x10d3   :  { %v4352_v36 = vmul.f32 0.03125, %v4344_v6  ;;  %v4341_v37 = vpop.xlane.xlu0 %4340  ;;  %v11255_v6 = vpack.c.bf16 %v4533_v35, %v4532_v34 }
0x10d4   :  { %v4351_v7 = vmul.f32 0.03125, %v4341_v37  ;;  %v4535_v37 = vld [vmem:[%s13219_s6 + $0x78] sm:$0xff] }
0x10d5   :  { %v4356_v39 = vadd.f32 1e-05, %v4352_v36  ;;  %v4534_v36 = vld [vmem:[%s13219_s6 + $0x70] sm:$0xff] }
0x10d6   :  { %v4355_v41 = vadd.f32 1e-05, %v4351_v7  ;;  %v4350_v43 = vpop.xlane.xlu1 %4349  ;;  %v11259_v7 = vpack.c.bf16 %v4535_v37, %v4534_v36 }
0x10d7   :  { %11513 = vrsqrt.f32 %v4356_v39  ;;  %v4354_v47 = vmul.f32 0.03125, %v4350_v43  ;;  %v4347_v49 = vpop.xlane.xlu0 %4346  ;;  %v4389_v39 = vsub.s32 6, %v11810_v51 }
0x10d8   :  { %11515 = vrsqrt.f32 %v4355_v41  ;;  %v4353_v55 = vmul.f32 0.03125, %v4347_v49 }
0x10d9   :  { %v4358_v57 = vadd.f32 1e-05, %v4354_v47  ;;  %v4390_v41 = vrot.slane %v12348_v54, %v4389_v39 }
0x10da   :  { %v4357_v40 = vadd.f32 1e-05, %v4353_v55 }
0x10db   :  { %11517 = vrsqrt.f32 %v4358_v57 }
0x10dc   :  { %11519 = vrsqrt.f32 %v4357_v40 }
0x10e1   :  { %v11514_v44 = vpop.eup %11513 }
0x10e2   :  { %v11516_v61 = vpop.eup %11515  ;;  %v4364_v45 = vmul.f32 %v11514_v44, %v4332_v20 }
0x10e3   :  { %v4363_v62 = vmul.f32 %v11516_v61, %v4331_v21 }
0x10e4   :  { %v4372_v0 = vmul.f32 %v4370_v50, %v4364_v45 }
0x10e5   :  { %v11518_v1 = vpop.eup %11517  ;;  %v4371_v42 = vmul.f32 %v4370_v50, %v4363_v62 }
0x10e6   :  { %v11520_v2 = vpop.eup %11519  ;;  %v4366_v9 = vmul.f32 %v11518_v1, %v4334_v11  ;;  %v4380_v15 = vadd.f32 %v4378_v63, %v4372_v0  ;;  %v4524_v11 = vld [vmem:[%s13219_s6 + $0x20] sm:$0xff] }
0x10e7   :  { %v4379_v12 = vadd.f32 %v4378_v63, %v4371_v42  ;;  %v4365_v14 = vmul.f32 %v11520_v2, %v4333_v16  ;;  %v11239_v16 = vpack.c.bf16 %v4525_v13, %v4524_v11 }
0x10e8   :  { %v4374_v18 = vmul.f32 %v4370_v50, %v4366_v9 }
0x10e9   :  { %10649 = vmatprep.mubr.msk.f32.mxu1 %vm51_vm0, %v4379_v12  ;;  %v4373_v19 = vmul.f32 %v4370_v50, %v4365_v14  ;;  %11240 = vmatprep.subr.bf16.mxu0 %v11239_v16 }
0x10ea   :  { %10650 = vmatmul.mubr.msk.f32.vlgmr.msra.gmra.mrb[60].mxu1 %vm51_vm0, %v4380_v15  ;;  %v4382_v21 = vadd.f32 %v4378_v63, %v4374_v18  ;;  %11242 = vmatpush3.bf16.msra.mxu0 %v11239_v16  ;;  %v4627_v16 = vsub.s32 5, %v11810_v51 }
0x10eb   :  { %v4381_v20 = vadd.f32 %v4378_v63, %v4373_v19  ;;  %11244 = vmatprep.subr.bf16.mxu0 %v11243_v27 }
0x10ec   :  { %v4628_v10 = vrot.slane %v12348_v54, %v4627_v16 }
0x10ed   :  { %10652 = vmatprep.mubr.msk.f32.mxu1 %vm51_vm0, %v4381_v20 }
0x10ee   :  { %10653 = vmatmul.mubr.msk.f32.gmra.mrb[62].mxu1 %vm51_vm0, %v4382_v21  ;;  %11246 = vmatpush3.bf16.msra.mxu0 %v11243_v27 }
0x10ef   :  { %11248 = vmatprep.subr.bf16.mxu0 %v11247_v30 }
0x10f2   :  { %11250 = vmatpush3.bf16.msra.mxu0 %v11247_v30 }
0x10f3   :  { %11252 = vmatprep.subr.bf16.mxu0 %v11251_v33 }
0x10f6   :  { %11254 = vmatpush3.bf16.msra.mxu0 %v11251_v33 }
0x10f7   :  { %11256 = vmatprep.subr.bf16.mxu0 %v11255_v6 }
0x10fa   :  { %11258 = vmatpush3.bf16.msra.mxu0 %v11255_v6 }
0x10fb   :  { %11260 = vmatprep.subr.bf16.mxu0 %v11259_v7 }
0x10fe   :  { %11262 = vmatpush3.bf16.msra.mxu0 %v11259_v7 }
0x10ff   :  { %10740 = vmatprep.subr.mxu0 %v11680_v17 }
0x11bd   :  { %v10651_v43 = vpop.f32.mrb[60].mxu1 }
0x11be   :  { %v4475_v47 = vadd.f32 %v10651_v43, %v4390_v41  ;;  %v4469_v49 = vpop.f32.mrb[61].mxu1 }
0x11bf   :  { %v4470_v55 = vadd.f32 %v4469_v49, %v4390_v41 }
0x11c0   :  { %v9626_v57 = vmul.f32 -1.702, %v4475_v47 }
0x11c1   :  { %v9625_v40 = vmul.f32 -1.702, %v4470_v55  ;;  %v10654_v50 = vpop.f32.mrb[62].mxu1 }
0x11c2   :  { %v4498_v44 = vmul.f32 1.442695, %v9626_v57  ;;  %v4485_v61 = vadd.f32 %v10654_v50, %v4390_v41  ;;  %v4479_v45 = vpop.f32.mrb[63].mxu1 }
0x11c3   :  { %v4496_v62 = vmul.f32 1.442695, %v9625_v40  ;;  %v4480_v63 = vadd.f32 %v4479_v45, %v4390_v41 }
0x11c4   :  { %11521 = vpow2.f32 %v4498_v44  ;;  %v9628_v0 = vmul.f32 -1.702, %v4485_v61 }
0x11c5   :  { %11523 = vpow2.f32 %v4496_v62  ;;  %v9627_v1 = vmul.f32 -1.702, %v4480_v63 }
0x11c6   :  { %v4502_v42 = vmul.f32 1.442695, %v9628_v0 }
0x11c7   :  { %v4500_v2 = vmul.f32 1.442695, %v9627_v1 }
0x11c8   :  { %11525 = vpow2.f32 %v4502_v42 }
0x11c9   :  { %11527 = vpow2.f32 %v4500_v2 }
0x11ce   :  { %v11522_v9 = vpop.eup %11521 }
0x11cf   :  { %v11524_v12 = vpop.eup %11523  ;;  %v4505_v14 = vadd.f32 1.0, %v11522_v9  ;;  %v9630_v9 = vld [vmem:[%s13215_s2 + $0x180] sm:$0xff] }
0x11d0   :  { %v4504_v15 = vadd.f32 1.0, %v11524_v12  ;;  %v9631_v12 = vld [vmem:[%s13215_s2 + $0x188] sm:$0xff] }
0x11d1   :  { %11529 = vrcp.f32 %v4505_v14  ;;  %v11263_v14 = vpack.c.bf16 %v9631_v12, %v9630_v9 }
0x11d2   :  { %v11526_v18 = vpop.eup %11525  ;;  %11531 = vrcp.f32 %v4504_v15  ;;  %v9632_v15 = vld [vmem:[%s13215_s2 + $0x190] sm:$0xff] }
0x11d3   :  { %v11528_v19 = vpop.eup %11527  ;;  %v4507_v20 = vadd.f32 1.0, %v11526_v18  ;;  %11264 = vmatprep.subr.bf16.mxu1 %v11263_v14  ;;  %v9633_v18 = vld [vmem:[%s13215_s2 + $0x198] sm:$0xff] }
0x11d4   :  { %v4506_v21 = vadd.f32 1.0, %v11528_v19  ;;  %11266 = vmatpush3.bf16.msra.mxu1 %v11263_v14  ;;  %v11267_v19 = vpack.c.bf16 %v9633_v18, %v9632_v15  ;;  %v9645_v18 = vld [vmem:[%s13216_s3 + $0x10] ss:$0 sm:$0xff] }
0x11d5   :  { %11533 = vrcp.f32 %v4507_v20  ;;  %v9640_v20 = vld [vmem:[%s13215_s2 + $0x200] sm:$0xff] }
0x11d6   :  { %11535 = vrcp.f32 %v4506_v21  ;;  %11268 = vmatprep.subr.bf16.mxu1 %v11267_v19  ;;  %v9641_v21 = vld [vmem:[%s13215_s2 + $0x208] sm:$0xff] }
0x11d8   :  { %11270 = vmatpush3.bf16.msra.mxu1 %v11267_v19 }
0x11db   :  { %v11530_v22 = vpop.eup %11529 }
0x11dc   :  { %v11532_v23 = vpop.eup %11531  ;;  %v4517_v4 = vmul.f32 %v11530_v22, %v4475_v47  ;;  %v11271_v22 = vpack.c.bf16 %v9641_v21, %v9640_v20  ;;  %v9635_v20 = vld [vmem:[%s13216_s3 + $0xc] ss:$0 sm:$0xff] }
0x11dd   :  { %v4516_v24 = vmul.f32 %v11532_v23, %v4470_v55 }
0x11de   :  { %11272 = vmatprep.subr.bf16.mxu1 %v11271_v22 }
0x11df   :  { %v11534_v3 = vpop.eup %11533  ;;  %10687 = vmatprep.mubr.f32.mxu0 %v4516_v24 }
0x11e0   :  { %v11536_v25 = vpop.eup %11535  ;;  %10688 = vmatmul.mubr.f32.vlgmr.msra.gmra.mrb[56].mxu0 %v4517_v4  ;;  %v4519_v13 = vmul.f32 %v11534_v3, %v4485_v61 }
0x11e1   :  { %v4518_v11 = vmul.f32 %v11536_v25, %v4480_v63 }
0x11e3   :  { %10690 = vmatprep.mubr.f32.mxu0 %v4518_v11 }
0x11e4   :  { %10691 = vmatmul.mubr.f32.gmra.mrb[58].mxu0 %v4519_v13 }
0x11e5   :  { %10742 = vmatprep.mubr.msk.f32.mxu0 %vm11681_vm1, %v11680_v17 }
0x12b3   :  { %v10689_v26 = vpop.f32.mrb[56].mxu0 }
0x12b4   :  { %v4622_v27 = vadd.f32 %v10689_v26, %v12359_v53  ;;  %v4602_v28 = vpop.f32.mrb[57].mxu0 }
0x12b5   :  { %v4621_v29 = vadd.f32 %v4602_v28, %v12361_v38 }
0x12b6   :  { %v12474_v30 = vadd.f32 %v4628_v10, %v4622_v27 }
0x12b7   :  { %v12476_v31 = vadd.f32 %v4628_v10, %v4621_v29  ;;  %v10692_v32 = vpop.f32.mrb[58].mxu0 }
0x12b8   :  { %v4624_v33 = vadd.f32 %v10692_v32, %v12373_v5  ;;  %v4612_v34 = vpop.f32.mrb[59].mxu0  ;;  %v4638_v35 = vsel %vm51_vm0, %v12474_v30, 0.0  ;;  %v9629_v32 = vld [vmem:[%s13220_s7 + $0x8] sm:$0x7f] }
0x12b9   :  { %v4623_v6 = vadd.f32 %v4612_v34, %v12375_v8  ;;  %4639 = vadd.xlane.f32.xlu1 %v4638_v35  ;;  %v4635_v54 = vsel %vm51_vm0, %v12476_v31, 0.0 }
0x12ba   :  { %v12484_v53 = vadd.f32 %v4628_v10, %v4624_v33  ;;  %4636 = vadd.xlane.f32.xlu0 %v4635_v54  ;;  %v4690_v33 = vrot.slane %v9629_v32, %v11813_v56  ;;  %v4698_v54 = vrot.slane %v9629_v32, %v11819_v59 }
0x12bb   :  { %v12486_v38 = vadd.f32 %v4628_v10, %v4623_v6 }
0x12bc   :  { %v4644_v36 = vsel %vm51_vm0, %v12484_v53, 0.0 }
0x12bd   :  { %4645 = vadd.xlane.f32.xlu1 %v4644_v36  ;;  %v4641_v5 = vsel %vm51_vm0, %v12486_v38, 0.0 }
0x12be   :  { %4642 = vadd.xlane.f32.xlu0 %v4641_v5 }
0x1346   :  { %v4640_v37 = vpop.xlane.xlu1 %4639 }
0x1347   :  { %v4648_v7 = vmul.f32 0.03125, %v4640_v37  ;;  %v4637_v8 = vpop.xlane.xlu0 %4636 }
0x1348   :  { %v4647_v41 = vmul.f32 0.03125, %v4637_v8  ;;  %v9642_v8 = vld [vmem:[%s13215_s2 + $0x210] sm:$0xff] }
0x1349   :  { %v4652_v43 = vsub.f32 %v12474_v30, %v4648_v7 }
0x134a   :  { %v4651_v47 = vsub.f32 %v12476_v31, %v4647_v41  ;;  %v4646_v49 = vpop.xlane.xlu1 %4645  ;;  %v9643_v41 = vld [vmem:[%s13215_s2 + $0x218] sm:$0xff] }
0x134b   :  { %v4650_v55 = vmul.f32 0.03125, %v4646_v49  ;;  %v4643_v57 = vpop.xlane.xlu0 %4642  ;;  %v4656_v40 = vmul.f32 %v4652_v43, %v4652_v43 }
0x134c   :  { %v4649_v50 = vmul.f32 0.03125, %v4643_v57  ;;  %v4655_v44 = vmul.f32 %v4651_v47, %v4651_v47 }
0x134d   :  { %v4654_v61 = vsub.f32 %v12484_v53, %v4650_v55  ;;  %v4662_v45 = vsel %vm51_vm0, %v4656_v40, 0.0 }
0x134e   :  { %v4653_v62 = vsub.f32 %v12486_v38, %v4649_v50  ;;  %4663 = vadd.xlane.f32.xlu1 %v4662_v45  ;;  %v4659_v63 = vsel %vm51_vm0, %v4655_v44, 0.0  ;;  %v9650_v45 = vld [vmem:[%s13215_s2 + $0x280] sm:$0xff] }
0x134f   :  { %4660 = vadd.xlane.f32.xlu0 %v4659_v63  ;;  %v4658_v0 = vmul.f32 %v4654_v61, %v4654_v61  ;;  %v9651_v63 = vld [vmem:[%s13215_s2 + $0x288] sm:$0xff] }
0x1350   :  { %v4657_v1 = vmul.f32 %v4653_v62, %v4653_v62 }
0x1351   :  { %v4668_v42 = vsel %vm51_vm0, %v4658_v0, 0.0  ;;  %v11279_v0 = vpack.c.bf16 %v9651_v63, %v9650_v45 }
0x1352   :  { %4669 = vadd.xlane.f32.xlu1 %v4668_v42  ;;  %v4665_v2 = vsel %vm51_vm0, %v4657_v1, 0.0  ;;  %v9652_v1 = vld [vmem:[%s13215_s2 + $0x290] sm:$0xff]  ;;  %v9653_v42 = vld [vmem:[%s13215_s2 + $0x298] sm:$0xff] }
0x1353   :  { %4666 = vadd.xlane.f32.xlu0 %v4665_v2  ;;  %v11283_v2 = vpack.c.bf16 %v9653_v42, %v9652_v1 }
0x13db   :  { %v4664_v23 = vpop.xlane.xlu1 %4663 }
0x13dc   :  { %v4672_v24 = vmul.f32 0.03125, %v4664_v23  ;;  %v4661_v4 = vpop.xlane.xlu0 %4660 }
0x13dd   :  { %v4671_v3 = vmul.f32 0.03125, %v4661_v4 }
0x13de   :  { %v4676_v25 = vadd.f32 1e-05, %v4672_v24 }
0x13df   :  { %v4675_v11 = vadd.f32 1e-05, %v4671_v3  ;;  %v4670_v13 = vpop.xlane.xlu1 %4669 }
0x13e0   :  { %11537 = vrsqrt.f32 %v4676_v25  ;;  %v4674_v10 = vmul.f32 0.03125, %v4670_v13  ;;  %v4667_v26 = vpop.xlane.xlu0 %4666 }
0x13e1   :  { %11539 = vrsqrt.f32 %v4675_v11  ;;  %v4673_v27 = vmul.f32 0.03125, %v4667_v26 }
0x13e2   :  { %v4678_v28 = vadd.f32 1e-05, %v4674_v10  ;;  %v9655_v10 = vld [vmem:[%s13216_s3 + $0x14] ss:$0 sm:$0xff] }
0x13e3   :  { %v4677_v29 = vadd.f32 1e-05, %v4673_v27 }
0x13e4   :  { %11541 = vrsqrt.f32 %v4678_v28 }
0x13e5   :  { %11543 = vrsqrt.f32 %v4677_v29 }
0x13ea   :  { %v11538_v34 = vpop.eup %11537 }
0x13eb   :  { %v11540_v35 = vpop.eup %11539  ;;  %v4684_v6 = vmul.f32 %v11538_v34, %v4652_v43 }
0x13ec   :  { %v4683_v36 = vmul.f32 %v11540_v35, %v4651_v47  ;;  %v11275_v47 = vpack.c.bf16 %v9643_v41, %v9642_v8 }
0x13ed   :  { %v4692_v5 = vmul.f32 %v4690_v33, %v4684_v6 }
0x13ee   :  { %v11542_v37 = vpop.eup %11541  ;;  %v4691_v7 = vmul.f32 %v4690_v33, %v4683_v36 }
0x13ef   :  { %v11544_v49 = vpop.eup %11543  ;;  %v4686_v55 = vmul.f32 %v11542_v37, %v4654_v61  ;;  %v12531_v43 = vadd.f32 %v4698_v54, %v4692_v5 }
0x13f0   :  { %v12529_v57 = vadd.f32 %v4698_v54, %v4691_v7  ;;  %v4685_v40 = vmul.f32 %v11544_v49, %v4653_v62 }
0x13f1   :  { %v4694_v50 = vmul.f32 %v4690_v33, %v4686_v55 }
0x13f2   :  { %v4693_v44 = vmul.f32 %v4690_v33, %v4685_v40  ;;  %10701 = vmatprep.mubr.msk.f32.mxu1 %vm51_vm0, %v12529_v57 }
0x13f3   :  { %10702 = vmatmul.mubr.msk.f32.vlgmr.msra.gmra.mrb[64].mxu1 %vm51_vm0, %v12531_v43  ;;  %v12545_v62 = vadd.f32 %v4698_v54, %v4694_v50 }
0x13f4   :  { %v12543_v61 = vadd.f32 %v4698_v54, %v4693_v44  ;;  %11274 = vmatpush3.bf16.msra.mxu1 %v11271_v22 }
0x13f5   :  { %11276 = vmatprep.subr.bf16.mxu1 %v11275_v47 }
0x13f6   :  { %10704 = vmatprep.mubr.msk.f32.mxu1 %vm51_vm0, %v12543_v61 }
0x13f7   :  { %10705 = vmatmul.mubr.msk.f32.gmra.mrb[66].mxu1 %vm51_vm0, %v12545_v62 }
0x13f8   :  { %11278 = vmatpush3.bf16.msra.mxu1 %v11275_v47  ;;  %10715 = vmatprep.mubr.msk.f32.mxu1 %vm51_vm0, %v12529_v57 }
0x13f9   :  { %11280 = vmatprep.subr.bf16.mxu1 %v11279_v0 }
0x13fb   :  { %10716 = vmatmul.mubr.msk.f32.vlgmr.msra.gmra.mrb[68].mxu1 %vm51_vm0, %v12531_v43 }
0x13fc   :  { %10718 = vmatprep.mubr.msk.f32.mxu1 %vm51_vm0, %v12543_v61  ;;  %11282 = vmatpush3.bf16.msra.mxu1 %v11279_v0 }
0x13fd   :  { %11284 = vmatprep.subr.bf16.mxu1 %v11283_v2 }
0x13ff   :  { %10719 = vmatmul.mubr.msk.f32.gmra.mrb[70].mxu1 %vm51_vm0, %v12545_v62 }
0x1400   :  { %11286 = vmatpush3.bf16.msra.mxu1 %v11283_v2  ;;  %10729 = vmatprep.mubr.msk.f32.mxu1 %vm51_vm0, %v12529_v57 }
0x1401   :  { %10735 = vmatprep.subr.mxu1 %v11680_v17 }
0x1403   :  { %10730 = vmatmul.mubr.msk.f32.vlgmr.msra.gmra.mrb[72].mxu1 %vm51_vm0, %v12531_v43 }
0x1404   :  { %10732 = vmatprep.mubr.msk.f32.mxu1 %vm51_vm0, %v12543_v61 }
0x1407   :  { %10733 = vmatmul.mubr.msk.f32.gmra.mrb[74].mxu1 %vm51_vm0, %v12545_v62 }
0x1408   :  { %10737 = vmatprep.mubr.msk.f32.mxu1 %vm11681_vm1, %v11680_v17 }
0x14c6   :  { %v10703_v9 = vpop.f32.mrb[64].mxu1 }
0x14c7   :  { %v4794_v12 = vpop.f32.mrb[65].mxu1  ;;  %v4800_v24 = vadd.f32 %v10703_v9, %v9635_v20 }
0x14c8   :  { %v4795_v3 = vadd.f32 %v9635_v20, %v4794_v12 }
0x14ca   :  { %v10706_v14 = vpop.f32.mrb[66].mxu1 }
0x14cb   :  { %v4804_v15 = vpop.f32.mrb[67].mxu1  ;;  %v4810_v26 = vadd.f32 %v10706_v14, %v9635_v20 }
0x14cc   :  { %v4805_v28 = vadd.f32 %v9635_v20, %v4804_v15 }
0x14ce   :  { %v10717_v19 = vpop.f32.mrb[68].mxu1 }
0x14cf   :  { %v4898_v21 = vadd.f32 %v10717_v19, %v9645_v18  ;;  %v4892_v22 = vpop.f32.mrb[69].mxu1 }
0x14d0   :  { %v4893_v23 = vadd.f32 %v9645_v18, %v4892_v22 }
0x14d1   :  { %10741 = vmatpush3.xpose.msk.msra.mxu0 %vm425_vm2, %v4898_v21 }
0x14d2   :  { %v10720_v4 = vpop.f32.mrb[70].mxu1  ;;  %10736 = vmatpush3.xpose.msk.msra.mxu1 %vm425_vm2, %v4893_v23  ;;  %10750 = vmatprep.subr.mxu0 %v11680_v17 }
0x14d3   :  { %v4908_v25 = vadd.f32 %v10720_v4, %v9645_v18  ;;  %v4902_v11 = vpop.f32.mrb[71].mxu1  ;;  %10745 = vmatprep.subr.mxu1 %v11680_v17 }
0x14d4   :  { %v4903_v13 = vadd.f32 %v9645_v18, %v4902_v11  ;;  %10743 = vmatmul.mubr.msk.f32.vlgmr.msra.gmra.mrb[60].mxu0 %vm425_vm2, %v4800_v24 }
0x14d5   :  { %10738 = vmatmul.mubr.msk.f32.vlgmr.msra.gmra.mrb[76].mxu1 %vm425_vm2, %v4795_v3  ;;  %10751 = vmatpush3.xpose.msk.msra.mxu0 %vm425_vm2, %v4908_v25 }
0x14d6   :  { %v10731_v27 = vpop.f32.mrb[72].mxu1  ;;  %10746 = vmatpush3.xpose.msk.msra.mxu1 %vm425_vm2, %v4903_v13  ;;  %10752 = vmatprep.mubr.msk.f32.mxu0 %vm11681_vm1, %v11680_v17 }
0x14d7   :  { %v4996_v29 = vadd.f32 %v10731_v27, %v9655_v10  ;;  %v4990_v32 = vpop.f32.mrb[73].mxu1  ;;  %10747 = vmatprep.mubr.msk.f32.mxu1 %vm11681_vm1, %v11680_v17  ;;  %10760 = vmatprep.subr.mxu0 %v11680_v17 }
0x14d8   :  { %v4991_v33 = vadd.f32 %v9655_v10, %v4990_v32  ;;  %10753 = vmatmul.mubr.msk.f32.vlgmr.msra.gmra.mrb[62].mxu0 %vm425_vm2, %v4810_v26  ;;  %10755 = vmatprep.subr.mxu1 %v11680_v17 }
0x14d9   :  { %10748 = vmatmul.mubr.msk.f32.vlgmr.msra.gmra.mrb[78].mxu1 %vm425_vm2, %v4805_v28  ;;  %10761 = vmatpush3.msra.mxu0 %v4996_v29 }
0x14da   :  { %v10734_v34 = vpop.f32.mrb[74].mxu1  ;;  %10756 = vmatpush3.msra.mxu1 %v4991_v33  ;;  %10762 = vmatprep.mubr.msk.f32.mxu0 %vm11681_vm1, %v11680_v17 }
0x14db   :  { %v12603_v35 = vadd.f32 %v10734_v34, %v9655_v10  ;;  %v5000_v6 = vpop.f32.mrb[75].mxu1  ;;  %10770 = vmatprep.subr.mxu0 %v11680_v17  ;;  %10757 = vmatprep.mubr.msk.f32.mxu1 %vm11681_vm1, %v11680_v17 }
0x14dc   :  { %v12608_v54 = vadd.f32 %v9655_v10, %v5000_v6  ;;  %10765 = vmatprep.subr.mxu1 %v11680_v17 }
0x15a7   :  { %v5157_v36 = vpop.f32.mrb[60].mxu0 }
0x15a8   :  { %v5314_v5 = vmul.f32 0.35355338, %v5157_v36  ;;  %v5081_v37 = vpop.f32.mrb[76].mxu1  ;;  %v10744_v7 = vpop.f32.mrb[61].mxu0 }
0x15a9   :  { %v5313_v8 = vmul.f32 0.35355338, %v5081_v37  ;;  %v10739_v41 = vpop.f32.mrb[77].mxu1  ;;  %v9684_v37 = vld [vmem:[%s13215_s2 + $0x228] sm:$0xff] }
0x15aa   :  { %v5318_v49 = vadd.f32 %v5314_v5, %v11911_v48  ;;  %v9683_v5 = vld [vmem:[%s13215_s2 + $0x220] sm:$0xff]  ;;  %v9674_v41 = vld [vmem:[%s13215_s2 + $0x1a8] sm:$0xff] }
0x15ab   :  { %v5309_v55 = vpop.f32.mrb[62].mxu0  ;;  %v5317_v40 = vadd.f32 %v5313_v8, %v11911_v48  ;;  %v9673_v8 = vld [vmem:[%s13215_s2 + $0x1a0] sm:$0xff] }
0x15ac   :  { %v5316_v50 = vmul.f32 0.35355338, %v5309_v55  ;;  %v5233_v47 = vpop.f32.mrb[78].mxu1  ;;  %v10754_v44 = vpop.f32.mrb[63].mxu0  ;;  %v5324_v45 = vsel %vm425_vm2, %v5318_v49, -inf }
0x15ad   :  { %v5315_v63 = vmul.f32 0.35355338, %v5233_v47  ;;  %5325 = vmax.xlane.f32.xlu0 %v5324_v45  ;;  %v10749_v0 = vpop.f32.mrb[79].mxu1  ;;  %v5321_v1 = vsel %vm425_vm2, %v5317_v40, -inf  ;;  %v11287_v47 = vpack.c.bf16 %v9674_v41, %v9673_v8  ;;  %v9685_v44 = vld [vmem:[%s13215_s2 + $0x230] sm:$0xff]  ;;  %v9686_v45 = vld [vmem:[%s13215_s2 + $0x238] sm:$0xff] }
0x15ae   :  { %5322 = vmax.xlane.f32.xlu1 %v5321_v1  ;;  %v5320_v42 = vadd.f32 %v5316_v50, %v11911_v48  ;;  %v11295_v50 = vpack.c.bf16 %v9684_v37, %v9683_v5  ;;  %v9675_v0 = vld [vmem:[%s13215_s2 + $0x1b0] sm:$0xff]  ;;  %v9676_v1 = vld [vmem:[%s13215_s2 + $0x1b8] sm:$0xff] }
0x15af   :  { %v5319_v2 = vadd.f32 %v5315_v63, %v11911_v48  ;;  %v9698_v8 = vld [vmem:[%s13216_s3 + $0x15] ss:$0 sm:$0xff] }
0x15b0   :  { %v5330_v9 = vsel %vm425_vm2, %v5320_v42, -inf }
0x15b1   :  { %5331 = vmax.xlane.f32.xlu0 %v5330_v9  ;;  %v5327_v12 = vsel %vm425_vm2, %v5319_v2, -inf }
0x15b2   :  { %5328 = vmax.xlane.f32.xlu1 %v5327_v12  ;;  %v11291_v12 = vpack.c.bf16 %v9676_v1, %v9675_v0 }
0x163a   :  { %v5326_v14 = vpop.xlane.xlu0 %5325 }
0x163b   :  { %v5334_v15 = vsub.f32 %v5318_v49, %v5326_v14  ;;  %v5323_v18 = vpop.xlane.xlu1 %5322  ;;  %v9693_v14 = vld [vmem:[%s13215_s2 + $0x2a0] sm:$0xff] }
0x163c   :  { %v5333_v19 = vsub.f32 %v5317_v40, %v5323_v18  ;;  %v9695_v18 = vld [vmem:[%s13215_s2 + $0x2b0] sm:$0xff] }
0x163d   :  { %v5339_v20 = vmul.f32 1.442695, %v5334_v15 }
0x163e   :  { %v5337_v21 = vmul.f32 1.442695, %v5333_v19  ;;  %v5332_v22 = vpop.xlane.xlu0 %5331  ;;  %v9696_v19 = vld [vmem:[%s13215_s2 + $0x2b8] sm:$0xff] }
0x163f   :  { %11545 = vpow2.f32 %v5339_v20  ;;  %v5336_v23 = vsub.f32 %v5320_v42, %v5332_v22  ;;  %v5329_v24 = vpop.xlane.xlu1 %5328  ;;  %v11307_v20 = vpack.c.bf16 %v9696_v19, %v9695_v18 }
0x1640   :  { %11547 = vpow2.f32 %v5337_v21  ;;  %v5335_v4 = vsub.f32 %v5319_v2, %v5329_v24 }
0x1641   :  { %v5343_v3 = vmul.f32 1.442695, %v5336_v23 }
0x1642   :  { %v5341_v25 = vmul.f32 1.442695, %v5335_v4 }
0x1643   :  { %11549 = vpow2.f32 %v5343_v3 }
0x1644   :  { %11551 = vpow2.f32 %v5341_v25 }
0x1649   :  { %v11546_v11 = vpop.eup %11545 }
0x164a   :  { %v11548_v13 = vpop.eup %11547  ;;  %v5348_v10 = vsel %vm425_vm2, %v11546_v11, 0.0 }
0x164b   :  { %5349 = vadd.xlane.f32.xlu0 %v5348_v10  ;;  %v5345_v26 = vsel %vm425_vm2, %v11548_v13, 0.0 }
0x164c   :  { %5346 = vadd.xlane.f32.xlu1 %v5345_v26 }
0x164d   :  { %v11550_v27 = vpop.eup %11549 }
0x164e   :  { %v11552_v28 = vpop.eup %11551  ;;  %v5354_v29 = vsel %vm425_vm2, %v11550_v27, 0.0 }
0x164f   :  { %5355 = vadd.xlane.f32.xlu0 %v5354_v29  ;;  %v5351_v32 = vsel %vm425_vm2, %v11552_v28, 0.0 }
0x1650   :  { %5352 = vadd.xlane.f32.xlu1 %v5351_v32 }
0x16d8   :  { %v5350_v33 = vpop.xlane.xlu0 %5349 }
0x16d9   :  { %11553 = vrcp.f32 %v5350_v33  ;;  %v5347_v34 = vpop.xlane.xlu1 %5346 }
0x16da   :  { %11555 = vrcp.f32 %v5347_v34 }
0x16dc   :  { %v5356_v6 = vpop.xlane.xlu0 %5355 }
0x16dd   :  { %11557 = vrcp.f32 %v5356_v6  ;;  %v5353_v36 = vpop.xlane.xlu1 %5352 }
0x16de   :  { %11559 = vrcp.f32 %v5353_v36 }
0x16e3   :  { %v11554_v7 = vpop.eup %11553 }
0x16e4   :  { %v11556_v49 = vpop.eup %11555  ;;  %v5360_v55 = vmul.f32 %v11554_v7, %v11546_v11 }
0x16e5   :  { %v5358_v40 = vmul.f32 %v11556_v49, %v11548_v13  ;;  %v9688_v13 = vld [vmem:[%s13216_s3 + $0x11] ss:$0 sm:$0xff] }
0x16e6   :  { %10763 = vmatmul.mubr.msk.f32.vlgmr.msra.gmra.mrb[64].mxu0 %vm425_vm2, %v5360_v55 }
0x16e7   :  { %v11558_v63 = vpop.eup %11557  ;;  %10771 = vmatpush3.msra.mxu0 %v12603_v35  ;;  %10758 = vmatmul.mubr.msk.f32.vlgmr.msra.gmra.mrb[80].mxu1 %vm425_vm2, %v5358_v40  ;;  %v11299_v35 = vpack.c.bf16 %v9686_v45, %v9685_v44 }
0x16e8   :  { %v11560_v42 = vpop.eup %11559  ;;  %v5364_v2 = vmul.f32 %v11558_v63, %v11550_v27  ;;  %10766 = vmatpush3.msra.mxu1 %v12608_v54  ;;  %10772 = vmatprep.mubr.msk.f32.mxu0 %vm11681_vm1, %v11680_v17  ;;  %v9694_v54 = vld [vmem:[%s13215_s2 + $0x2a8] sm:$0xff] }
0x16e9   :  { %v5362_v9 = vmul.f32 %v11560_v42, %v11552_v28  ;;  %11296 = vmatprep.subr.bf16.mxu0 %v11295_v50  ;;  %10767 = vmatprep.mubr.msk.f32.mxu1 %vm11681_vm1, %v11680_v17  ;;  %v11303_v15 = vpack.c.bf16 %v9694_v54, %v9693_v14  ;;  %v9678_v28 = vld [vmem:[%s13216_s3 + $0xd] ss:$0 sm:$0xff] }
0x16ea   :  { %10773 = vmatmul.mubr.msk.f32.vlgmr.msra.gmra.mrb[66].mxu0 %vm425_vm2, %v5364_v2  ;;  %11288 = vmatprep.subr.bf16.mxu1 %v11287_v47 }
0x16eb   :  { %11298 = vmatpush3.bf16.msra.mxu0 %v11295_v50  ;;  %10768 = vmatmul.mubr.msk.f32.vlgmr.msra.gmra.mrb[82].mxu1 %vm425_vm2, %v5362_v9 }
0x16ec   :  { %11290 = vmatpush3.bf16.msra.mxu1 %v11287_v47  ;;  %10797 = vmatprep.mubr.msk.f32.mxu0 %vm51_vm0, %v12529_v57 }
0x16ed   :  { %10783 = vmatprep.mubr.msk.f32.mxu1 %vm51_vm0, %v12529_v57  ;;  %11300 = vmatprep.subr.bf16.mxu0 %v11299_v35 }
0x16ee   :  { %11292 = vmatprep.subr.bf16.mxu1 %v11291_v12 }
0x16ef   :  { %11302 = vmatpush3.bf16.msra.mxu0 %v11299_v35 }
0x16f0   :  { %11294 = vmatpush3.bf16.msra.mxu1 %v11291_v12  ;;  %10817 = vmatprep.subr.mxu0 %v11680_v17 }
0x16f1   :  { %11304 = vmatprep.subr.bf16.mxu1 %v11303_v15 }
0x16f2   :  { %10798 = vmatmul.mubr.msk.f32.vlgmr.msra.gmra.mrb[68].mxu0 %vm51_vm0, %v12531_v43 }
0x16f3   :  { %10784 = vmatmul.mubr.msk.f32.vlgmr.msra.gmra.mrb[84].mxu1 %vm51_vm0, %v12531_v43  ;;  %10800 = vmatprep.mubr.msk.f32.mxu0 %vm51_vm0, %v12543_v61 }
0x16f4   :  { %10786 = vmatprep.mubr.msk.f32.mxu1 %vm51_vm0, %v12543_v61  ;;  %11306 = vmatpush3.bf16.msra.mxu1 %v11303_v15 }
0x16f5   :  { %11308 = vmatprep.subr.bf16.mxu1 %v11307_v20 }
0x16f6   :  { %10801 = vmatmul.mubr.msk.f32.gmra.mrb[70].mxu0 %vm51_vm0, %v12545_v62 }
0x16f7   :  { %10787 = vmatmul.mubr.msk.f32.gmra.mrb[86].mxu1 %vm51_vm0, %v12545_v62  ;;  %10819 = vmatprep.mubr.msk.f32.mxu0 %vm11681_vm1, %v11680_v17 }
0x16f8   :  { %11310 = vmatpush3.bf16.msra.mxu1 %v11307_v20  ;;  %10811 = vmatprep.mubr.msk.f32.mxu1 %vm51_vm0, %v12529_v57 }
0x16f9   :  { %10827 = vmatprep.subr.mxu1 %v11680_v17 }
0x16fb   :  { %10812 = vmatmul.mubr.msk.f32.vlgmr.msra.gmra.mrb[88].mxu1 %vm51_vm0, %v12531_v43 }
0x16fc   :  { %10814 = vmatprep.mubr.msk.f32.mxu1 %vm51_vm0, %v12543_v61 }
0x16ff   :  { %10815 = vmatmul.mubr.msk.f32.gmra.mrb[90].mxu1 %vm51_vm0, %v12545_v62 }
0x1700   :  { %10829 = vmatprep.mubr.msk.f32.mxu1 %vm11681_vm1, %v11680_v17 }
0x17b9   :  { %v12699_v21 = vpop.f32.mrb[64].mxu0 }
0x17ba   :  { %v12701_v22 = vpop.f32.mrb[80].mxu1  ;;  %v10764_v23 = vpop.f32.mrb[65].mxu0 }
0x17bb   :  { %v10759_v24 = vpop.f32.mrb[81].mxu1 }
0x17bd   :  { %v12703_v4 = vpop.f32.mrb[66].mxu0 }
0x17be   :  { %v12705_v3 = vpop.f32.mrb[82].mxu1  ;;  %v10774_v25 = vpop.f32.mrb[67].mxu0 }
0x17bf   :  { %v10769_v11 = vpop.f32.mrb[83].mxu1 }
0x17c5   :  { %v10799_v10 = vpop.f32.mrb[68].mxu0 }
0x17c6   :  { %v10785_v26 = vpop.f32.mrb[84].mxu1  ;;  %v5836_v27 = vpop.f32.mrb[69].mxu0  ;;  %v5842_v5 = vadd.f32 %v10799_v10, %v9688_v13 }
0x17c7   :  { %v5837_v29 = vadd.f32 %v9688_v13, %v5836_v27  ;;  %v5738_v32 = vpop.f32.mrb[85].mxu1  ;;  %v5744_v41 = vadd.f32 %v10785_v26, %v9678_v28 }
0x17c8   :  { %v5739_v34 = vadd.f32 %v9678_v28, %v5738_v32 }
0x17c9   :  { %v10802_v33 = vpop.f32.mrb[70].mxu0  ;;  %10818 = vmatpush3.xpose.msk.msra.mxu0 %vm425_vm2, %v5837_v29 }
0x17ca   :  { %v10788_v6 = vpop.f32.mrb[86].mxu1  ;;  %v5846_v36 = vpop.f32.mrb[71].mxu0  ;;  %10822 = vmatprep.subr.mxu0 %v11680_v17  ;;  %v5852_v40 = vadd.f32 %v10802_v33, %v9688_v13 }
0x17cb   :  { %v5847_v37 = vadd.f32 %v9688_v13, %v5846_v36  ;;  %v5748_v7 = vpop.f32.mrb[87].mxu1  ;;  %v5754_v44 = vadd.f32 %v10788_v6, %v9678_v28 }
0x17cc   :  { %10820 = vmatmul.mubr.msk.f32.vlgmr.msra.gmra.mrb[72].mxu0 %vm425_vm2, %v5739_v34  ;;  %v5749_v49 = vadd.f32 %v9678_v28, %v5748_v7 }
0x17cd   :  { %10823 = vmatpush3.xpose.msk.msra.mxu0 %vm425_vm2, %v5842_v5  ;;  %10828 = vmatpush3.xpose.msk.msra.mxu1 %vm425_vm2, %v5847_v37 }
0x17ce   :  { %v10813_v55 = vpop.f32.mrb[88].mxu1  ;;  %10824 = vmatprep.mubr.msk.f32.mxu0 %vm11681_vm1, %v11680_v17  ;;  %10832 = vmatprep.subr.mxu0 %v11680_v17 }
0x17cf   :  { %v5934_v50 = vpop.f32.mrb[89].mxu1  ;;  %10837 = vmatprep.subr.mxu1 %v11680_v17  ;;  %v5940_v63 = vadd.f32 %v10813_v55, %v9698_v8 }
0x17d0   :  { %v5935_v47 = vadd.f32 %v9698_v8, %v5934_v50  ;;  %10825 = vmatmul.mubr.msk.f32.vlgmr.msra.gmra.mrb[74].mxu0 %vm425_vm2, %v5744_v41  ;;  %10830 = vmatmul.mubr.msk.f32.vlgmr.msra.gmra.mrb[92].mxu1 %vm425_vm2, %v5749_v49 }
0x17d1   :  { %10833 = vmatpush3.xpose.msk.msra.mxu0 %vm425_vm2, %v5852_v40  ;;  %10834 = vmatprep.mubr.msk.f32.mxu0 %vm11681_vm1, %v11680_v17 }
0x17d2   :  { %v10816_v45 = vpop.f32.mrb[90].mxu1  ;;  %10838 = vmatpush3.msra.mxu1 %v5935_v47  ;;  %10842 = vmatprep.subr.mxu0 %v11680_v17 }
0x17d3   :  { %v12731_v0 = vadd.f32 %v10816_v45, %v9698_v8  ;;  %v5944_v1 = vpop.f32.mrb[91].mxu1  ;;  %10839 = vmatprep.mubr.msk.f32.mxu1 %vm11681_vm1, %v11680_v17  ;;  %10847 = vmatprep.subr.mxu1 %v11680_v17 }
0x17d4   :  { %v12736_v42 = vadd.f32 %v9698_v8, %v5944_v1  ;;  %10835 = vmatmul.mubr.msk.f32.vlgmr.msra.gmra.mrb[76].mxu0 %vm425_vm2, %v5754_v44 }
0x17d5   :  { %10843 = vmatpush3.msra.mxu0 %v5940_v63  ;;  %10844 = vmatprep.mubr.msk.f32.mxu0 %vm11681_vm1, %v11680_v17 }
0x17d6   :  { %10852 = vmatprep.subr.mxu0 %v11680_v17 }
0x189f   :  { %v6025_v2 = vpop.f32.mrb[72].mxu0 }
0x18a0   :  { %v6257_v9 = vmul.f32 0.35355338, %v6025_v2  ;;  %v10821_v35 = vpop.f32.mrb[73].mxu0 }
0x18a2   :  { %v6261_v12 = vadd.f32 %v6257_v9, %v11911_v48 }
0x18a3   :  { %v6101_v14 = vpop.f32.mrb[74].mxu0  ;;  %v6177_v54 = vpop.f32.mrb[92].mxu1 }
0x18a4   :  { %v6258_v15 = vmul.f32 0.35355338, %v6101_v14  ;;  %v6259_v18 = vmul.f32 0.35355338, %v6177_v54  ;;  %v10826_v19 = vpop.f32.mrb[75].mxu0  ;;  %v10831_v20 = vpop.f32.mrb[93].mxu1 }
0x18a5   :  { %v6265_v23 = vsel %vm425_vm2, %v6261_v12, -inf  ;;  %v9744_v20 = vld [vmem:[%s13215_s2 + $0x2c0] sm:$0xff] }
0x18a6   :  { %6266 = vmax.xlane.f32.xlu0 %v6265_v23  ;;  %v6263_v24 = vadd.f32 %v6259_v18, %v11911_v48  ;;  %v6262_v25 = vadd.f32 %v6258_v15, %v11911_v48  ;;  %v9672_v18 = vld [vmem:[%s13217_s4 + $0x20] sm:$0xff]  ;;  %v9745_v23 = vld [vmem:[%s13215_s2 + $0x2c8] sm:$0xff] }
0x18a7   :  { %v6253_v11 = vpop.f32.mrb[76].mxu0 }
0x18a8   :  { %v6260_v13 = vmul.f32 0.35355338, %v6253_v11  ;;  %v10836_v10 = vpop.f32.mrb[77].mxu0  ;;  %v6271_v26 = vsel %vm425_vm2, %v6263_v24, -inf  ;;  %v6268_v27 = vsel %vm425_vm2, %v6262_v25, -inf }
0x18a9   :  { %6269 = vmax.xlane.f32.xlu1 %v6268_v27  ;;  %v9746_v10 = vld [vmem:[%s13215_s2 + $0x2d0] sm:$0xff] }
0x18aa   :  { %6272 = vmax.xlane.f32.xlu0 %v6271_v26  ;;  %v6264_v28 = vadd.f32 %v6260_v13, %v11911_v48  ;;  %v11327_v13 = vpack.c.bf16 %v9745_v23, %v9744_v20  ;;  %v9747_v26 = vld [vmem:[%s13215_s2 + $0x2d8] sm:$0xff] }
0x18ac   :  { %v6274_v29 = vsel %vm425_vm2, %v6264_v28, -inf }
0x18ad   :  { %6275 = vmax.xlane.f32.xlu1 %v6274_v29  ;;  %v9727_v29 = vld [vmem:[%s13215_s2 + $0x1d8] sm:$0xff] }
0x1933   :  { %v6267_v32 = vpop.xlane.xlu0 %6266 }
0x1934   :  { %v6277_v33 = vsub.f32 %v6261_v12, %v6267_v32 }
0x1936   :  { %v6281_v34 = vmul.f32 1.442695, %v6277_v33  ;;  %v6270_v6 = vpop.xlane.xlu1 %6269 }
0x1937   :  { %v6273_v36 = vpop.xlane.xlu0 %6272  ;;  %v6278_v5 = vsub.f32 %v6262_v25, %v6270_v6 }
0x1938   :  { %11561 = vpow2.f32 %v6281_v34  ;;  %v6279_v37 = vsub.f32 %v6263_v24, %v6273_v36  ;;  %v9734_v36 = vld [vmem:[%s13215_s2 + $0x240] sm:$0xff] }
0x1939   :  { %v6283_v7 = vmul.f32 1.442695, %v6278_v5  ;;  %v9735_v5 = vld [vmem:[%s13215_s2 + $0x248] sm:$0xff] }
0x193a   :  { %v6285_v8 = vmul.f32 1.442695, %v6279_v37  ;;  %v6276_v41 = vpop.xlane.xlu1 %6275 }
0x193b   :  { %11563 = vpow2.f32 %v6283_v7  ;;  %v6280_v49 = vsub.f32 %v6264_v28, %v6276_v41  ;;  %v11331_v28 = vpack.c.bf16 %v9747_v26, %v9746_v10  ;;  %v11319_v41 = vpack.c.bf16 %v9735_v5, %v9734_v36 }
0x193c   :  { %11565 = vpow2.f32 %v6285_v8 }
0x193d   :  { %v6287_v55 = vmul.f32 1.442695, %v6280_v49 }
0x193f   :  { %11567 = vpow2.f32 %v6287_v55  ;;  %v9736_v55 = vld [vmem:[%s13215_s2 + $0x250] sm:$0xff] }
0x1942   :  { %v11562_v40 = vpop.eup %11561 }
0x1943   :  { %v6289_v50 = vsel %vm425_vm2, %v11562_v40, 0.0 }
0x1944   :  { %6290 = vadd.xlane.f32.xlu0 %v6289_v50 }
0x1945   :  { %v11564_v47 = vpop.eup %11563 }
0x1946   :  { %v11566_v44 = vpop.eup %11565  ;;  %v6292_v45 = vsel %vm425_vm2, %v11564_v47, 0.0 }
0x1947   :  { %v6295_v63 = vsel %vm425_vm2, %v11566_v44, 0.0  ;;  %6293 = vadd.xlane.f32.xlu1 %v6292_v45 }
0x1948   :  { %6296 = vadd.xlane.f32.xlu0 %v6295_v63  ;;  %v9749_v63 = vld [vmem:[%s13216_s3 + $0x16] ss:$0 sm:$0xff] }
0x1949   :  { %v11568_v1 = vpop.eup %11567 }
0x194a   :  { %v6298_v2 = vsel %vm425_vm2, %v11568_v1, 0.0 }
0x194b   :  { %6299 = vadd.xlane.f32.xlu1 %v6298_v2 }
0x19d1   :  { %v6291_v9 = vpop.xlane.xlu0 %6290 }
0x19d2   :  { %11569 = vrcp.f32 %v6291_v9 }
0x19d4   :  { %v6294_v35 = vpop.xlane.xlu1 %6293 }
0x19d5   :  { %v6297_v12 = vpop.xlane.xlu0 %6296  ;;  %11571 = vrcp.f32 %v6294_v35 }
0x19d6   :  { %11573 = vrcp.f32 %v6297_v12 }
0x19d8   :  { %v6300_v14 = vpop.xlane.xlu1 %6299 }
0x19d9   :  { %11575 = vrcp.f32 %v6300_v14 }
0x19dc   :  { %v11570_v54 = vpop.eup %11569 }
0x19dd   :  { %v6302_v15 = vmul.f32 %v11570_v54, %v11562_v40  ;;  %v9737_v40 = vld [vmem:[%s13215_s2 + $0x258] sm:$0xff] }
0x19df   :  { %v11572_v19 = vpop.eup %11571  ;;  %10840 = vmatmul.mubr.msk.f32.vlgmr.msra.gmra.mrb[94].mxu1 %vm425_vm2, %v6302_v15 }
0x19e0   :  { %v11574_v24 = vpop.eup %11573  ;;  %v6304_v25 = vmul.f32 %v11572_v19, %v11564_v47  ;;  %10848 = vmatpush3.msra.mxu1 %v12736_v42  ;;  %10849 = vmatprep.mubr.msk.f32.mxu1 %vm11681_vm1, %v11680_v17  ;;  %v11323_v47 = vpack.c.bf16 %v9737_v40, %v9736_v55 }
0x19e1   :  { %v6306_v11 = vmul.f32 %v11574_v24, %v11566_v44  ;;  %10865 = vmatprep.subr.mxu1 %v9672_v18  ;;  %v9739_v24 = vld [vmem:[%s13216_s3 + $0x12] ss:$0 sm:$0xff] }
0x19e2   :  { %10845 = vmatmul.mubr.msk.f32.vlgmr.msra.gmra.mrb[78].mxu0 %vm425_vm2, %v6304_v25 }
0x19e3   :  { %v11576_v27 = vpop.eup %11575  ;;  %10850 = vmatmul.mubr.msk.f32.vlgmr.msra.gmra.mrb[96].mxu1 %vm425_vm2, %v6306_v11  ;;  %10853 = vmatpush3.msra.mxu0 %v12731_v0  ;;  %v9726_v0 = vld [vmem:[%s13215_s2 + $0x1d0] sm:$0xff]  ;;  %v9729_v11 = vld [vmem:[%s13216_s3 + $0xe] ss:$0 sm:$0xff] }
0x19e4   :  { %v6308_v42 = vmul.f32 %v11576_v27, %v11568_v1  ;;  %10867 = vmatprep.mubr.msk.f32.mxu1 %vm425_vm2, %v12701_v22  ;;  %10854 = vmatprep.mubr.msk.f32.mxu0 %vm11681_vm1, %v11680_v17  ;;  %v9724_v22 = vld [vmem:[%s13215_s2 + $0x1c0] sm:$0xff]  ;;  %v11315_v34 = vpack.c.bf16 %v9727_v29, %v9726_v0 }
0x19e5   :  { %10866 = vmatpush3.msra.mxu1 %v9672_v18 }
0x19e6   :  { %10855 = vmatmul.mubr.msk.f32.vlgmr.msra.gmra.mrb[80].mxu0 %vm425_vm2, %v6308_v42  ;;  %11328 = vmatprep.subr.bf16.mxu1 %v11327_v13 }
0x19e7   :  { %10868 = vmatmul.mubr.msk.f32.vlgmr.msra.gmra.mrb[98].mxu1 %vm425_vm2, %v12699_v21  ;;  %v9715_v21 = vld [vmem:[%s13217_s4 + $0x28] sm:$0xff] }
0x19e8   :  { %10870 = vmatprep.mubr.msk.f32.mxu1 %vm425_vm2, %v12705_v3  ;;  %11330 = vmatpush3.bf16.msra.mxu1 %v11327_v13 }
0x19e9   :  { %11332 = vmatprep.subr.bf16.mxu1 %v11331_v28  ;;  %10857 = vmatprep.subr.mxu0 %v9715_v21 }
0x19ea   :  { %10858 = vmatpush3.msra.mxu0 %v9715_v21 }
0x19eb   :  { %10871 = vmatmul.mubr.msk.f32.gmra.mrb[100].mxu1 %vm425_vm2, %v12703_v4  ;;  %v9725_v4 = vld [vmem:[%s13215_s2 + $0x1c8] sm:$0xff] }
0x19ec   :  { %11334 = vmatpush3.bf16.msra.mxu1 %v11331_v28  ;;  %10909 = vmatprep.mubr.msk.f32.mxu1 %vm51_vm0, %v12529_v57  ;;  %v11311_v3 = vpack.c.bf16 %v9725_v4, %v9724_v22 }
0x19ed   :  { %10920 = vmatprep.subr.mxu1 %v11680_v17 }
0x19ee   :  { %11312 = vmatprep.subr.bf16.mxu0 %v11311_v3 }
0x19ef   :  { %10910 = vmatmul.mubr.msk.f32.vlgmr.msra.gmra.mrb[102].mxu1 %vm51_vm0, %v12531_v43 }
0x19f0   :  { %10912 = vmatprep.mubr.msk.f32.mxu1 %vm51_vm0, %v12543_v61 }
0x19f3   :  { %10913 = vmatmul.mubr.msk.f32.gmra.mrb[104].mxu1 %vm51_vm0, %v12545_v62 }
0x19f4   :  { %10922 = vmatprep.mubr.msk.f32.mxu1 %vm11681_vm1, %v11680_v17 }
0x1ab2   :  { %v6378_v32 = vpop.f32.mrb[94].mxu1 }
0x1ab3   :  { %v10841_v33 = vpop.f32.mrb[95].mxu1  ;;  %10859 = vmatprep.mubr.msk.f32.mxu0 %vm425_vm2, %v6378_v32 }
0x1ab5   :  { %v6451_v6 = vpop.f32.mrb[78].mxu0 }
0x1ab6   :  { %v6524_v37 = vpop.f32.mrb[96].mxu1  ;;  %v10846_v7 = vpop.f32.mrb[79].mxu0  ;;  %10860 = vmatmul.mubr.msk.f32.vlgmr.msra.gmra.mrb[82].mxu0 %vm425_vm2, %v6451_v6 }
0x1ab7   :  { %v10851_v8 = vpop.f32.mrb[97].mxu1  ;;  %10862 = vmatprep.mubr.msk.f32.mxu0 %vm425_vm2, %v6524_v37  ;;  %11314 = vmatpush3.bf16.msra.mxu0 %v11311_v3 }
0x1ab8   :  { %11316 = vmatprep.subr.bf16.mxu0 %v11315_v34 }
0x1ab9   :  { %v6597_v49 = vpop.f32.mrb[80].mxu0 }
0x1aba   :  { %v10856_v50 = vpop.f32.mrb[81].mxu0  ;;  %10863 = vmatmul.mubr.msk.f32.gmra.mrb[84].mxu0 %vm425_vm2, %v6597_v49 }
0x1abb   :  { %11318 = vmatpush3.bf16.msra.mxu0 %v11315_v34  ;;  %10881 = vmatprep.mubr.msk.f32.mxu0 %vm51_vm0, %v12529_v57 }
0x1abc   :  { %11320 = vmatprep.subr.bf16.mxu0 %v11319_v41 }
0x1abe   :  { %10882 = vmatmul.mubr.msk.f32.vlgmr.msra.gmra.mrb[86].mxu0 %vm51_vm0, %v12531_v43 }
0x1abf   :  { %10884 = vmatprep.mubr.msk.f32.mxu0 %vm51_vm0, %v12543_v61  ;;  %11322 = vmatpush3.bf16.msra.mxu0 %v11319_v41 }
0x1ac0   :  { %11324 = vmatprep.subr.bf16.mxu0 %v11323_v47 }
0x1ac2   :  { %v10911_v44 = vpop.f32.mrb[102].mxu1  ;;  %10885 = vmatmul.mubr.msk.f32.gmra.mrb[88].mxu0 %vm51_vm0, %v12545_v62 }
0x1ac3   :  { %v7072_v45 = vpop.f32.mrb[103].mxu1  ;;  %11326 = vmatpush3.bf16.msra.mxu0 %v11323_v47  ;;  %10895 = vmatprep.mubr.msk.f32.mxu0 %vm51_vm0, %v12529_v57  ;;  %v7078_v0 = vadd.f32 %v10911_v44, %v9749_v63 }
0x1ac4   :  { %10915 = vmatprep.subr.mxu0 %v11680_v17  ;;  %v7073_v32 = vadd.f32 %v9749_v63, %v7072_v45 }
0x1ac6   :  { %v10914_v1 = vpop.f32.mrb[104].mxu1  ;;  %10896 = vmatmul.mubr.msk.f32.vlgmr.msra.gmra.mrb[90].mxu0 %vm51_vm0, %v12531_v43 }
0x1ac7   :  { %v12845_v2 = vadd.f32 %v10914_v1, %v9749_v63  ;;  %v7082_v9 = vpop.f32.mrb[105].mxu1  ;;  %10898 = vmatprep.mubr.msk.f32.mxu0 %vm51_vm0, %v12543_v61 }
0x1ac8   :  { %v12849_v35 = vadd.f32 %v9749_v63, %v7082_v9 }
0x1aca   :  { %10899 = vmatmul.mubr.msk.f32.gmra.mrb[92].mxu0 %vm51_vm0, %v12545_v62 }
0x1acb   :  { %10917 = vmatprep.mubr.msk.f32.mxu0 %vm11681_vm1, %v11680_v17 }
0x1b89   :  { %v12855_v12 = vpop.f32.mrb[82].mxu0 }
0x1b8a   :  { %v12857_v14 = vpop.f32.mrb[83].mxu0 }
0x1b8d   :  { %v12859_v54 = vpop.f32.mrb[84].mxu0 }
0x1b8e   :  { %v12861_v15 = vpop.f32.mrb[85].mxu0 }
0x1b91   :  { %v10883_v18 = vpop.f32.mrb[86].mxu0 }
0x1b92   :  { %v6876_v19 = vpop.f32.mrb[87].mxu0  ;;  %v6882_v27 = vadd.f32 %v10883_v18, %v9729_v11 }
0x1b93   :  { %v6877_v28 = vadd.f32 %v9729_v11, %v6876_v19 }
0x1b95   :  { %v10886_v20 = vpop.f32.mrb[88].mxu0 }
0x1b96   :  { %v6886_v23 = vpop.f32.mrb[89].mxu0  ;;  %v6892_v3 = vadd.f32 %v10886_v20, %v9729_v11 }
0x1b97   :  { %v6887_v29 = vadd.f32 %v9729_v11, %v6886_v23 }
0x1b99   :  { %v10897_v25 = vpop.f32.mrb[90].mxu0 }
0x1b9a   :  { %v6980_v13 = vadd.f32 %v10897_v25, %v9739_v24  ;;  %v6974_v10 = vpop.f32.mrb[91].mxu0 }
0x1b9b   :  { %v6975_v26 = vadd.f32 %v9739_v24, %v6974_v10 }
0x1b9c   :  { %10921 = vmatpush3.xpose.msk.msra.mxu1 %vm425_vm2, %v6980_v13 }
0x1b9d   :  { %v10900_v42 = vpop.f32.mrb[92].mxu0  ;;  %10916 = vmatpush3.xpose.msk.msra.mxu0 %vm425_vm2, %v6975_v26  ;;  %10930 = vmatprep.subr.mxu1 %v11680_v17 }
0x1b9e   :  { %v6990_v21 = vadd.f32 %v10900_v42, %v9739_v24  ;;  %v6984_v22 = vpop.f32.mrb[93].mxu0  ;;  %10925 = vmatprep.subr.mxu0 %v11680_v17 }
0x1b9f   :  { %v6985_v4 = vadd.f32 %v9739_v24, %v6984_v22  ;;  %10923 = vmatmul.mubr.msk.f32.vlgmr.msra.gmra.mrb[106].mxu1 %vm425_vm2, %v6882_v27 }
0x1ba0   :  { %10918 = vmatmul.mubr.msk.f32.vlgmr.msra.gmra.mrb[94].mxu0 %vm425_vm2, %v6877_v28  ;;  %10931 = vmatpush3.xpose.msk.msra.mxu1 %vm425_vm2, %v6990_v21 }
0x1ba1   :  { %10926 = vmatpush3.xpose.msk.msra.mxu0 %vm425_vm2, %v6985_v4  ;;  %10932 = vmatprep.mubr.msk.f32.mxu1 %vm11681_vm1, %v11680_v17 }
0x1ba2   :  { %10927 = vmatprep.mubr.msk.f32.mxu0 %vm11681_vm1, %v11680_v17  ;;  %10940 = vmatprep.subr.mxu1 %v11680_v17 }
0x1ba3   :  { %10933 = vmatmul.mubr.msk.f32.vlgmr.msra.gmra.mrb[108].mxu1 %vm425_vm2, %v6892_v3  ;;  %10935 = vmatprep.subr.mxu0 %v11680_v17 }
0x1ba4   :  { %10928 = vmatmul.mubr.msk.f32.vlgmr.msra.gmra.mrb[96].mxu0 %vm425_vm2, %v6887_v29  ;;  %10941 = vmatpush3.msra.mxu1 %v7078_v0 }
0x1ba5   :  { %10936 = vmatpush3.msra.mxu0 %v7073_v32  ;;  %10942 = vmatprep.mubr.msk.f32.mxu1 %vm11681_vm1, %v11680_v17 }
0x1ba6   :  { %10950 = vmatprep.subr.mxu1 %v11680_v17  ;;  %10937 = vmatprep.mubr.msk.f32.mxu0 %vm11681_vm1, %v11680_v17 }
0x1ba7   :  { %10945 = vmatprep.subr.mxu0 %v11680_v17 }
0x1c72   :  { %v7239_v33 = vpop.f32.mrb[106].mxu1 }
0x1c73   :  { %v7396_v34 = vmul.f32 0.35355338, %v7239_v33  ;;  %v7163_v6 = vpop.f32.mrb[94].mxu0  ;;  %v10924_v36 = vpop.f32.mrb[107].mxu1 }
0x1c74   :  { %v7395_v5 = vmul.f32 0.35355338, %v7163_v6  ;;  %v10919_v37 = vpop.f32.mrb[95].mxu0 }
0x1c75   :  { %v7400_v7 = vadd.f32 %v7396_v34, %v11911_v48  ;;  %v9771_v37 = vld [vmem:[%s13215_s2 + $0x1e0] sm:$0xff] }
0x1c76   :  { %v7391_v8 = vpop.f32.mrb[108].mxu1  ;;  %v7399_v41 = vadd.f32 %v7395_v5, %v11911_v48 }
0x1c77   :  { %v7398_v49 = vmul.f32 0.35355338, %v7391_v8  ;;  %v7315_v55 = vpop.f32.mrb[96].mxu0  ;;  %v10934_v40 = vpop.f32.mrb[109].mxu1  ;;  %v7406_v50 = vsel %vm425_vm2, %v7400_v7, -inf }
0x1c78   :  { %v7397_v47 = vmul.f32 0.35355338, %v7315_v55  ;;  %7407 = vmax.xlane.f32.xlu1 %v7406_v50  ;;  %v10929_v44 = vpop.f32.mrb[97].mxu0  ;;  %v7403_v45 = vsel %vm425_vm2, %v7399_v41, -inf  ;;  %v9773_v50 = vld [vmem:[%s13215_s2 + $0x1f0] sm:$0xff] }
0x1c79   :  { %7404 = vmax.xlane.f32.xlu0 %v7403_v45  ;;  %v7402_v63 = vadd.f32 %v7398_v49, %v11911_v48 }
0x1c7a   :  { %v7401_v1 = vadd.f32 %v7397_v47, %v11911_v48  ;;  %v9774_v47 = vld [vmem:[%s13215_s2 + $0x1f8] sm:$0xff] }
0x1c7b   :  { %v7412_v9 = vsel %vm425_vm2, %v7402_v63, -inf }
0x1c7c   :  { %7413 = vmax.xlane.f32.xlu1 %v7412_v9  ;;  %v7409_v18 = vsel %vm425_vm2, %v7401_v1, -inf  ;;  %v11339_v9 = vpack.c.bf16 %v9774_v47, %v9773_v50 }
0x1c7d   :  { %7410 = vmax.xlane.f32.xlu0 %v7409_v18  ;;  %v9792_v18 = vld [vmem:[%s13215_s2 + $0x2e8] sm:$0xff] }
0x1d05   :  { %v7408_v19 = vpop.xlane.xlu1 %7407 }
0x1d06   :  { %v7416_v20 = vsub.f32 %v7400_v7, %v7408_v19  ;;  %v7405_v23 = vpop.xlane.xlu0 %7404  ;;  %v9772_v7 = vld [vmem:[%s13215_s2 + $0x1e8] sm:$0xff]  ;;  %v9793_v19 = vld [vmem:[%s13215_s2 + $0x2f0] sm:$0xff] }
0x1d07   :  { %v7415_v24 = vsub.f32 %v7399_v41, %v7405_v23  ;;  %v11335_v40 = vpack.c.bf16 %v9772_v7, %v9771_v37 }
0x1d08   :  { %v7421_v25 = vmul.f32 1.442695, %v7416_v20  ;;  %v9794_v20 = vld [vmem:[%s13215_s2 + $0x2f8] sm:$0xff] }
0x1d09   :  { %v7419_v11 = vmul.f32 1.442695, %v7415_v24  ;;  %v7414_v13 = vpop.xlane.xlu1 %7413  ;;  %v11355_v23 = vpack.c.bf16 %v9794_v20, %v9793_v19  ;;  %v9766_v24 = vld [vmem:[%s13217_s4 + $0x30] sm:$0xff] }
0x1d0a   :  { %11577 = vpow2.f32 %v7421_v25  ;;  %v7418_v10 = vsub.f32 %v7402_v63, %v7414_v13  ;;  %v7411_v26 = vpop.xlane.xlu0 %7410  ;;  %v9781_v25 = vld [vmem:[%s13215_s2 + $0x260] sm:$0xff] }
0x1d0b   :  { %11579 = vpow2.f32 %v7419_v11  ;;  %v7417_v27 = vsub.f32 %v7401_v1, %v7411_v26  ;;  %v9782_v11 = vld [vmem:[%s13215_s2 + $0x268] sm:$0xff]  ;;  %v9784_v26 = vld [vmem:[%s13215_s2 + $0x278] sm:$0xff] }
0x1d0c   :  { %v7425_v42 = vmul.f32 1.442695, %v7418_v10  ;;  %v11343_v13 = vpack.c.bf16 %v9782_v11, %v9781_v25  ;;  %v9783_v10 = vld [vmem:[%s13215_s2 + $0x270] sm:$0xff] }
0x1d0d   :  { %v7423_v28 = vmul.f32 1.442695, %v7417_v27 }
0x1d0e   :  { %11581 = vpow2.f32 %v7425_v42 }
0x1d0f   :  { %11583 = vpow2.f32 %v7423_v28 }
0x1d14   :  { %v11578_v21 = vpop.eup %11577 }
0x1d15   :  { %v11580_v22 = vpop.eup %11579  ;;  %v7430_v4 = vsel %vm425_vm2, %v11578_v21, 0.0 }
0x1d16   :  { %7431 = vadd.xlane.f32.xlu1 %v7430_v4  ;;  %v7427_v3 = vsel %vm425_vm2, %v11580_v22, 0.0 }
0x1d17   :  { %7428 = vadd.xlane.f32.xlu0 %v7427_v3 }
0x1d18   :  { %v11582_v0 = vpop.eup %11581 }
0x1d19   :  { %v11584_v29 = vpop.eup %11583  ;;  %v7436_v32 = vsel %vm425_vm2, %v11582_v0, 0.0 }
0x1d1a   :  { %7437 = vadd.xlane.f32.xlu1 %v7436_v32  ;;  %v7433_v33 = vsel %vm425_vm2, %v11584_v29, 0.0 }
0x1d1b   :  { %7434 = vadd.xlane.f32.xlu0 %v7433_v33 }
0x1da3   :  { %v7432_v34 = vpop.xlane.xlu1 %7431 }
0x1da4   :  { %11585 = vrcp.f32 %v7432_v34  ;;  %v7429_v6 = vpop.xlane.xlu0 %7428 }
0x1da5   :  { %11587 = vrcp.f32 %v7429_v6 }
0x1da7   :  { %v7438_v36 = vpop.xlane.xlu1 %7437 }
0x1da8   :  { %11589 = vrcp.f32 %v7438_v36  ;;  %v7435_v5 = vpop.xlane.xlu0 %7434 }
0x1da9   :  { %11591 = vrcp.f32 %v7435_v5  ;;  %v9796_v5 = vld [vmem:[%s13216_s3 + $0x17] ss:$0 sm:$0xff] }
0x1dae   :  { %v11586_v8 = vpop.eup %11585 }
0x1daf   :  { %v11588_v41 = vpop.eup %11587  ;;  %v7442_v49 = vmul.f32 %v11586_v8, %v11578_v21  ;;  %v11347_v21 = vpack.c.bf16 %v9784_v26, %v9783_v10 }
0x1db0   :  { %v7440_v55 = vmul.f32 %v11588_v41, %v11580_v22  ;;  %v9776_v41 = vld [vmem:[%s13216_s3 + $0xf] ss:$0 sm:$0xff] }
0x1db1   :  { %10943 = vmatmul.mubr.msk.f32.vlgmr.msra.gmra.mrb[110].mxu1 %vm425_vm2, %v7442_v49 }
0x1db2   :  { %v11590_v44 = vpop.eup %11589  ;;  %10951 = vmatpush3.msra.mxu1 %v12845_v2  ;;  %10938 = vmatmul.mubr.msk.f32.vlgmr.msra.gmra.mrb[98].mxu0 %vm425_vm2, %v7440_v55  ;;  %v9791_v2 = vld [vmem:[%s13215_s2 + $0x2e0] sm:$0xff]  ;;  %s9231_s2 = sadd.s32 16, %s9849_s21 }
0x1db3   :  { %v11592_v45 = vpop.eup %11591  ;;  %v7446_v63 = vmul.f32 %v11590_v44, %v11582_v0  ;;  %10946 = vmatpush3.msra.mxu0 %v12849_v35  ;;  %10952 = vmatprep.mubr.msk.f32.mxu1 %vm11681_vm1, %v11680_v17  ;;  %v11351_v35 = vpack.c.bf16 %v9792_v18, %v9791_v2 }
0x1db4   :  { %v7444_v1 = vmul.f32 %v11592_v45, %v11584_v29  ;;  %10947 = vmatprep.mubr.msk.f32.mxu0 %vm11681_vm1, %v11680_v17  ;;  %11336 = vmatprep.subr.bf16.mxu0 %v11335_v40 }
0x1db5   :  { %10953 = vmatmul.mubr.msk.f32.vlgmr.msra.gmra.mrb[112].mxu1 %vm425_vm2, %v7446_v63  ;;  %10955 = vmatprep.subr.mxu1 %v9766_v24 }
0x1db6   :  { %10948 = vmatmul.mubr.msk.f32.vlgmr.msra.gmra.mrb[100].mxu0 %vm425_vm2, %v7444_v1  ;;  %10956 = vmatpush3.msra.mxu1 %v9766_v24 }
0x1db7   :  { %11338 = vmatpush3.bf16.msra.mxu0 %v11335_v40  ;;  %10971 = vmatprep.mubr.msk.f32.mxu0 %vm51_vm0, %v12529_v57 }
0x1db8   :  { %11340 = vmatprep.subr.bf16.mxu0 %v11339_v9  ;;  %11344 = vmatprep.subr.bf16.mxu1 %v11343_v13 }
0x1dbb   :  { %11342 = vmatpush3.bf16.msra.mxu0 %v11339_v9 }
0x1dbc   :  { %11352 = vmatprep.subr.bf16.mxu0 %v11351_v35 }
0x1dbe   :  { %10972 = vmatmul.mubr.msk.f32.vlgmr.msra.gmra.mrb[102].mxu0 %vm51_vm0, %v12531_v43 }
0x1dbf   :  { %10974 = vmatprep.mubr.msk.f32.mxu0 %vm51_vm0, %v12543_v61  ;;  %11354 = vmatpush3.bf16.msra.mxu0 %v11351_v35 }
0x1dc0   :  { %11356 = vmatprep.subr.bf16.mxu0 %v11355_v23 }
0x1dc2   :  { %10975 = vmatmul.mubr.msk.f32.gmra.mrb[104].mxu0 %vm51_vm0, %v12545_v62 }
0x1dc3   :  { %11358 = vmatpush3.bf16.msra.mxu0 %v11355_v23  ;;  %10999 = vmatprep.mubr.msk.f32.mxu0 %vm51_vm0, %v12529_v57 }
0x1dc4   :  { %11010 = vmatprep.subr.mxu0 %v11680_v17 }
0x1dc6   :  { %11000 = vmatmul.mubr.msk.f32.vlgmr.msra.gmra.mrb[106].mxu0 %vm51_vm0, %v12531_v43 }
0x1dc7   :  { %11002 = vmatprep.mubr.msk.f32.mxu0 %vm51_vm0, %v12543_v61 }
0x1dca   :  { %11003 = vmatmul.mubr.msk.f32.gmra.mrb[108].mxu0 %vm51_vm0, %v12545_v62 }
0x1dcb   :  { %11012 = vmatprep.mubr.msk.f32.mxu0 %vm11681_vm1, %v11680_v17 }
0x1e84   :  { %v7589_v27 = vpop.f32.mrb[110].mxu1 }
0x1e85   :  { %v7516_v42 = vpop.f32.mrb[98].mxu0  ;;  %v10944_v28 = vpop.f32.mrb[111].mxu1 }
0x1e86   :  { %v10939_v22 = vpop.f32.mrb[99].mxu0  ;;  %10957 = vmatprep.mubr.msk.f32.mxu1 %vm425_vm2, %v7516_v42 }
0x1e87   :  { %10958 = vmatmul.mubr.msk.f32.vlgmr.msra.gmra.mrb[98].mxu1 %vm425_vm2, %v7589_v27 }
0x1e88   :  { %v7735_v4 = vpop.f32.mrb[112].mxu1  ;;  %11346 = vmatpush3.bf16.msra.mxu1 %v11343_v13 }
0x1e89   :  { %v7662_v3 = vpop.f32.mrb[100].mxu0  ;;  %v10954_v0 = vpop.f32.mrb[113].mxu1  ;;  %11348 = vmatprep.subr.bf16.mxu1 %v11347_v21 }
0x1e8a   :  { %v10949_v29 = vpop.f32.mrb[101].mxu0  ;;  %10960 = vmatprep.mubr.msk.f32.mxu1 %vm425_vm2, %v7662_v3 }
0x1e8b   :  { %10961 = vmatmul.mubr.msk.f32.gmra.mrb[100].mxu1 %vm425_vm2, %v7735_v4 }
0x1e8c   :  { %11350 = vmatpush3.bf16.msra.mxu1 %v11347_v21  ;;  %10985 = vmatprep.mubr.msk.f32.mxu1 %vm51_vm0, %v12529_v57 }
0x1e8d   :  { %11005 = vmatprep.subr.mxu1 %v11680_v17 }
0x1e8f   :  { %10986 = vmatmul.mubr.msk.f32.vlgmr.msra.gmra.mrb[114].mxu1 %vm51_vm0, %v12531_v43 }
0x1e90   :  { %10988 = vmatprep.mubr.msk.f32.mxu1 %vm51_vm0, %v12543_v61 }
0x1e91   :  { %v10973_v32 = vpop.f32.mrb[102].mxu0 }
0x1e92   :  { %v7921_v33 = vpop.f32.mrb[103].mxu0  ;;  %v7927_v50 = vadd.f32 %v10973_v32, %v9776_v41 }
0x1e93   :  { %10989 = vmatmul.mubr.msk.f32.gmra.mrb[116].mxu1 %vm51_vm0, %v12545_v62  ;;  %v9786_v62 = vld [vmem:[%s13216_s3 + $0x13] ss:$0 sm:$0xff]  ;;  %v7922_v44 = vadd.f32 %v9776_v41, %v7921_v33 }
0x1e94   :  { %11007 = vmatprep.mubr.msk.f32.mxu1 %vm11681_vm1, %v11680_v17 }
0x1e95   :  { %v10976_v34 = vpop.f32.mrb[104].mxu0 }
0x1e96   :  { %v7931_v6 = vpop.f32.mrb[105].mxu0  ;;  %v7937_v9 = vadd.f32 %v10976_v34, %v9776_v41 }
0x1e97   :  { %v7932_v2 = vadd.f32 %v9776_v41, %v7931_v6 }
0x1e99   :  { %v11001_v36 = vpop.f32.mrb[106].mxu0 }
0x1e9a   :  { %v8117_v57 = vpop.f32.mrb[107].mxu0  ;;  %v8123_v18 = vadd.f32 %v11001_v36, %v9796_v5 }
0x1e9b   :  { %v8118_v35 = vadd.f32 %v9796_v5, %v8117_v57 }
0x1e9d   :  { %v11004_v43 = vpop.f32.mrb[108].mxu0 }
0x1e9e   :  { %v12989_v37 = vadd.f32 %v11004_v43, %v9796_v5  ;;  %v8127_v61 = vpop.f32.mrb[109].mxu0 }
0x1e9f   :  { %v12991_v7 = vadd.f32 %v9796_v5, %v8127_v61 }
0x1f62   :  { %v10987_v8 = vpop.f32.mrb[114].mxu1 }
0x1f63   :  { %v8025_v49 = vadd.f32 %v10987_v8, %v9786_v62  ;;  %v8019_v55 = vpop.f32.mrb[115].mxu1 }
0x1f64   :  { %v8020_v40 = vadd.f32 %v9786_v62, %v8019_v55 }
0x1f65   :  { %11011 = vmatpush3.xpose.msk.msra.mxu0 %vm425_vm2, %v8025_v49 }
0x1f66   :  { %v10990_v47 = vpop.f32.mrb[116].mxu1  ;;  %11006 = vmatpush3.xpose.msk.msra.mxu1 %vm425_vm2, %v8020_v40  ;;  %11020 = vmatprep.subr.mxu0 %v11680_v17 }
0x1f67   :  { %v8035_v45 = vadd.f32 %v10990_v47, %v9786_v62  ;;  %v8029_v63 = vpop.f32.mrb[117].mxu1  ;;  %11015 = vmatprep.subr.mxu1 %v11680_v17 }
0x1f68   :  { %v8030_v1 = vadd.f32 %v9786_v62, %v8029_v63  ;;  %11013 = vmatmul.mubr.msk.f32.vlgmr.msra.gmra.mrb[110].mxu0 %vm425_vm2, %v7927_v50 }
0x1f69   :  { %11008 = vmatmul.mubr.msk.f32.vlgmr.msra.gmra.mrb[118].mxu1 %vm425_vm2, %v7922_v44  ;;  %11021 = vmatpush3.xpose.msk.msra.mxu0 %vm425_vm2, %v8035_v45 }
0x1f6a   :  { %11016 = vmatpush3.xpose.msk.msra.mxu1 %vm425_vm2, %v8030_v1  ;;  %11022 = vmatprep.mubr.msk.f32.mxu0 %vm11681_vm1, %v11680_v17 }
0x1f6b   :  { %11017 = vmatprep.mubr.msk.f32.mxu1 %vm11681_vm1, %v11680_v17  ;;  %11030 = vmatprep.subr.mxu0 %v11680_v17 }
0x1f6c   :  { %11023 = vmatmul.mubr.msk.f32.vlgmr.msra.gmra.mrb[112].mxu0 %vm425_vm2, %v7937_v9  ;;  %11025 = vmatprep.subr.mxu1 %v11680_v17 }
0x1f6d   :  { %11018 = vmatmul.mubr.msk.f32.vlgmr.msra.gmra.mrb[120].mxu1 %vm425_vm2, %v7932_v2  ;;  %11031 = vmatpush3.msra.mxu0 %v8123_v18 }
0x1f6e   :  { %11026 = vmatpush3.msra.mxu1 %v8118_v35  ;;  %11032 = vmatprep.mubr.msk.f32.mxu0 %vm11681_vm1, %v11680_v17 }
0x1f6f   :  { %11040 = vmatprep.subr.mxu0 %v11680_v17  ;;  %11027 = vmatprep.mubr.msk.f32.mxu1 %vm11681_vm1, %v11680_v17 }
0x1f70   :  { %11035 = vmatprep.subr.mxu1 %v11680_v17 }
0x203b   :  { %v8284_v19 = vpop.f32.mrb[110].mxu0 }
0x203c   :  { %v8441_v20 = vmul.f32 0.35355338, %v8284_v19  ;;  %v8208_v23 = vpop.f32.mrb[118].mxu1  ;;  %v11014_v24 = vpop.f32.mrb[111].mxu0 }
0x203d   :  { %v8440_v25 = vmul.f32 0.35355338, %v8208_v23  ;;  %v11009_v11 = vpop.f32.mrb[119].mxu1 }
0x203e   :  { %v8445_v13 = vadd.f32 %v8441_v20, %v11911_v48 }
0x203f   :  { %v8436_v10 = vpop.f32.mrb[112].mxu0  ;;  %v8444_v26 = vadd.f32 %v8440_v25, %v11911_v48 }
0x2040   :  { %v8443_v27 = vmul.f32 0.35355338, %v8436_v10  ;;  %v8360_v42 = vpop.f32.mrb[120].mxu1  ;;  %v11024_v28 = vpop.f32.mrb[113].mxu0  ;;  %v8451_v21 = vsel %vm425_vm2, %v8445_v13, -inf }
0x2041   :  { %v8442_v22 = vmul.f32 0.35355338, %v8360_v42  ;;  %8452 = vmax.xlane.f32.xlu1 %v8451_v21  ;;  %v11019_v4 = vpop.f32.mrb[121].mxu1  ;;  %v8448_v3 = vsel %vm425_vm2, %v8444_v26, -inf }
0x2042   :  { %8449 = vmax.xlane.f32.xlu0 %v8448_v3  ;;  %v8447_v0 = vadd.f32 %v8443_v27, %v11911_v48 }
0x2043   :  { %v8446_v29 = vadd.f32 %v8442_v22, %v11911_v48 }
0x2044   :  { %v8457_v32 = vsel %vm425_vm2, %v8447_v0, -inf }
0x2045   :  { %8458 = vmax.xlane.f32.xlu1 %v8457_v32  ;;  %v8454_v33 = vsel %vm425_vm2, %v8446_v29, -inf }
0x2046   :  { %8455 = vmax.xlane.f32.xlu0 %v8454_v33 }
0x20ce   :  { %v8453_v34 = vpop.xlane.xlu1 %8452 }
0x20cf   :  { %v8461_v6 = vsub.f32 %v8445_v13, %v8453_v34  ;;  %v8450_v36 = vpop.xlane.xlu0 %8449 }
0x20d0   :  { %v8460_v57 = vsub.f32 %v8444_v26, %v8450_v36 }
0x20d1   :  { %v8466_v5 = vmul.f32 1.442695, %v8461_v6 }
0x20d2   :  { %v8464_v43 = vmul.f32 1.442695, %v8460_v57  ;;  %v8459_v61 = vpop.xlane.xlu1 %8458 }
0x20d3   :  { %11593 = vpow2.f32 %v8466_v5  ;;  %v8463_v62 = vsub.f32 %v8447_v0, %v8459_v61  ;;  %v8456_v8 = vpop.xlane.xlu0 %8455 }
0x20d4   :  { %11595 = vpow2.f32 %v8464_v43  ;;  %v8462_v41 = vsub.f32 %v8446_v29, %v8456_v8  ;;  %v13054_v29 = vld [vmem:[%s13220_s7 + $0x8] sm:$0x7f] }
0x20d5   :  { %v8470_v49 = vmul.f32 1.442695, %v8463_v62  ;;  %v8894_v32 = vrot.slane %v13054_v29, %v4309_v52 }
0x20d6   :  { %v8468_v48 = vmul.f32 1.442695, %v8462_v41 }
0x20d7   :  { %11597 = vpow2.f32 %v8470_v49 }
0x20d8   :  { %11599 = vpow2.f32 %v8468_v48 }
0x20dd   :  { %v11594_v55 = vpop.eup %11593 }
0x20de   :  { %v11596_v40 = vpop.eup %11595  ;;  %v8475_v50 = vsel %vm425_vm2, %v11594_v55, 0.0 }
0x20df   :  { %8476 = vadd.xlane.f32.xlu1 %v8475_v50  ;;  %v8472_v47 = vsel %vm425_vm2, %v11596_v40, 0.0 }
0x20e0   :  { %8473 = vadd.xlane.f32.xlu0 %v8472_v47 }
0x20e1   :  { %v11598_v44 = vpop.eup %11597 }
0x20e2   :  { %v11600_v45 = vpop.eup %11599  ;;  %v8481_v63 = vsel %vm425_vm2, %v11598_v44, 0.0 }
0x20e3   :  { %8482 = vadd.xlane.f32.xlu1 %v8481_v63  ;;  %v8478_v1 = vsel %vm425_vm2, %v11600_v45, 0.0 }
0x20e4   :  { %8479 = vadd.xlane.f32.xlu0 %v8478_v1 }
0x216c   :  { %v8477_v9 = vpop.xlane.xlu1 %8476 }
0x216d   :  { %11601 = vrcp.f32 %v8477_v9  ;;  %v8474_v2 = vpop.xlane.xlu0 %8473 }
0x216e   :  { %11603 = vrcp.f32 %v8474_v2 }
0x2170   :  { %v8483_v18 = vpop.xlane.xlu1 %8482 }
0x2171   :  { %11605 = vrcp.f32 %v8483_v18  ;;  %v8480_v35 = vpop.xlane.xlu0 %8479 }
0x2172   :  { %11607 = vrcp.f32 %v8480_v35 }
0x2177   :  { %v11602_v19 = vpop.eup %11601 }
0x2178   :  { %v11604_v20 = vpop.eup %11603  ;;  %v8487_v23 = vmul.f32 %v11602_v19, %v11594_v55 }
0x2179   :  { %v8485_v24 = vmul.f32 %v11604_v20, %v11596_v40 }
0x217a   :  { %11033 = vmatmul.mubr.msk.f32.vlgmr.msra.gmra.mrb[114].mxu0 %vm425_vm2, %v8487_v23 }
0x217b   :  { %v11606_v25 = vpop.eup %11605  ;;  %11041 = vmatpush3.msra.mxu0 %v12989_v37  ;;  %11028 = vmatmul.mubr.msk.f32.vlgmr.msra.gmra.mrb[122].mxu1 %vm425_vm2, %v8485_v24  ;;  %v9813_v37 = vld [vmem:[%s13217_s4 + $0x38] sm:$0xff] }
0x217c   :  { %v11608_v11 = vpop.eup %11607  ;;  %v8491_v13 = vmul.f32 %v11606_v25, %v11598_v44  ;;  %11036 = vmatpush3.msra.mxu1 %v12991_v7  ;;  %11042 = vmatprep.mubr.msk.f32.mxu0 %vm11681_vm1, %v11680_v17  ;;  %v9818_v25 = vld [vmem:[%s13218_s5 + $0x20] sm:$0xff] }
0x217d   :  { %v8489_v10 = vmul.f32 %v11608_v11, %v11600_v45  ;;  %11037 = vmatprep.mubr.msk.f32.mxu1 %vm11681_vm1, %v11680_v17  ;;  %11045 = vmatprep.subr.mxu1 %v9813_v37  ;;  %v9819_v11 = vld [vmem:[%s13218_s5 + $0x28] sm:$0xff] }
0x217e   :  { %11043 = vmatmul.mubr.msk.f32.vlgmr.msra.gmra.mrb[116].mxu0 %vm425_vm2, %v8491_v13  ;;  %v11359_v13 = vpack.c.bf16 %v9819_v11, %v9818_v25  ;;  %v9841_v25 = vld [vmem:[%s13219_s6 + $0xd8] sm:$0xff] }
0x217f   :  { %11038 = vmatmul.mubr.msk.f32.vlgmr.msra.gmra.mrb[124].mxu1 %vm425_vm2, %v8489_v10  ;;  %v9820_v10 = vld [vmem:[%s13218_s5 + $0x30] sm:$0xff] }
0x2180   :  { %11046 = vmatpush3.msra.mxu1 %v9813_v37  ;;  %v9821_v37 = vld [vmem:[%s13218_s5 + $0x38] sm:$0xff]  ;;  %11360 = vmatprep.subr.bf16.mxu0 %v11359_v13 }
0x2181   :  { %11362 = vmatpush3.bf16.msra.mxu0 %v11359_v13  ;;  %v9842_v13 = vld [vmem:[%s13219_s6 + $0xe0] sm:$0xff] }
0x224d   :  { %v8634_v26 = vpop.f32.mrb[114].mxu0 }
0x224e   :  { %v8561_v27 = vpop.f32.mrb[122].mxu1  ;;  %v11034_v7 = vpop.f32.mrb[115].mxu0 }
0x224f   :  { %v11029_v42 = vpop.f32.mrb[123].mxu1  ;;  %11047 = vmatprep.mubr.msk.f32.mxu1 %vm425_vm2, %v8561_v27 }
0x2250   :  { %11048 = vmatmul.mubr.msk.f32.vlgmr.msra.gmra.mrb[98].mxu1 %vm425_vm2, %v8634_v26  ;;  %v11363_v26 = vpack.c.bf16 %v9821_v37, %v9820_v10  ;;  %v9843_v10 = vld [vmem:[%s13219_s6 + $0xe8] sm:$0xff] }
0x2251   :  { %v8780_v28 = vpop.f32.mrb[116].mxu0  ;;  %v11391_v37 = vpack.c.bf16 %v9843_v10, %v9842_v13 }
0x2252   :  { %v8707_v21 = vpop.f32.mrb[124].mxu1  ;;  %v11044_v22 = vpop.f32.mrb[117].mxu0  ;;  %11364 = vmatprep.subr.bf16.mxu0 %v11363_v26 }
0x2253   :  { %v11039_v4 = vpop.f32.mrb[125].mxu1  ;;  %11050 = vmatprep.mubr.msk.f32.mxu1 %vm425_vm2, %v8707_v21  ;;  %11366 = vmatpush3.bf16.msra.mxu0 %v11363_v26  ;;  %v9844_v26 = vld [vmem:[%s13219_s6 + $0xf0] sm:$0xff] }
0x2254   :  { %11051 = vmatmul.mubr.msk.f32.gmra.mrb[100].mxu1 %vm425_vm2, %v8780_v28 }
0x2323   :  { %v11049_v3 = vpop.f32.mrb[98].mxu1 }
0x2324   :  { %v11411_v0 = vadd.f32 %v11049_v3, %v12855_v12  ;;  %v8864_v33 = vpop.f32.mrb[99].mxu1 }
0x2325   :  { %v11412_v34 = vadd.f32 %v8864_v33, %v12857_v14 }
0x2326   :  { %v8888_v6 = vadd.f32 %v11411_v0, %v12474_v30 }
0x2327   :  { %v8887_v36 = vadd.f32 %v11412_v34, %v12476_v31  ;;  %v11052_v57 = vpop.f32.mrb[100].mxu1 }
0x2328   :  { %v13062_v5 = vadd.f32 %v8894_v32, %v8888_v6  ;;  %v11413_v12 = vadd.f32 %v11052_v57, %v12859_v54  ;;  %v8874_v43 = vpop.f32.mrb[101].mxu1  ;;  %v8954_v6 = vrot.slane %v13054_v29, %v4369_v58 }
0x2329   :  { %v13065_v61 = vadd.f32 %v8894_v32, %v8887_v36  ;;  %v11414_v62 = vadd.f32 %v8874_v43, %v12861_v15 }
0x232a   :  { %v8890_v8 = vadd.f32 %v11413_v12, %v12484_v53  ;;  %v8902_v52 = vsel %vm51_vm0, %v13062_v5, 0.0 }
0x232b   :  { %v8889_v14 = vadd.f32 %v11414_v62, %v12486_v38  ;;  %8903 = vadd.xlane.f32.xlu1 %v8902_v52  ;;  %v8899_v30 = vsel %vm51_vm0, %v13065_v61, 0.0  ;;  %v8962_v62 = vrot.slane %v13054_v29, %v4377_v60  ;;  %v9830_v60 = vld [vmem:[%s13219_s6 + $0x80] sm:$0xff] }
0x232c   :  { %v13074_v31 = vadd.f32 %v8894_v32, %v8890_v8  ;;  %8900 = vadd.xlane.f32.xlu0 %v8899_v30 }
0x232d   :  { %v13076_v54 = vadd.f32 %v8894_v32, %v8889_v14 }
0x232e   :  { %v8908_v41 = vsel %vm51_vm0, %v13074_v31, 0.0 }
0x232f   :  { %8909 = vadd.xlane.f32.xlu1 %v8908_v41  ;;  %v8905_v53 = vsel %vm51_vm0, %v13076_v54, 0.0 }
0x2330   :  { %8906 = vadd.xlane.f32.xlu0 %v8905_v53 }
0x23b8   :  { %v8904_v15 = vpop.xlane.xlu1 %8903 }
0x23b9   :  { %v8912_v49 = vmul.f32 0.03125, %v8904_v15  ;;  %v8901_v38 = vpop.xlane.xlu0 %8900 }
0x23ba   :  { %v8911_v48 = vmul.f32 0.03125, %v8901_v38 }
0x23bb   :  { %v8916_v55 = vsub.f32 %v13062_v5, %v8912_v49 }
0x23bc   :  { %v8915_v40 = vsub.f32 %v13065_v61, %v8911_v48  ;;  %v8910_v50 = vpop.xlane.xlu1 %8909 }
0x23bd   :  { %v8914_v47 = vmul.f32 0.03125, %v8910_v50  ;;  %v8907_v44 = vpop.xlane.xlu0 %8906  ;;  %v8920_v45 = vmul.f32 %v8916_v55, %v8916_v55 }
0x23be   :  { %v8913_v63 = vmul.f32 0.03125, %v8907_v44  ;;  %v8919_v1 = vmul.f32 %v8915_v40, %v8915_v40  ;;  %v9833_v44 = vld [vmem:[%s13219_s6 + $0x98] sm:$0xff] }
0x23bf   :  { %v8918_v9 = vsub.f32 %v13074_v31, %v8914_v47  ;;  %v8926_v2 = vsel %vm51_vm0, %v8920_v45, 0.0  ;;  %v9832_v47 = vld [vmem:[%s13219_s6 + $0x90] sm:$0xff] }
0x23c0   :  { %v8917_v18 = vsub.f32 %v13076_v54, %v8913_v63  ;;  %8927 = vadd.xlane.f32.xlu1 %v8926_v2  ;;  %v8923_v35 = vsel %vm51_vm0, %v8919_v1, 0.0  ;;  %v11371_v45 = vpack.c.bf16 %v9833_v44, %v9832_v47  ;;  %v9834_v63 = vld [vmem:[%s13219_s6 + $0xa0] sm:$0xff]  ;;  %v9835_v1 = vld [vmem:[%s13219_s6 + $0xa8] sm:$0xff]  ;;  %v9836_v2 = vld [vmem:[%s13219_s6 + $0xb0] sm:$0xff]  ;;  %v11683_v44 = vmov 0.0|0.0  }
0x23c1   :  { %8924 = vadd.xlane.f32.xlu0 %v8923_v35  ;;  %v8922_v19 = vmul.f32 %v8918_v9, %v8918_v9  ;;  %11399 = vmatprep.subr.bf16.mxu0 %v11683_v44 }
0x23c2   :  { %v8921_v20 = vmul.f32 %v8917_v18, %v8917_v18 }
0x23c3   :  { %v8932_v23 = vsel %vm51_vm0, %v8922_v19, 0.0  ;;  %v9838_v19 = vld [vmem:[%s13219_s6 + $0xc0] sm:$0xff] }
0x23c4   :  { %8933 = vadd.xlane.f32.xlu1 %v8932_v23  ;;  %v8929_v24 = vsel %vm51_vm0, %v8921_v20, 0.0  ;;  %v9839_v20 = vld [vmem:[%s13219_s6 + $0xc8] sm:$0xff] }
0x23c5   :  { %8930 = vadd.xlane.f32.xlu0 %v8929_v24  ;;  %v11383_v23 = vpack.c.bf16 %v9839_v20, %v9838_v19  ;;  %v9840_v24 = vld [vmem:[%s13219_s6 + $0xd0] sm:$0xff]  ;;  %v9238_v20 = vstv %s9237_s25 }
0x23c6   :  { %v11387_v11 = vpack.c.bf16 %v9841_v25, %v9840_v24  ;;  %vm9239_vm8 = vcmp.eq.s32.totalorder %v11907_v46, %v9238_v20 }
0x244d   :  { %v8928_v27 = vpop.xlane.xlu1 %8927 }
0x244e   :  { %v8936_v7 = vmul.f32 0.03125, %v8928_v27  ;;  %v8925_v42 = vpop.xlane.xlu0 %8924  ;;  %v9845_v27 = vld [vmem:[%s13219_s6 + $0xf8] sm:$0xff] }
0x244f   :  { %v8935_v28 = vmul.f32 0.03125, %v8925_v42  ;;  %v8975_v42 = vrot.slane %v13054_v29, %v4389_v39 }
0x2450   :  { %v8940_v21 = vadd.f32 1e-05, %v8936_v7  ;;  %v11395_v7 = vpack.c.bf16 %v9845_v27, %v9844_v26  ;;  %v9852_v27 = vsel %vm9239_vm8, 1.0, %v11680_v17 }
0x2451   :  { %v8939_v22 = vadd.f32 1e-05, %v8935_v28  ;;  %v8934_v4 = vpop.xlane.xlu1 %8933 }
0x2452   :  { %11609 = vrsqrt.f32 %v8940_v21  ;;  %v8938_v3 = vmul.f32 0.03125, %v8934_v4  ;;  %v8931_v0 = vpop.xlane.xlu0 %8930 }
0x2453   :  { %11611 = vrsqrt.f32 %v8939_v22  ;;  %v8937_v32 = vmul.f32 0.03125, %v8931_v0 }
0x2454   :  { %v8942_v33 = vadd.f32 1e-05, %v8938_v3 }
0x2455   :  { %v8941_v34 = vadd.f32 1e-05, %v8937_v32 }
0x2456   :  { %11613 = vrsqrt.f32 %v8942_v33 }
0x2457   :  { %11615 = vrsqrt.f32 %v8941_v34 }
0x245c   :  { %v11610_v36 = vpop.eup %11609 }
0x245d   :  { %v11612_v57 = vpop.eup %11611  ;;  %v8948_v12 = vmul.f32 %v11610_v36, %v8916_v55 }
0x245e   :  { %v8947_v43 = vmul.f32 %v11612_v57, %v8915_v40  ;;  %v9831_v40 = vld [vmem:[%s13219_s6 + $0x88] sm:$0xff] }
0x245f   :  { %v8956_v8 = vmul.f32 %v8954_v6, %v8948_v12  ;;  %v11367_v50 = vpack.c.bf16 %v9831_v40, %v9830_v60 }
0x2460   :  { %v11614_v52 = vpop.eup %11613  ;;  %v8955_v14 = vmul.f32 %v8954_v6, %v8947_v43 }
0x2461   :  { %v11616_v30 = vpop.eup %11615  ;;  %v8950_v41 = vmul.f32 %v11614_v52, %v8918_v9  ;;  %v8964_v49 = vadd.f32 %v8962_v62, %v8956_v8  ;;  %11368 = vmatprep.subr.bf16.mxu1 %v11367_v50  ;;  %v11375_v9 = vpack.c.bf16 %v9835_v1, %v9834_v63  ;;  %v9214_v1 = vrot.slane %v13054_v29, %v4627_v16 }
0x2462   :  { %v8963_v53 = vadd.f32 %v8962_v62, %v8955_v14  ;;  %v8949_v15 = vmul.f32 %v11616_v30, %v8917_v18  ;;  %11370 = vmatpush3.bf16.msra.mxu1 %v11367_v50  ;;  %v9837_v18 = vld [vmem:[%s13219_s6 + $0xb8] sm:$0xff]  ;;  %s9847_s6 = sld [smem:[#allocation3 + $0x1]] }
0x2463   :  { %v8958_v38 = vmul.f32 %v8954_v6, %v8950_v41  ;;  %11372 = vmatprep.subr.bf16.mxu1 %v11371_v45  ;;  %v11379_v35 = vpack.c.bf16 %v9837_v18, %v9836_v2 }
0x2464   :  { %11061 = vmatprep.mubr.msk.f32.mxu0 %vm51_vm0, %v8963_v53  ;;  %v8957_v58 = vmul.f32 %v8954_v6, %v8949_v15 }
0x2465   :  { %11062 = vmatmul.mubr.msk.f32.vlgmr.msra.gmra.mrb[118].mxu0 %vm51_vm0, %v8964_v49  ;;  %v8966_v55 = vadd.f32 %v8962_v62, %v8958_v38 }
0x2466   :  { %v8965_v48 = vadd.f32 %v8962_v62, %v8957_v58  ;;  %11374 = vmatpush3.bf16.msra.mxu1 %v11371_v45  ;;  %v9220_v45 = vstv %s9219_s22 }
0x2467   :  { %11376 = vmatprep.subr.bf16.mxu1 %v11375_v9  ;;  %vm9221_vm4 = vcmp.eq.s32.totalorder %v11907_v46, %v9220_v45 }
0x2468   :  { %11064 = vmatprep.mubr.msk.f32.mxu0 %vm51_vm0, %v8965_v48  ;;  %s9225_s24 = sadd.s32 8, %s9847_s6  ;;  %v9846_v51 = vsel %vm9221_vm4, 1.0, %v11680_v17 }
0x2469   :  { %11065 = vmatmul.mubr.msk.f32.gmra.mrb[120].mxu0 %vm51_vm0, %v8966_v55  ;;  %v9226_v63 = vstv %s9225_s24 }
0x246a   :  { %11113 = vmatprep.mubr.msk.f32.mxu0 %vm11681_vm1, %v11680_v17  ;;  %11378 = vmatpush3.bf16.msra.mxu1 %v11375_v9  ;;  %v9232_v9 = vstv %s9231_s2  ;;  %vm9227_vm5 = vcmp.eq.s32.totalorder %v11907_v46, %v9226_v63 }
0x246b   :  { %11380 = vmatprep.subr.bf16.mxu1 %v11379_v35  ;;  %vm9233_vm6 = vcmp.eq.s32.totalorder %v11907_v46, %v9232_v9  ;;  %v9848_v16 = vsel %vm9227_vm5, 1.0, %v11680_v17 }
0x246c   :  { %v9850_v13 = vsel %vm9233_vm6, 1.0, %v11680_v17  ;;  %v9243_v10 = vsel %vm9242_vm7, %v9846_v51, %v9848_v16 }
0x246e   :  { %11382 = vmatpush3.bf16.msra.mxu1 %v11379_v35 }
0x246f   :  { %11384 = vmatprep.subr.bf16.mxu1 %v11383_v23 }
0x2472   :  { %11386 = vmatpush3.bf16.msra.mxu1 %v11383_v23 }
0x2473   :  { %11388 = vmatprep.subr.bf16.mxu1 %v11387_v11 }
0x2476   :  { %11390 = vmatpush3.bf16.msra.mxu1 %v11387_v11 }
0x2477   :  { %11392 = vmatprep.subr.bf16.mxu1 %v11391_v37 }
0x247a   :  { %11394 = vmatpush3.bf16.msra.mxu1 %v11391_v37 }
0x247b   :  { %11396 = vmatprep.subr.bf16.mxu1 %v11395_v7 }
0x247e   :  { %11398 = vmatpush3.bf16.msra.mxu1 %v11395_v7  ;;  %v9245_v7 = vsel %vm9244_vm9, %v9243_v10, %v9850_v13 }
0x2538   :  { %v11063_v28 = vpop.f32.mrb[118].mxu0 }
0x2539   :  { %v9060_v21 = vadd.f32 %v11063_v28, %v8975_v42  ;;  %v9054_v22 = vpop.f32.mrb[119].mxu0 }
0x253a   :  { %v9055_v4 = vadd.f32 %v9054_v22, %v8975_v42 }
0x253b   :  { %v9827_v3 = vmul.f32 -1.702, %v9060_v21 }
0x253c   :  { %v9826_v0 = vmul.f32 -1.702, %v9055_v4  ;;  %v11066_v32 = vpop.f32.mrb[120].mxu0 }
0x253d   :  { %v9083_v33 = vmul.f32 1.442695, %v9827_v3  ;;  %v9070_v34 = vadd.f32 %v11066_v32, %v8975_v42  ;;  %v9064_v6 = vpop.f32.mrb[121].mxu0  ;;  %v9346_v32 = vld [vmem:[%s13222_s9] sm:$0xff] }
0x253e   :  { %v9081_v36 = vmul.f32 1.442695, %v9826_v0  ;;  %v9065_v57 = vadd.f32 %v9064_v6, %v8975_v42  ;;  %v9349_v6 = vld [vmem:[%s13222_s9 + $0x18] sm:$0xff] }
0x253f   :  { %11617 = vpow2.f32 %v9083_v33  ;;  %v9829_v12 = vmul.f32 -1.702, %v9070_v34  ;;  %v9347_v33 = vld [vmem:[%s13222_s9 + $0x8] sm:$0xff] }
0x2540   :  { %11619 = vpow2.f32 %v9081_v36  ;;  %v9828_v43 = vmul.f32 -1.702, %v9065_v57 }
0x2541   :  { %v9087_v62 = vmul.f32 1.442695, %v9829_v12 }
0x2542   :  { %v9085_v8 = vmul.f32 1.442695, %v9828_v43 }
0x2543   :  { %11621 = vpow2.f32 %v9087_v62  ;;  %v9321_v62 = vld [vmem:[%s13221_s8] sm:$0x3] }
0x2544   :  { %11623 = vpow2.f32 %v9085_v8  ;;  %v9339_v8 = vrot.slane %v9321_v62, %v11813_v56 }
0x2549   :  { %v11618_v39 = vpop.eup %11617 }
0x254a   :  { %v11620_v52 = vpop.eup %11619  ;;  %v9090_v14 = vadd.f32 1.0, %v11618_v39 }
0x254b   :  { %v9089_v30 = vadd.f32 1.0, %v11620_v52 }
0x254c   :  { %11625 = vrcp.f32 %v9090_v14  ;;  %v9344_v14 = vrot.slane %v9321_v62, %v11819_v59 }
0x254d   :  { %v11622_v41 = vpop.eup %11621  ;;  %11627 = vrcp.f32 %v9089_v30 }
0x254e   :  { %v11624_v53 = vpop.eup %11623  ;;  %v9092_v15 = vadd.f32 1.0, %v11622_v41 }
0x254f   :  { %v9091_v49 = vadd.f32 1.0, %v11624_v53 }
0x2550   :  { %11629 = vrcp.f32 %v9092_v15 }
0x2551   :  { %11631 = vrcp.f32 %v9091_v49 }
0x2556   :  { %v11626_v38 = vpop.eup %11625 }
0x2557   :  { %v11628_v58 = vpop.eup %11627  ;;  %v9102_v55 = vmul.f32 %v11626_v38, %v9060_v21 }
0x2558   :  { %v9101_v48 = vmul.f32 %v11628_v58, %v9055_v4 }
0x255a   :  { %v11630_v60 = vpop.eup %11629  ;;  %11099 = vmatprep.mubr.f32.mxu1 %v9101_v48 }
0x255b   :  { %v11632_v40 = vpop.eup %11631  ;;  %11100 = vmatmul.mubr.f32.vlgmr.msra.gmra.mrb[126].mxu1 %v9102_v55  ;;  %v9104_v47 = vmul.f32 %v11630_v60, %v9070_v34  ;;  %v9348_v34 = vld [vmem:[%s13222_s9 + $0x10] sm:$0xff]  ;;  %s11684_s9 = smov [#allocation4]  }
0x255c   :  { %v9103_v50 = vmul.f32 %v11632_v40, %v9065_v57  ;;  %v11409_v36 = vpack.c.bf16 %v9349_v6, %v9348_v34  ;;  %s9431_s13 = sshll.u32 %s11684_s9, 4  ;;  %s9432_s13 = int_to_ptr.vmem [resolvable:$true] %s9431_s13 }
0x255d   :  { %s11653_s14 = scalar_lea.vmem %s9432_s13, 64  ;;  %p11658_p6 = scmp.lt.s32.totalorder %s9432_s13, %s9432_s13 }
0x255e   :  { %11102 = vmatprep.mubr.f32.mxu1 %v9103_v50  ;;  %p11654_p5 = scmp.ne.s32.totalorder %s9432_s13, %s11653_s14  ;;  %p11659_p7 = scmp.lt.s32.totalorder %s11653_s14, %s11653_s14 }
0x255f   :  { %11103 = vmatmul.mubr.f32.gmra.mrb[128].mxu1 %v9104_v47 }
0x2560   :  { %p11660_p8 = por %p11659_p7, %p11658_p6 }
0x2562   :  { %p11661_p9 = pnand %p11660_p8, %p11654_p5 }
0x262e   :  { %v11101_v2 = vpop.f32.mrb[126].mxu1 }
0x262f   :  { %v9208_v18 = vadd.f32 %v11101_v2, %v13062_v5  ;;  %v9188_v35 = vpop.f32.mrb[127].mxu1 }
0x2630   :  { %v9207_v19 = vadd.f32 %v9188_v35, %v13065_v61 }
0x2631   :  { %v9216_v23 = vadd.f32 %v9214_v1, %v9208_v18 }
0x2632   :  { %v9215_v29 = vadd.f32 %v9214_v1, %v9207_v19  ;;  %v11104_v24 = vpop.f32.mrb[128].mxu1 }
0x2633   :  { %v9210_v25 = vadd.f32 %v11104_v24, %v13074_v31  ;;  %v9198_v11 = vpop.f32.mrb[129].mxu1  ;;  %v9247_v31 = vsel %vm9246_vm10, %v9245_v7, %v9852_v27 }
0x2634   :  { %v11400_v5 = vpack.c.bf16 %v9216_v23, %v9215_v29  ;;  %v9209_v61 = vadd.f32 %v9198_v11, %v13076_v54 }
0x2635   :  { %v9218_v37 = vadd.f32 %v9214_v1, %v9210_v25 }
0x2636   :  { %v9217_v26 = vadd.f32 %v9214_v1, %v9209_v61  ;;  %11401 = vmatpush3.bf16.msra.mxu0 %v11400_v5 }
0x2637   :  { %11402 = vmatprep.subr.bf16.mxu0 %v11683_v44 }
0x2638   :  { %v11403_v42 = vpack.c.bf16 %v9218_v37, %v9217_v26 }
0x263a   :  { %11404 = vmatpush3.bf16.msra.mxu0 %v11403_v42 }
0x263b   :  { %11405 = vmatprep.subr.bf16.mxu0 %v11683_v44 }
0x263d   :  { %11114 = vmatmul.mubr.msk.f32.vlgmr.msra.gmra.mrb[122].mxu0 %vm51_vm0, %v9247_v31 }
0x263e   :  { %11124 = vmatprep.mubr.msk.f32.mxu0 %vm11681_vm1, %v11680_v17  ;;  %v11406_v17 = vpack.c.bf16 %v9347_v33, %v9346_v32 }
0x2640   :  { %11407 = vmatpush3.bf16.msra.mxu0 %v11406_v17 }
0x2641   :  { %11408 = vmatprep.subr.bf16.mxu0 %v11683_v44 }
0x2644   :  { %11410 = vmatpush3.bf16.msra.mxu0 %v11409_v36 }
0x2710   :  { %v9317_v46 = vpop.f32.mrb[122].mxu0 }
0x2711   :  { %v9323_v54 = vsel %vm9322_vm11, %v9317_v46, 0.0  ;;  %v11115_v28 = vpop.f32.mrb[123].mxu0 }
0x2712   :  { %9324 = vadd.xlane.f32.xlu0 %v9323_v54 }
0x279f   :  { %v9325_v21 = vpop.xlane.xlu0 %9324 }
0x27a0   :  { %v9326_v22 = vmul.f32 0.03125, %v9325_v21 }
0x27a2   :  { %v9327_v4 = vsub.f32 %v9317_v46, %v9326_v22 }
0x27a4   :  { %v9328_v3 = vmul.f32 %v9327_v4, %v9327_v4 }
0x27a6   :  { %v9329_v0 = vsel %vm9322_vm11, %v9328_v3, 0.0 }
0x27a7   :  { %9330 = vadd.xlane.f32.xlu1 %v9329_v0 }
0x2834   :  { %v9331_v57 = vpop.xlane.xlu1 %9330 }
0x2835   :  { %v9332_v12 = vmul.f32 0.03125, %v9331_v57 }
0x2837   :  { %v9333_v43 = vadd.f32 1e-05, %v9332_v12 }
0x2839   :  { %11633 = vrsqrt.f32 %v9333_v43 }
0x2843   :  { %v11634_v39 = vpop.eup %11633 }
0x2844   :  { %v9335_v52 = vmul.f32 %v11634_v39, %v9327_v4 }
0x2846   :  { %v9340_v30 = vmul.f32 %v9339_v8, %v9335_v52 }
0x2848   :  { %v9345_v41 = vadd.f32 %v9344_v14, %v9340_v30 }
0x284a   :  { %11125 = vmatmul.mubr.msk.f32.vlgmr.msra.gmra.mrb[124].mxu0 %vm51_vm0, %v9345_v41 }
0x291d   :  { %v9419_v53 = vpop.f32.mrb[124].mxu0 }
0x291e   :  { %9424 = vst.msk [vmem:[#allocation4] sm:$0xf] %vm9423_vm12, %v9419_v53  ;;  %v11126_v15 = vpop.f32.mrb[125].mxu0 }
0x291f   :  { %11664 = shalt.err (!%p11661_p9)
}
0x2920   :  { %s11665_s16 = scalar_lea.hbm %s13223_s10, 64 }
0x2921   :  { %p11666_p10 = scmp.ne.s32.totalorder %s13223_s10, %s11665_s16  ;;  %p11669_p11 = scmp.lt.u32.totalorder %s11665_s16, %s13223_s10 }
0x2923   :  { %p11671_p12 = pnand %p11669_p11, %p11666_p10 }
0x2925   :  { %11674 = shalt.err (!%p11671_p12)
}
0x2926   :  { %9434 = dma.vmem_to_hbm [thread:$0]  %s9432_s13, 64, %s13223_s10, [#allocation5]  }
0x2927   :  { %11677 = dma.done.wait [#allocation5], 64  }
0x2928   :  { %11678 = vsyncadd [#allocation5], 4294967232 }
0x2929   :  { %9438 = vsyncpa [#allocation5], 1 }

</bundles_post_ra>
